<compile_context>
chip_gen: v7x
topology: tpu7x:2x2x1
jax: 0.10.0
libtpu: 0.0.40
codegen_flags: <defaults>
</compile_context>

<pallas_src>
import functools
import math

import jax
import jax.numpy as jnp
from jax import lax
from jax.experimental import pallas as pl
from jax.experimental.pallas import tpu as pltpu


def _pam_kernel(x_q_ref, x_kv_ref, g_ref, gb_ref, wd_ref, bd_ref, alpha_ref,
                o_ref, qp_sc, m_sc, l_sc, acc_sc, *,
                compute_dtype, n_tokens, tk, mask_kv):
    """One (batch, Q-tile, KV-tile) grid step.

    x_q_ref / x_kv_ref : (1, C, TQ) / (1, C, TK) channel-major tiles of x.
    g_ref  : (C, C) folded energy weight  Wb^T Wc   (compute dtype)
    gb_ref : (1, C) folded energy bias    bb Wc     (f32)
    wd_ref : (C, C) value weight, PyTorch (C_out, C_in) layout (compute dtype)
    bd_ref : (C, 1) value bias (f32)
    """
    kv = pl.program_id(2)
    cdt = compute_dtype

    @pl.when(kv == 0)
    def _init():
        # Folded query projection, once per Q tile (off the per-step hot path):
        #   qp[n, k] = sum_i x[i, n] * (Wb^T Wc)[i, k] + (bb Wc)[k]
        x_q_t = x_q_ref[0].T.astype(cdt)                               # (TQ, C)
        qp = jnp.dot(x_q_t, g_ref[...],
                     preferred_element_type=jnp.float32) + gb_ref[...]
        qp_sc[...] = qp.astype(cdt)
        m_sc[...] = jnp.full(m_sc.shape, -jnp.inf, jnp.float32)
        l_sc[...] = jnp.zeros(l_sc.shape, jnp.float32)
        acc_sc[...] = jnp.zeros(acc_sc.shape, jnp.float32)

    x_kv = x_kv_ref[0].astype(cdt)                                     # (C, TK)

    # Energy tile (TQ, TK): full-C contraction, natural (TQ,C)@(C,TK) MXU feed.
    s = jnp.dot(qp_sc[...], x_kv, preferred_element_type=jnp.float32)

    if mask_kv:
        # Padded token columns (m >= n_tokens) get zero attention weight.
        col = kv * tk + lax.broadcasted_iota(jnp.int32, s.shape, 1)
        s = jnp.where(col < n_tokens, s, -jnp.inf)

    # Online softmax update (f32 stats).
    m_prev = m_sc[...]                                                 # (TQ, 1)
    m_new = jnp.maximum(m_prev, jnp.max(s, axis=-1, keepdims=True))
    corr = jnp.exp(m_prev - m_new)
    p = jnp.exp(s - m_new)                                             # (TQ, TK)
    l_sc[...] = corr * l_sc[...] + jnp.sum(p, axis=-1, keepdims=True)
    # Wd folded out of the KV loop: accumulate attn @ x^T instead of attn @ feat_d.
    # trans-B dot_general -> no materialized x_kv transpose (MXU streams it).
    acc_sc[...] = corr * acc_sc[...] + lax.dot_general(
        p.astype(cdt), x_kv, (((1,), (1,)), ((), ())),
        preferred_element_type=jnp.float32)                            # (TQ, C)
    m_sc[...] = m_new

    @pl.when(kv == pl.num_programs(2) - 1)
    def _finalize():
        # Deferred normalization + deferred value projection:
        #   feat_e = Wd @ (acc / l)^T + bd   (bd exact: softmax rows sum to 1).
        inv_l = pl.reciprocal(l_sc[...], approx=True)                  # (TQ, 1)
        ax = (acc_sc[...] * inv_l).astype(cdt)                         # (TQ, C)
        feat_e = lax.dot_general(                                      # (C, TQ)
            wd_ref[...], ax, (((1,), (1,)), ((), ())),
            preferred_element_type=jnp.float32) + bd_ref[...]
        # Lane-dense store: last dim is the 128-wide token tile.
        o_ref[0] = (alpha_ref[0] * feat_e + x_q_ref[0]).astype(o_ref.dtype)


def _hw_budgets():
    """Token-tile cap and scoped-VMEM limit sized per TPU generation."""
    cap, vmem_limit = 512, 48 * 1024 * 1024            # safe for v7x (64 MiB VMEM/core)
    try:
        if pltpu.get_tpu_info().vmem_capacity_bytes >= 100 * 1024 * 1024:
            cap, vmem_limit = 1024, 64 * 1024 * 1024   # v5e / v6e (128 MiB VMEM)
    except Exception:
        pass
    return cap, vmem_limit


def _auto_tile(n, c, x_bytes, w_bytes, cap, vmem_limit):
    """Pick the token tile (multiple of 128 when tiled) and the padded token count."""
    # Shrink the cap until a rough resident-VMEM model fits the budget:
    # double-buffered x_q / x_kv / out tiles + 2 resident (C,C) weights (2 bufs each)
    # + qp/acc scratch + (T,T) softmax temporaries.
    budget = int(0.75 * vmem_limit)
    weights = 2 * 2 * c * c * w_bytes
    t = max(128, (cap // 128) * 128)
    while t > 128:
        tiles = 3 * 2 * c * t * x_bytes
        scratch = t * c * (4 + w_bytes) + 2 * t * t * 4
        if weights + tiles + scratch <= budget:
            break
        t -= 128
    cap = t
    if n <= cap:                        # whole token axis fits one tile (full-dim block)
        return n, n
    t = cap
    while t >= 128 and n % t != 0:      # largest multiple of 128 <= cap that divides n
        t -= 128
    if t >= 128:
        return t, n
    t = cap                             # no divisor: pad N, mask the tail in-kernel
    return t, -(-n // t) * t


def position_attention_pallas(x_nchw, wb, bb, wc, bc, wd, bd, alpha, *,
                              tile_q=None, tile_kv=None,
                              compute_dtype=jnp.bfloat16):
    """DANet position attention forward.

    x_nchw: (B, C, H, W).  Conv 1x1 weights in PyTorch layout (C_out, C_in), biases (C_out,).
    `bc` provably cancels (per-row constant under softmax(dim=-1)) and is unused.
    MXU operands are fed in `compute_dtype` (default bf16) with f32 accumulation;
    pass bf16 x to also halve the dominant HBM stream.  For best MXU occupancy
    keep C a multiple of 128 (real DANet channel counts already are).
    """
    del bc  # row-constant under softmax(dim=-1); mathematically a no-op.

    B, C, H, W = x_nchw.shape
    N = H * W
    x_cn = x_nchw.reshape(B, C, N)                   # metadata-only reshape, no HBM pass

    f32 = jnp.float32
    cdt = jnp.dtype(compute_dtype)
    # Energy fold (computed once, in f32): S_eff = (x^T (Wb^T Wc) + bb Wc) @ x.
    g_tok = (wb.astype(f32).T @ wc.astype(f32)).astype(cdt)          # (C, C)
    g_bias = (bb.astype(f32) @ wc.astype(f32)).reshape(1, C)         # (1, C) f32
    wd_m = wd.astype(cdt)                                            # (C, C) PyTorch layout
    bd_col = bd.astype(f32).reshape(C, 1)                            # (C, 1) f32
    alpha1 = jnp.asarray(alpha, f32).reshape(1)

    cap, vmem_limit = _hw_budgets()
    x_bytes = jnp.dtype(x_nchw.dtype).itemsize
    if tile_q is None and tile_kv is None:
        t, n_pad = _auto_tile(N, C, x_bytes, cdt.itemsize, cap, vmem_limit)
        tq = tk = t
        # v7x has 2 TensorCores sharing the "parallel" grid axes: keep B*n_q even.
        if (B * (n_pad // tq)) % 2 == 1 and tq % 256 == 0:
            tq //= 2
    else:
        tq = int(tile_q if tile_q is not None else tile_kv)
        tk = int(tile_kv if tile_kv is not None else tile_q)
        step = math.lcm(tq, tk)
        n_pad = -(-N // step) * step
    n_q, n_kv = n_pad // tq, n_pad // tk
    mask_kv = n_pad != N
    x_in = jnp.pad(x_cn, ((0, 0), (0, 0), (0, n_pad - N))) if mask_kv else x_cn

    kernel = functools.partial(_pam_kernel, compute_dtype=cdt,
                               n_tokens=N, tk=tk, mask_kv=mask_kv)

    # Weights / biases: constant index_map -> DMA'd once, resident in VMEM.
    resident = lambda shape: pl.BlockSpec(shape, lambda b, q, kv: tuple(0 for _ in shape))

    out_cn = pl.pallas_call(
        kernel,
        out_shape=jax.ShapeDtypeStruct((B, C, n_pad), x_nchw.dtype),
        grid=(B, n_q, n_kv),
        in_specs=[
            pl.BlockSpec((1, C, tq), lambda b, q, kv: (b, 0, q)),    # x, Q view (resident over kv)
            pl.BlockSpec((1, C, tk), lambda b, q, kv: (b, 0, kv)),   # x, KV view (pipelined)
            resident((C, C)),                                        # Wb^T Wc
            resident((1, C)),                                        # bb Wc
            resident((C, C)),                                        # Wd
            resident((C, 1)),                                        # bd
            pl.BlockSpec(memory_space=pltpu.MemorySpace.SMEM),       # alpha scalar
        ],
        out_specs=pl.BlockSpec((1, C, tq), lambda b, q, kv: (b, 0, q)),
        scratch_shapes=[
            pltpu.VMEM((tq, C), cdt),    # cached folded query projection
            pltpu.VMEM((tq, 1), f32),    # running row max
            pltpu.VMEM((tq, 1), f32),    # running row sum
            pltpu.VMEM((tq, C), f32),    # un-normalized, un-projected accumulator
        ],
        compiler_params=pltpu.CompilerParams(
            dimension_semantics=("parallel", "parallel", "arbitrary"),
            vmem_limit_bytes=vmem_limit),
    )(x_in, x_in, g_tok, g_bias, wd_m, bd_col, alpha1)

    if mask_kv:
        out_cn = out_cn[:, :, :N]
    return out_cn.reshape(B, C, H, W)


def position_attention_ref(x_nchw, wb, bb, wc, bc, wd, bd, alpha):
    """Pure-JAX reference mirroring the PyTorch forward exactly (un-folded, f32)."""
    B, C, H, W = x_nchw.shape
    N = H * W
    xf = x_nchw.reshape(B, C, N)
    feat_b = jnp.einsum('oc,bcn->bon', wb, xf) + bb[None, :, None]   # (B, Cq, N)
    feat_c = jnp.einsum('oc,bcn->bon', wc, xf) + bc[None, :, None]   # (B, Cq, N)
    feat_d = jnp.einsum('oc,bcn->bon', wd, xf) + bd[None, :, None]   # (B, C,  N)
    s = jnp.einsum('bon,bom->bnm', feat_b, feat_c)                   # (B, N, N)
    attn = jax.nn.softmax(s, axis=-1)
    feat_e = jnp.einsum('bcm,bnm->bcn', feat_d, attn)                # (B, C, N)
    out = alpha * feat_e + xf
    return out.reshape(B, C, H, W)


if __name__ == "__main__":
    key = jax.random.PRNGKey(0)
    B, C, H, W = 2, 32, 16, 16            # in_channels=32 -> C/4 = 8, N = 256
    Cq = C // 4

    k_x, k_wb, k_bb, k_wc, k_bc, k_wd, k_bd = jax.random.split(key, 7)
    x = jax.random.normal(k_x, (B, C, H, W), dtype=jnp.float32)

    # Conv2d 1x1 weights in PyTorch layout (C_out, C_in).
    wb = 0.1 * jax.random.normal(k_wb, (Cq, C), dtype=jnp.float32)
    bb = 0.1 * jax.random.normal(k_bb, (Cq,), dtype=jnp.float32)
    wc = 0.1 * jax.random.normal(k_wc, (Cq, C), dtype=jnp.float32)
    bc = 0.1 * jax.random.normal(k_bc, (Cq,), dtype=jnp.float32)
    wd = 0.1 * jax.random.normal(k_wd, (C, C), dtype=jnp.float32)
    bd = 0.1 * jax.random.normal(k_bd, (C,), dtype=jnp.float32)
    # Nonzero alpha exercises the full attention path (module init is alpha=0).
    alpha = jnp.asarray(0.5, jnp.float32)

    ref = position_attention_ref(x, wb, bb, wc, bc, wd, bd, alpha)

    # 1) Default path: bf16 MXU feed, generation-aware auto tiling.
    out_bf16 = position_attention_pallas(x, wb, bb, wc, bc, wd, bd, alpha)
    jax.block_until_ready(out_bf16)
    assert jnp.allclose(out_bf16, ref, atol=2e-2, rtol=2e-2), "bf16 path mismatch"

    # 2) Multi-tile online-softmax path (grid (2, 2, 2)), f32 feed, strict tolerance.
    out_f32 = position_attention_pallas(x, wb, bb, wc, bc, wd, bd, alpha,
                                        tile_q=128, tile_kv=128,
                                        compute_dtype=jnp.float32)
    jax.block_until_ready(out_f32)
    assert jnp.allclose(out_f32, ref, atol=2e-3, rtol=2e-3), "f32 tiled path mismatch"

    # 3) Ragged token count: N = 144 is padded to 256 and the tail KV columns are
    #    masked in-kernel (exercises the fixed _pick_tile fallback).
    H2 = W2 = 12
    x2 = jax.random.normal(jax.random.PRNGKey(1), (B, C, H2, W2), dtype=jnp.float32)
    ref2 = position_attention_ref(x2, wb, bb, wc, bc, wd, bd, alpha)
    out2 = position_attention_pallas(x2, wb, bb, wc, bc, wd, bd, alpha,
                                     tile_q=128, tile_kv=128,
                                     compute_dtype=jnp.float32)
    jax.block_until_ready(out2)
    assert jnp.allclose(out2, ref2, atol=2e-3, rtol=2e-3), "padded/masked path mismatch"

    print("KERNEL_OK")
</pallas_src>

<mosaic_0001>
module attributes {stable_mosaic.version = 11 : i64} {
  func.func @_pam_kernel(%arg0: i32, %arg1: i32, %arg2: i32, %arg3: memref<1x32x256xf32, #tpu.memory_space<vmem>>, %arg4: memref<1x32x256xf32, #tpu.memory_space<vmem>>, %arg5: memref<32x32xbf16, #tpu.memory_space<vmem>>, %arg6: memref<1x32xf32, #tpu.memory_space<vmem>>, %arg7: memref<32x32xbf16, #tpu.memory_space<vmem>>, %arg8: memref<32x1xf32, #tpu.memory_space<vmem>>, %arg9: memref<1xf32, #tpu.memory_space<smem>>, %arg10: memref<1x32x256xf32, #tpu.memory_space<vmem>>, %arg11: memref<256x32xbf16, #tpu.memory_space<vmem>>, %arg12: memref<256x1xf32, #tpu.memory_space<vmem>>, %arg13: memref<256x1xf32, #tpu.memory_space<vmem>>, %arg14: memref<256x32xf32, #tpu.memory_space<vmem>>) attributes {dimension_semantics = [#tpu.dimension_semantics<parallel>, #tpu.dimension_semantics<parallel>, #tpu.dimension_semantics<arbitrary>], iteration_bounds = array<i64: 2, 1, 1>, scalar_prefetch = 0 : i64, scratch_operands = 4 : i64, tpu.core_type = #tpu.core_type<tc>, window_params = [{transform_indices = @transform_0, window_bounds = array<i64: 1, 32, 256>}, {transform_indices = @transform_1, window_bounds = array<i64: 1, 32, 256>}, {pipeline_mode = #tpu.pipeline_mode<synchronous>, transform_indices = @transform_2, window_bounds = array<i64: 32, 32>}, {pipeline_mode = #tpu.pipeline_mode<synchronous>, transform_indices = @transform_3, window_bounds = array<i64: 1, 32>}, {pipeline_mode = #tpu.pipeline_mode<synchronous>, transform_indices = @transform_4, window_bounds = array<i64: 32, 32>}, {pipeline_mode = #tpu.pipeline_mode<synchronous>, transform_indices = @transform_5, window_bounds = array<i64: 32, 1>}, {transform_indices = @transform_6, window_bounds = array<i64: 1>}, {transform_indices = @transform_7, window_bounds = array<i64: 1, 32, 256>}]} {
    %c0_i32 = arith.constant 0 : i32
    %0 = arith.cmpi eq, %arg2, %c0_i32 : i32
    %1 = arith.extui %0 : i1 to i32
    %c0_i32_0 = arith.constant 0 : i32
    %2 = arith.cmpi ne, %1, %c0_i32_0 : i32
    scf.if %2 {
      %c0_22 = arith.constant 0 : index
      %c0_23 = arith.constant 0 : index
      %c0_24 = arith.constant 0 : index
      %34 = vector.load %arg3[%c0_22, %c0_23, %c0_24] : memref<1x32x256xf32, #tpu.memory_space<vmem>>, vector<1x32x256xf32>
      %35 = vector.shape_cast %34 : vector<1x32x256xf32> to vector<32x256xf32>
      %36 = tpu.transpose %35, [1, 0] : vector<32x256xf32> -> vector<256x32xf32>
      %37 = arith.truncf %36 : vector<256x32xf32> to vector<256x32xbf16>
      %c0_25 = arith.constant 0 : index
      %c0_26 = arith.constant 0 : index
      %38 = vector.load %arg5[%c0_25, %c0_26] : memref<32x32xbf16, #tpu.memory_space<vmem>>, vector<32x32xbf16>
      %cst_27 = arith.constant dense<0.000000e+00> : vector<256x32xf32>
      %39 = tpu.matmul %37, %38, %cst_27 {dimension_numbers = #tpu.dot_dimension_numbers<[1], [0], [0], [1], [0, 0, 1, 1], [], []>} : vector<256x32xbf16>, vector<32x32xbf16>, vector<256x32xf32> -> vector<256x32xf32>
      %c0_28 = arith.constant 0 : index
      %c0_29 = arith.constant 0 : index
      %40 = vector.load %arg6[%c0_28, %c0_29] : memref<1x32xf32, #tpu.memory_space<vmem>>, vector<1x32xf32>
      %41 = vector.broadcast %40 : vector<1x32xf32> to vector<256x32xf32>
      %42 = arith.addf %39, %41 : vector<256x32xf32>
      %43 = arith.truncf %42 : vector<256x32xf32> to vector<256x32xbf16>
      %c0_30 = arith.constant 0 : index
      %c0_31 = arith.constant 0 : index
      %44 = vector.load %arg11[%c0_30, %c0_31] : memref<256x32xbf16, #tpu.memory_space<vmem>>, vector<256x32xbf16>
      tpu.vector_store %arg11[%c0_30, %c0_31], %43 {strides = array<i32>} : memref<256x32xbf16, #tpu.memory_space<vmem>>, vector<256x32xbf16>,
      %cst_32 = arith.constant 0xFF800000 : f32
      %45 = vector.broadcast %cst_32 : f32 to vector<256x1xf32>
      %c0_33 = arith.constant 0 : index
      %c0_34 = arith.constant 0 : index
      %46 = vector.load %arg12[%c0_33, %c0_34] : memref<256x1xf32, #tpu.memory_space<vmem>>, vector<256x1xf32>
      tpu.vector_store %arg12[%c0_33, %c0_34], %45 {strides = array<i32>} : memref<256x1xf32, #tpu.memory_space<vmem>>, vector<256x1xf32>,
      %cst_35 = arith.constant 0.000000e+00 : f32
      %47 = vector.broadcast %cst_35 : f32 to vector<256x1xf32>
      %c0_36 = arith.constant 0 : index
      %c0_37 = arith.constant 0 : index
      %48 = vector.load %arg13[%c0_36, %c0_37] : memref<256x1xf32, #tpu.memory_space<vmem>>, vector<256x1xf32>
      tpu.vector_store %arg13[%c0_36, %c0_37], %47 {strides = array<i32>} : memref<256x1xf32, #tpu.memory_space<vmem>>, vector<256x1xf32>,
      %cst_38 = arith.constant 0.000000e+00 : f32
      %49 = vector.broadcast %cst_38 : f32 to vector<256x32xf32>
      %c0_39 = arith.constant 0 : index
      %c0_40 = arith.constant 0 : index
      %50 = vector.load %arg14[%c0_39, %c0_40] : memref<256x32xf32, #tpu.memory_space<vmem>>, vector<256x32xf32>
      tpu.vector_store %arg14[%c0_39, %c0_40], %49 {strides = array<i32>} : memref<256x32xf32, #tpu.memory_space<vmem>>, vector<256x32xf32>,
    } else {
    }
    %c0 = arith.constant 0 : index
    %c0_1 = arith.constant 0 : index
    %c0_2 = arith.constant 0 : index
    %3 = vector.load %arg4[%c0, %c0_1, %c0_2] : memref<1x32x256xf32, #tpu.memory_space<vmem>>, vector<1x32x256xf32>
    %4 = vector.shape_cast %3 : vector<1x32x256xf32> to vector<32x256xf32>
    %5 = arith.truncf %4 : vector<32x256xf32> to vector<32x256xbf16>
    %c0_3 = arith.constant 0 : index
    %c0_4 = arith.constant 0 : index
    %6 = vector.load %arg11[%c0_3, %c0_4] : memref<256x32xbf16, #tpu.memory_space<vmem>>, vector<256x32xbf16>
    %cst = arith.constant dense<0.000000e+00> : vector<256x256xf32>
    %7 = tpu.matmul %6, %5, %cst {dimension_numbers = #tpu.dot_dimension_numbers<[1], [0], [0], [1], [0, 0, 1, 1], [], []>} : vector<256x32xbf16>, vector<32x256xbf16>, vector<256x256xf32> -> vector<256x256xf32>
    %c0_5 = arith.constant 0 : index
    %c0_6 = arith.constant 0 : index
    %8 = vector.load %arg12[%c0_5, %c0_6] : memref<256x1xf32, #tpu.memory_space<vmem>>, vector<256x1xf32>
    %cst_7 = arith.constant dense<0xFF800000> : vector<256xf32>
    %9 = vector.multi_reduction <maximumf>, %7, %cst_7 [1] : vector<256x256xf32> to vector<256xf32>
    %10 = vector.shape_cast %9 : vector<256xf32> to vector<256x1xf32>
    %11 = arith.maximumf %8, %10 : vector<256x1xf32>
    %12 = arith.subf %8, %11 : vector<256x1xf32>
    %13 = math.exp %12 : vector<256x1xf32>
    %14 = vector.broadcast %11 : vector<256x1xf32> to vector<256x256xf32>
    %15 = arith.subf %7, %14 : vector<256x256xf32>
    %16 = math.exp %15 : vector<256x256xf32>
    %c0_8 = arith.constant 0 : index
    %c0_9 = arith.constant 0 : index
    %17 = vector.load %arg13[%c0_8, %c0_9] : memref<256x1xf32, #tpu.memory_space<vmem>>, vector<256x1xf32>
    %18 = arith.mulf %13, %17 : vector<256x1xf32>
    %cst_10 = arith.constant dense<0.000000e+00> : vector<256xf32>
    %19 = vector.multi_reduction <add>, %16, %cst_10 [1] : vector<256x256xf32> to vector<256xf32>
    %20 = vector.shape_cast %19 : vector<256xf32> to vector<256x1xf32>
    %21 = arith.addf %18, %20 : vector<256x1xf32>
    %c0_11 = arith.constant 0 : index
    %c0_12 = arith.constant 0 : index
    %22 = vector.load %arg13[%c0_11, %c0_12] : memref<256x1xf32, #tpu.memory_space<vmem>>, vector<256x1xf32>
    tpu.vector_store %arg13[%c0_11, %c0_12], %21 {strides = array<i32>} : memref<256x1xf32, #tpu.memory_space<vmem>>, vector<256x1xf32>,
    %c0_13 = arith.constant 0 : index
    %c0_14 = arith.constant 0 : index
    %23 = vector.load %arg14[%c0_13, %c0_14] : memref<256x32xf32, #tpu.memory_space<vmem>>, vector<256x32xf32>
    %24 = vector.broadcast %13 : vector<256x1xf32> to vector<256x32xf32>
    %25 = arith.mulf %24, %23 : vector<256x32xf32>
    %26 = arith.truncf %16 : vector<256x256xf32> to vector<256x256xbf16>
    %cst_15 = arith.constant dense<0.000000e+00> : vector<256x32xf32>
    %27 = tpu.matmul %26, %5, %cst_15 {dimension_numbers = #tpu.dot_dimension_numbers<[1], [1], [0], [0], [0, 0, 1, 0], [], []>} : vector<256x256xbf16>, vector<32x256xbf16>, vector<256x32xf32> -> vector<256x32xf32>
    %28 = arith.addf %25, %27 : vector<256x32xf32>
    %c0_16 = arith.constant 0 : index
    %c0_17 = arith.constant 0 : index
    %29 = vector.load %arg14[%c0_16, %c0_17] : memref<256x32xf32, #tpu.memory_space<vmem>>, vector<256x32xf32>
    tpu.vector_store %arg14[%c0_16, %c0_17], %28 {strides = array<i32>} : memref<256x32xf32, #tpu.memory_space<vmem>>, vector<256x32xf32>,
    %c0_18 = arith.constant 0 : index
    %c0_19 = arith.constant 0 : index
    %30 = vector.load %arg12[%c0_18, %c0_19] : memref<256x1xf32, #tpu.memory_space<vmem>>, vector<256x1xf32>
    tpu.vector_store %arg12[%c0_18, %c0_19], %11 {strides = array<i32>} : memref<256x1xf32, #tpu.memory_space<vmem>>, vector<256x1xf32>,
    %c0_i32_20 = arith.constant 0 : i32
    %31 = arith.cmpi eq, %arg2, %c0_i32_20 : i32
    %32 = arith.extui %31 : i1 to i32
    %c0_i32_21 = arith.constant 0 : i32
    %33 = arith.cmpi ne, %32, %c0_i32_21 : i32
    scf.if %33 {
      %c0_22 = arith.constant 0 : index
      %c0_23 = arith.constant 0 : index
      %34 = vector.load %arg13[%c0_22, %c0_23] : memref<256x1xf32, #tpu.memory_space<vmem>>, vector<256x1xf32>
      %35 = tpu.reciprocal %34 {approx = true} : vector<256x1xf32> -> vector<256x1xf32>
      %c0_24 = arith.constant 0 : index
      %c0_25 = arith.constant 0 : index
      %36 = vector.load %arg14[%c0_24, %c0_25] : memref<256x32xf32, #tpu.memory_space<vmem>>, vector<256x32xf32>
      %37 = vector.broadcast %35 : vector<256x1xf32> to vector<256x32xf32>
      %38 = arith.mulf %36, %37 : vector<256x32xf32>
      %39 = arith.truncf %38 : vector<256x32xf32> to vector<256x32xbf16>
      %c0_26 = arith.constant 0 : index
      %c0_27 = arith.constant 0 : index
      %40 = vector.load %arg7[%c0_26, %c0_27] : memref<32x32xbf16, #tpu.memory_space<vmem>>, vector<32x32xbf16>
      %cst_28 = arith.constant dense<0.000000e+00> : vector<32x256xf32>
      %41 = tpu.matmul %40, %39, %cst_28 {dimension_numbers = #tpu.dot_dimension_numbers<[1], [1], [0], [0], [0, 0, 1, 0], [], []>} : vector<32x32xbf16>, vector<256x32xbf16>, vector<32x256xf32> -> vector<32x256xf32>
      %c0_29 = arith.constant 0 : index
      %c0_30 = arith.constant 0 : index
      %42 = vector.load %arg8[%c0_29, %c0_30] : memref<32x1xf32, #tpu.memory_space<vmem>>, vector<32x1xf32>
      %43 = vector.broadcast %42 : vector<32x1xf32> to vector<32x256xf32>
      %44 = arith.addf %41, %43 : vector<32x256xf32>
      %c0_31 = arith.constant 0 : index
      %45 = memref.load %arg9[%c0_31] : memref<1xf32, #tpu.memory_space<smem>>
      %46 = vector.broadcast %45 : f32 to vector<32x256xf32>
      %47 = arith.mulf %46, %44 : vector<32x256xf32>
      %c0_32 = arith.constant 0 : index
      %c0_33 = arith.constant 0 : index
      %c0_34 = arith.constant 0 : index
      %48 = vector.load %arg3[%c0_32, %c0_33, %c0_34] : memref<1x32x256xf32, #tpu.memory_space<vmem>>, vector<1x32x256xf32>
      %49 = vector.shape_cast %48 : vector<1x32x256xf32> to vector<32x256xf32>
      %50 = arith.addf %47, %49 : vector<32x256xf32>
      %c0_35 = arith.constant 0 : index
      %c0_36 = arith.constant 0 : index
      %c0_37 = arith.constant 0 : index
      %51 = vector.load %arg10[%c0_35, %c0_36, %c0_37] : memref<1x32x256xf32, #tpu.memory_space<vmem>>, vector<1x32x256xf32>
      %52 = vector.shape_cast %51 : vector<1x32x256xf32> to vector<32x256xf32>
      %53 = vector.shape_cast %50 : vector<32x256xf32> to vector<1x32x256xf32>
      tpu.vector_store %arg10[%c0_35, %c0_36, %c0_37], %53 {strides = array<i32>} : memref<1x32x256xf32, #tpu.memory_space<vmem>>, vector<1x32x256xf32>,
    } else {
    }
    return
  }
  func.func @transform_0(%arg0: i32, %arg1: i32, %arg2: i32) -> (i32, i32, i32) {
    %c0_i32 = arith.constant 0 : i32
    %c0_i32_0 = arith.constant 0 : i32
    return %arg0, %c0_i32, %arg1 : i32, i32, i32
  }
  func.func @transform_1(%arg0: i32, %arg1: i32, %arg2: i32) -> (i32, i32, i32) {
    %c0_i32 = arith.constant 0 : i32
    %c0_i32_0 = arith.constant 0 : i32
    return %arg0, %c0_i32, %arg2 : i32, i32, i32
  }
  func.func @transform_2(%arg0: i32, %arg1: i32, %arg2: i32) -> (i32, i32) {
    %c0_i32 = arith.constant 0 : i32
    %c0_i32_0 = arith.constant 0 : i32
    %c0_i32_1 = arith.constant 0 : i32
    return %c0_i32, %c0_i32_0 : i32, i32
  }
  func.func @transform_3(%arg0: i32, %arg1: i32, %arg2: i32) -> (i32, i32) {
    %c0_i32 = arith.constant 0 : i32
    %c0_i32_0 = arith.constant 0 : i32
    %c0_i32_1 = arith.constant 0 : i32
    return %c0_i32, %c0_i32_0 : i32, i32
  }
  func.func @transform_4(%arg0: i32, %arg1: i32, %arg2: i32) -> (i32, i32) {
    %c0_i32 = arith.constant 0 : i32
    %c0_i32_0 = arith.constant 0 : i32
    %c0_i32_1 = arith.constant 0 : i32
    return %c0_i32, %c0_i32_0 : i32, i32
  }
  func.func @transform_5(%arg0: i32, %arg1: i32, %arg2: i32) -> (i32, i32) {
    %c0_i32 = arith.constant 0 : i32
    %c0_i32_0 = arith.constant 0 : i32
    %c0_i32_1 = arith.constant 0 : i32
    return %c0_i32, %c0_i32_0 : i32, i32
  }
  func.func @transform_6(%arg0: i32, %arg1: i32, %arg2: i32) -> i32 {
    %c0_i32 = arith.constant 0 : i32
    %c0_i32_0 = arith.constant 0 : i32
    return %c0_i32 : i32
  }
  func.func @transform_7(%arg0: i32, %arg1: i32, %arg2: i32) -> (i32, i32, i32) {
    %c0_i32 = arith.constant 0 : i32
    %c0_i32_0 = arith.constant 0 : i32
    return %arg0, %c0_i32, %arg1 : i32, i32, i32
  }
}

</mosaic_0001>

<bundles_post_ra>
// kernel: tpu_custom_call.1
= control target key start
LH: loop header
LB: loop body
LE: loop exit
PB: predicated region body
PF: predicated region fallthrough
CT: control target
= control target key end

     0   :  { %s5382_s0 = inlined_call_operand.hbm [shape: f32[2,32,256], index: 0, kind: input, shape index: {}]   ;;  %s5383_s1 = inlined_call_operand.hbm [shape: f32[2,32,256], index: 1, kind: input, shape index: {}]   ;;  %s5384_s2 = inlined_call_operand.vmem [shape: bf16[32,32], index: 2, kind: input, shape index: {}]   ;;  %s5385_s3 = inlined_call_operand.vmem [shape: f32[1,32], index: 3, kind: input, shape index: {}]   ;;  %s5386_s4 = inlined_call_operand.vmem [shape: bf16[32,32], index: 4, kind: input, shape index: {}]   ;;  %s5387_s5 = inlined_call_operand.vmem [shape: f32[32,1], index: 5, kind: input, shape index: {}]   ;;  %s5388_s6 = inlined_call_operand.<no memory space> [shape: f32[1], index: 6, kind: input, shape index: {}]   ;;  %s5389_s7 = inlined_call_operand.hbm [shape: f32[2,32,256], index: 7, kind: output, shape index: {}]  }
   0x1   :  { %5457 = sst [smem:[#allocation77_spill]] %s5382_s0 }
   0x2   :  { %12 = sst [smem:[#allocation6]] %s5388_s6 }
   0x3   :  { %13 = vsyncpa [#allocation8], 0 }
   0x4   :  { %15 = vsyncpa [#allocation8 + $0x1], 0 }
   0x5   :  { %16 = vsyncpa [#allocation11], 0 }
   0x6   :  { %18 = vsyncpa [#allocation11 + $0x1], 0 }
   0x7   :  { %19 = vsyncpa [#allocation9], 0 }
   0x8   :  { %21 = vsyncpa [#allocation9 + $0x1], 0  ;;  %s3743_s26 = smov 0   ;;  %s3745_s27 = smov 0  }
   0x9   :  { %s3747_s28 = smov 0   ;;  %s3749_s29 = smov 0  }
   0xa   :  { %s3751_s30 = smov 0   ;;  %s3753_s8 = smov 0  }
   0xb LB: > { %s3059_s6 = sadd.s32 4294967295, %s3688_s8   ;;  %s3060_s9 = sadd.s32 4294967294, %s3688_s8   ;;  %s3688_s8 = sphi %s3753_s8, %s27_s8   ;;  %s3684_s30 = sphi %s3751_s30, %s5631_s30   ;;  %s3680_s29 = sphi %s3749_s29, %s5630_s29   ;;  %s3676_s28 = sphi %s3747_s28, %s5629_s28   ;;  %s3672_s27 = sphi %s3745_s27, %s5628_s27   ;;  %s3668_s26 = sphi %s3743_s26, %s5627_s26  }
   0xc   : > { %s46_s10 = sadd.s32 1, %s3684_s30  ;;  %s55_s11 = sadd.s32 1, %s3676_s28 }
   0xd   : > { %p48_p0 = scmp.ge.s32.totalorder %s46_s10, 2  ;;  %p62_p1 = scmp.ne.s32.totalorder %s3676_s28, %s3672_s27 }
   0xe   : > { %p63_p2 = scmp.eq.s32.totalorder %s3688_s8, 0  ;;  %p68_p3 = scmp.ne.s32.totalorder %s3672_s27, %s3668_s26 }
   0xf   : > { %s5633_s10 = smov (%p48_p0, %s46_s10), 0  ;;  %p69_p5 = scmp.eq.s32.totalorder %s3059_s6, 0 }
  0x10   : > { %5458 = sst [smem:[#allocation16_spill]] %s5633_s10  ;;  %p3784_p4 = por %p63_p2, %p62_p1 }
  0x11   : > { %s50_s13 = ssub.s32 %s3684_s30, %s5633_s10  ;;  %p227_p6 = scmp.eq.s32.totalorder %s3059_s6, 1 }
  0x12   : > { %p53_p7 = scmp.eq.s32.totalorder %s50_s13, 0  ;;  %p3790_p8 = por %p69_p5, %p68_p3 }
  0x13   : > { %p3794_p9 = por %p227_p6, %p62_p1  ;;  %p233_p10 = scmp.eq.s32.totalorder %s3060_s9, 1 }
  0x14   : > { %s5460_s14 = scalar_select %p3790_p8, 1, 0 }
  0x15   : > { %s5461_s15 = scalar_select %p3794_p9, 1, 0 }
  0x16   : > { %s3799_s16 = scalar_select %p53_p7, %s3676_s28, %s55_s11  }
  0x17   : > { %p3801_p11 = por %p233_p10, %p68_p3  ;;  %p3223_p13 = scmp.lt.s32.totalorder %s3688_s8, 2 }
  0x18   : > { %s3808_s18 = sand.u32 1, %s3676_s28   ;;  %s3117_s20 = sshll.u32 %s3684_s30, 10 }
  0x19   : > { %s5462_s17 = scalar_select %p3801_p11, 1, 0 }
  0x1a   : > { %s5390_s19 = sshll.u32 %s3808_s18, 6  ;;  %s5463_s0 = sld [smem:[#allocation77_spill]] }
  0x1b   : > { %s272_s24 = scalar_lea.vmem [#allocation7], %s5390_s19  ;;  %p3825_p0 = pnand %p3223_p13, %p3784_p4 }
  0x1c   : > { %s281_s25 = sshll.u32 %s272_s24, 4  ;;  %s269_s9 = scalar_lea.sflag [#allocation8], %s3808_s18  ;;  %s3821_s25 = int_to_ptr.vmem [resolvable:$true] %s281_s25 }
  0x1d   : > { %p3544_p3 = pneg %p3825_p0 }
  0x20   : > { %s3817_s23 = scalar_lea.hbm %s5463_s0, %s3117_s20  ;;  %s3547_s12 = scalar_lea.hbm %s5463_s0, 2048 }
  0x21   : > { %s3542_s11 = scalar_lea.hbm %s3817_s23, 1024  ;;  %p3548_p4 = scmp.lt.u32.totalorder %s3817_s23, %s5463_s0 }
  0x22   : > { %p3543_p2 = scmp.ne.s32.totalorder %s3817_s23, %s3542_s11  ;;  %p3549_p7 = scmp.lt.u32.totalorder %s3547_s12, %s3542_s11 }
  0x23   : > { %p3551_p13 = scmp.lt.u32.totalorder %s3542_s11, %s3817_s23 }
  0x24   : > { %p3545_p5 = pnand %p3544_p3, %p3543_p2  ;;  %p3550_p10 = por %p3549_p7, %p3548_p4 }
  0x26   : > { %p3546_p6 = pneg %p3545_p5  ;;  %p3552_p12 = por %p3551_p13, %p3550_p10 }
  0x28   : > { %p3553_p1 = pnand %p3552_p12, %p3546_p6 }
  0x2a   : > { %3556 = shalt.err (!%p3553_p1)
}
  0x2b   : > { %s3557_s19 = scalar_lea.vmem %s3821_s25, 1024  ;;  %s3690_s13 = smov [#allocation7]  }
  0x2c   : > { %p3558_p2 = scmp.ne.s32.totalorder %s3821_s25, %s3557_s19  ;;  %s3562_s21 = sshll.u32 %s3690_s13, 4  ;;  %s3563_s21 = int_to_ptr.vmem [resolvable:$false] %s3562_s21 }
  0x2d   : > { %s3564_s22 = scalar_lea.vmem %s3563_s21, 2048  ;;  %p3565_p9 = scmp.lt.s32.totalorder %s3821_s25, %s3563_s21 }
  0x2e   : > { %p3560_p5 = pnand %p3558_p2, %p3544_p3  ;;  %p3566_p4 = scmp.lt.s32.totalorder %s3564_s22, %s3557_s19 }
  0x30   : > { %p3561_p11 = pneg %p3560_p5  ;;  %p3567_p7 = por %p3566_p4, %p3565_p9 }
  0x32   : > { %p3568_p10 = pnand %p3567_p7, %p3561_p11 }
  0x34   : > { %3571 = shalt.err (!%p3568_p10)
}
  0x35   : > { %s5393_s11 = smov 256   ;;  %s3692_s12 = smov 16  }
  0x36   : > { %3215 = dma.hbm_to_vmem [thread:$0]  (!%p3825_p0), %s3817_s23, 1024, %s3821_s25, %s269_s9, %s5393_s11, %s5393_s11, %s3692_s12  }
  0x37   : > { %p312_p9 = scmp.lt.s32.totalorder %s3688_s8, 3  ;;  %s3867_s13 = scalar_lea.hbm %s5383_s1, %s3117_s20 }
  0x38   : > { %p5465_p11 = scmp.ge.s32.totalorder %s3688_s8, 1  ;;  %s5467_s22 = sshll.u32 %s3808_s18, 6 }
  0x39   : > { %s295_s0 = scalar_lea.vmem [#allocation10], %s5467_s22  ;;  %s292_s23 = scalar_lea.sflag [#allocation11], %s3808_s18 }
  0x3a   : > { %p3871_p12 = pnand %p5465_p11, %p312_p9  ;;  %s304_s10 = sshll.u32 %s295_s0, 4  ;;  %s3877_s10 = int_to_ptr.vmem [resolvable:$true] %s304_s10 }
  0x3b   : > { %s3572_s25 = scalar_lea.hbm %s3867_s13, 1024  ;;  %s3577_s19 = scalar_lea.hbm %s5383_s1, 2048 }
  0x3c   : > { %p3573_p1 = scmp.ne.s32.totalorder %s3867_s13, %s3572_s25  ;;  %p3578_p2 = scmp.lt.u32.totalorder %s3867_s13, %s5383_s1 }
  0x3d   : > { %p3579_p5 = scmp.lt.u32.totalorder %s3577_s19, %s3572_s25  ;;  %p3581_p7 = scmp.lt.u32.totalorder %s3572_s25, %s3867_s13 }
  0x3e   : > { %p3575_p6 = pnand %p3573_p1, %p3544_p3 }
  0x3f   : > { %p3580_p4 = por %p3579_p5, %p3578_p2 }
  0x40   : > { %p3576_p13 = pneg %p3575_p6 }
  0x41   : > { %p3582_p10 = por %p3581_p7, %p3580_p4 }
  0x43   : > { %p3583_p9 = pnand %p3582_p10, %p3576_p13 }
  0x45   : > { %3586 = shalt.err (!%p3583_p9)
}
  0x46   : > { %s3587_s0 = scalar_lea.vmem %s3877_s10, 1024  ;;  %s3693_s22 = smov [#allocation10]  }
  0x47   : > { %p3588_p11 = scmp.ne.s32.totalorder %s3877_s10, %s3587_s0  ;;  %s3592_s20 = sshll.u32 %s3693_s22, 4  ;;  %s3593_s20 = int_to_ptr.vmem [resolvable:$false] %s3592_s20 }
  0x48   : > { %s3594_s11 = scalar_lea.vmem %s3593_s20, 2048  ;;  %p3595_p8 = scmp.lt.s32.totalorder %s3877_s10, %s3593_s20 }
  0x49   : > { %p3590_p1 = pnand %p3588_p11, %p3544_p3  ;;  %p3596_p2 = scmp.lt.s32.totalorder %s3594_s11, %s3587_s0 }
  0x4b   : > { %p3591_p6 = pneg %p3590_p1  ;;  %p3597_p5 = por %p3596_p2, %p3595_p8 }
  0x4d   : > { %p3598_p4 = pnand %p3597_p5, %p3591_p6 }
  0x4f   : > { %3601 = shalt.err (!%p3598_p4)
}
  0x50   : > { %s5468_s25 = smov 256   ;;  %316 = sbr.rel (%p3871_p12) target bundleno = 1752 (0x6d8), region = 48 }
  0x51   : > { %3218 = dma.hbm_to_vmem [thread:$0]  (!%p3825_p0), %s3867_s13, 1024, %s3877_s10, %s292_s23, %s5468_s25, %s5468_s25, %s3692_s12  }
  0x57   : > { %s3911_s9 = sand.u32 1, %s3672_s27   ;;  %p5469_p8 = scmp.ne.s32.totalorder %s5460_s14, 0 }
  0x58   : > { %s3914_s19 = sshll.u32 %s3911_s9, 6  ;;  %s319_s6 = scalar_lea.sflag [#allocation8], %s3911_s9 }
  0x59   : > { %s3918_s24 = scalar_lea.vmem [#allocation7], %s3914_s19 }
  0x5a   : > { %3655 = dma.done.wait (%p5469_p8), %s319_s6, 1024  }
  0x5b   : > { %3657 = vsyncadd (%p5469_p8), %s319_s6, 4294966272  ;;  %s328_s10 = scalar_lea.sflag [#allocation11], %s3911_s9  ;;  %s3926_s18 = scalar_lea.vmem [#allocation10], %s3914_s19 }
  0x5c   : > { %3659 = dma.done.wait (%p5469_p8), %s328_s10, 1024  }
  0x5d   : > { %3661 = vsyncadd (%p5469_p8), %s328_s10, 4294966272  ;;  %v375_v0 = vld [vmem:[%s3918_s24] sm:$0xff]  ;;  %v376_v1 = vld [vmem:[%s3918_s24 + $0x8] sm:$0xff]  ;;  %vm486_vm0 = vcmask 261120   ;;  %vm728_vm1 = vcmask 7168   ;;  %s2893_s0 = sld [smem:[#allocation6]] }
  0x5e   : > { %383 = vxpose.xlu0.b32.start [1/4] (short) %v375_v0, 128  ;;  %v377_v2 = vld [vmem:[%s3918_s24 + $0x10] sm:$0xff]  ;;  %415 = vxpose.xlu1.b32.start [1/4] (short) %v376_v1, 128  ;;  %v378_v3 = vld [vmem:[%s3918_s24 + $0x18] sm:$0xff]  ;;  %v3282_v4 = vld [vmem:[%s5384_s2] sm:$0xff]   ;;  %s5312_s22 = scalar_lea.vmem [#allocation12], %s3914_s19  ;;  %s3119_s19 = sshll.u32 %s3680_s29, 10 }
  0x5f   : > { %v379_v5 = vld [vmem:[%s3918_s24 + $0x20] sm:$0xff]  ;;  %v380_v6 = vld [vmem:[%s3918_s24 + $0x28] sm:$0xff]  ;;  %3158 = vmatprep.subr.bf16.mxu0 %v3282_v4  ;;  %3194 = vmatprep.subr.bf16.mxu1 %v3282_v4  ;;  %v381_v8 = vld [vmem:[%s3918_s24 + $0x30] sm:$0xff]  ;;  %s2943_s20 = sshll.u32 %s5312_s22, 4  ;;  %s5328_s6 = scalar_lea.hbm %s5389_s7, %s3119_s19  ;;  %s5330_s20 = int_to_ptr.vmem [resolvable:$true] %s2943_s20 }
  0x60   : > { %3159 = vmatpush3.bf16.msra.mxu0 %v3282_v4  ;;  %3196 = vmatpush3.bf16.msra.mxu1 %v3282_v4  ;;  %v3283_v7 = vld [vmem:[%s5384_s2 + $0x8] sm:$0xff]   ;;  %v382_v9 = vld [vmem:[%s3918_s24 + $0x38] sm:$0xff]  ;;  %v825_v61 = vld [vmem:[%s3926_s18] sm:$0xff]  ;;  %s2928_s29 = scalar_lea.sflag [#allocation9], %s3911_s9  ;;  %p5623_p3 = scmp.ne.s32.totalorder %s5461_s15, 0 }
  0x61   : > { %3160 = vmatprep.subr.bf16.mxu0 %v3283_v7  ;;  %3195 = vmatprep.subr.bf16.mxu1 %v3283_v7  ;;  %v826_v58 = vld [vmem:[%s3926_s18 + $0x8] sm:$0xff]  ;;  %v828_v59 = vld [vmem:[%s3926_s18 + $0x18] sm:$0xff]  ;;  %v827_v62 = vld [vmem:[%s3926_s18 + $0x10] sm:$0xff]  ;;  %s3697_s10 = smov [#allocation12]  }
  0x62   : > { %384 = vxpose.xlu0.b32.cont [2/4] (short) %v377_v2, 128  ;;  %416 = vxpose.xlu1.b32.cont [2/4] (short) %v378_v3, 128  ;;  %v834_v60 = vpack.c.bf16 %v828_v59, %v826_v58  ;;  %v833_v63 = vpack.c.bf16 %v827_v62, %v825_v61  ;;  %v830_v0 = vld [vmem:[%s3926_s18 + $0x28] sm:$0xff]  ;;  %v832_v1 = vld [vmem:[%s3926_s18 + $0x38] sm:$0xff]  ;;  %v829_v2 = vld [vmem:[%s3926_s18 + $0x20] sm:$0xff] }
  0x63   : > { %v836_v3 = vpack.c.bf16 %v832_v1, %v830_v0  ;;  %v831_v4 = vld [vmem:[%s3926_s18 + $0x30] sm:$0xff]  ;;  %s3606_s18 = sshll.u32 %s3697_s10, 4  ;;  %s3607_s18 = int_to_ptr.vmem [resolvable:$false] %s3606_s18 }
  0x64   : > { %3161 = vmatpush3.bf16.msra.mxu0 %v3283_v7  ;;  %3197 = vmatpush3.bf16.msra.mxu1 %v3283_v7  ;;  %s3608_s12 = scalar_lea.vmem %s3607_s18, 2048  ;;  %p3609_p7 = scmp.lt.s32.totalorder %s5330_s20, %s3607_s18 }
  0x65   : > { %902 = vmatprep.subr.bf16.mxu1 %v834_v60  ;;  %2184 = vmatprep.subr.bf16.mxu0 %v834_v60 }
  0x66   : > { %385 = vxpose.xlu0.b32.cont [3/4] (short) %v379_v5, 128  ;;  %417 = vxpose.xlu1.b32.cont [3/4] (short) %v380_v6, 128  ;;  %v3694_v5 = vmov 0   ;;  %v835_v6 = vpack.c.bf16 %v831_v4, %v829_v2 }
  0x6a   : > { %386 = vxpose.xlu0.b32.end [4/4] (short) %v381_v8, 128  ;;  %418 = vxpose.xlu1.b32.end [4/4] (short) %v382_v9, 128  ;;  %v3976_v8 = vld [vmem:[%s5385_s3] ss:$0 sm:$0xff] }
  0x88   : > { %3281 = vset.pattern.permute.xlu1 %v3694_v5 }
  0x93   : > { %3280 = vset.pattern.permute.xlu0 %v3694_v5 }
  0xde   : > { %v399_v10 = vpop.trf.xlu0  ;;  %v431_v11 = vpop.trf.xlu1 }
  0xe2   : > { %v400_v12 = vpop.trf.xlu0  ;;  %v432_v14 = vpop.trf.xlu1 }
  0xe3   : > { %v447_v13 = vpack.c.bf16 %v400_v12, %v399_v10  ;;  %v455_v53 = vpack.c.bf16 %v432_v14, %v431_v11 }
  0xe5   : > { %3162 = vmatprep.mubr.msk.bf16.mxu0 %vm486_vm0, %v447_v13 }
  0xe6   : > { %v401_v15 = vpop.trf.xlu0  ;;  %v433_v16 = vpop.trf.xlu1 }
  0xea   : > { %v402_v17 = vpop.trf.xlu0  ;;  %v434_v19 = vpop.trf.xlu1 }
  0xeb   : > { %v448_v18 = vpack.c.bf16 %v402_v17, %v401_v15  ;;  %v456_v57 = vpack.c.bf16 %v434_v19, %v433_v16 }
  0xed   : > { %3163 = vmatmul.mubr.msk.bf16.vlgmr.msra.gmra.mrb[0].mxu0 %vm486_vm0, %v448_v18 }
  0xee   : > { %v403_v20 = vpop.trf.xlu0  ;;  %v435_v21 = vpop.trf.xlu1  ;;  %2185 = vmatpush1.bf16.xpose.msra.mxu0 %v833_v63 }
  0xef   : > { %2186 = vmatprep.subr.bf16.mxu0 %v836_v3 }
  0xf2   : > { %v404_v22 = vpop.trf.xlu0  ;;  %v436_v24 = vpop.trf.xlu1 }
  0xf3   : > { %v449_v23 = vpack.c.bf16 %v404_v22, %v403_v20  ;;  %v457_v25 = vpack.c.bf16 %v436_v24, %v435_v21 }
  0xf5   : > { %3166 = vmatprep.mubr.msk.bf16.mxu0 %vm486_vm0, %v449_v23  ;;  %3182 = vmatprep.mubr.msk.bf16.mxu1 %vm486_vm0, %v457_v25 }
  0xf6   : > { %v405_v26 = vpop.trf.xlu0  ;;  %v437_v27 = vpop.trf.xlu1  ;;  %2187 = vmatpush1.bf16.xpose.msra.mxu0 %v835_v6 }
  0xfa   : > { %v406_v28 = vpop.trf.xlu0  ;;  %v438_v30 = vpop.trf.xlu1 }
  0xfb   : > { %v450_v29 = vpack.c.bf16 %v406_v28, %v405_v26  ;;  %v458_v31 = vpack.c.bf16 %v438_v30, %v437_v27 }
  0xfd   : > { %3167 = vmatmul.mubr.msk.bf16.gmra.mrb[4].mxu0 %vm486_vm0, %v450_v29  ;;  %3183 = vmatmul.mubr.msk.bf16.vlgmr.msra.gmra.mrb[0].mxu1 %vm486_vm0, %v458_v31 }
  0xfe   : > { %v407_v32 = vpop.trf.xlu0  ;;  %v439_v33 = vpop.trf.xlu1  ;;  %903 = vmatpush1.bf16.msra.mxu1 %v833_v63 }
  0xff   : > { %904 = vmatprep.subr.bf16.mxu1 %v836_v3 }
 0x102   : > { %v408_v34 = vpop.trf.xlu0  ;;  %v440_v36 = vpop.trf.xlu1  ;;  %905 = vmatpush1.bf16.msra.mxu1 %v835_v6 }
 0x103   : > { %v451_v35 = vpack.c.bf16 %v408_v34, %v407_v32  ;;  %v459_v37 = vpack.c.bf16 %v440_v36, %v439_v33 }
 0x105   : > { %3170 = vmatprep.mubr.msk.bf16.mxu0 %vm486_vm0, %v451_v35  ;;  %3186 = vmatprep.mubr.msk.bf16.mxu1 %vm486_vm0, %v459_v37 }
 0x106   : > { %v409_v38 = vpop.trf.xlu0  ;;  %v441_v39 = vpop.trf.xlu1 }
 0x10a   : > { %v410_v40 = vpop.trf.xlu0  ;;  %v442_v42 = vpop.trf.xlu1 }
 0x10b   : > { %v452_v41 = vpack.c.bf16 %v410_v40, %v409_v38  ;;  %v460_v43 = vpack.c.bf16 %v442_v42, %v441_v39 }
 0x10d   : > { %3171 = vmatmul.mubr.msk.bf16.gmra.mrb[8].mxu0 %vm486_vm0, %v452_v41  ;;  %3187 = vmatmul.mubr.msk.bf16.gmra.mrb[4].mxu1 %vm486_vm0, %v460_v43 }
 0x10e   : > { %v411_v44 = vpop.trf.xlu0  ;;  %v443_v45 = vpop.trf.xlu1 }
 0x112   : > { %v412_v46 = vpop.trf.xlu0  ;;  %v444_v48 = vpop.trf.xlu1 }
 0x113   : > { %v453_v47 = vpack.c.bf16 %v412_v46, %v411_v44  ;;  %v461_v49 = vpack.c.bf16 %v444_v48, %v443_v45 }
 0x115   : > { %3174 = vmatprep.mubr.msk.bf16.mxu0 %vm486_vm0, %v453_v47  ;;  %3190 = vmatprep.mubr.msk.bf16.mxu1 %vm486_vm0, %v461_v49 }
 0x116   : > { %v413_v50 = vpop.trf.xlu0  ;;  %v445_v51 = vpop.trf.xlu1 }
 0x11a   : > { %v414_v52 = vpop.trf.xlu0  ;;  %v446_v55 = vpop.trf.xlu1 }
 0x11b   : > { %v454_v54 = vpack.c.bf16 %v414_v52, %v413_v50  ;;  %v462_v56 = vpack.c.bf16 %v446_v55, %v445_v51 }
 0x11d   : > { %3175 = vmatmul.mubr.msk.bf16.gmra.mrb[12].mxu0 %vm486_vm0, %v454_v54  ;;  %3191 = vmatmul.mubr.msk.bf16.gmra.mrb[8].mxu1 %vm486_vm0, %v462_v56 }
 0x11e   : > { %3178 = vmatprep.mubr.msk.bf16.mxu0 %vm486_vm0, %v455_v53  ;;  %934 = vmatprep.mubr.bf16.mxu1 %v3694_v5 }
 0x125   : > { %3179 = vmatmul.mubr.msk.bf16.gmra.mrb[16].mxu0 %vm486_vm0, %v456_v57 }
 0x1c0   : > { %v3164_v7 = vpop.f32.mrb[0].mxu0 }
 0x1c1   : > { %v569_v9 = vpop.f32.mrb[1].mxu0  ;;  %v578_v11 = vadd.f32 %v3164_v7, %v3976_v8 }
 0x1c2   : > { %v3165_v10 = vpop.f32.mrb[2].mxu0  ;;  %v570_v14 = vadd.f32 %v3976_v8, %v569_v9 }
 0x1c3   : > { %v581_v12 = vadd.f32 %v3165_v10, %v3976_v8  ;;  %v572_v13 = vpop.f32.mrb[3].mxu0 }
 0x1c4   : > { %v573_v15 = vadd.f32 %v3976_v8, %v572_v13 }
 0x1c5   : > { %v697_v16 = vpack.c.bf16 %v581_v12, %v578_v11 }
 0x1c6   : > { %v696_v17 = vpack.c.bf16 %v573_v15, %v570_v14 }
 0x1c7   : > { %713 = vst.msk [vmem:[#allocation2 + $0x8] sm:$0xff] %vm486_vm0, %v697_v16 }
 0x1c8   : > { %712 = vst.msk [vmem:[#allocation2] sm:$0xff] %vm486_vm0, %v696_v17 }
 0x1ce   : > { %v838_v38 = vld [vmem:[#allocation2 + $0x8] sm:$0xff] }
 0x1cf   : > { %v837_v18 = vld [vmem:[#allocation2] sm:$0xff] }
 0x1d0   : > { %v3168_v19 = vpop.f32.mrb[4].mxu0  ;;  %3092 = vmatmul.mubr.msk.bf16.vlgmr.msra.gmra.mrb[12].mxu1 %vm486_vm0, %v837_v18  ;;  %v3184_v21 = vpop.f32.mrb[0].mxu1 }
 0x1d1   : > { %v585_v20 = vpop.f32.mrb[5].mxu0  ;;  %944 = vmatprep.mubr.bf16.mxu1 %v3694_v5  ;;  %v658_v23 = vadd.f32 %v3184_v21, %v3976_v8  ;;  %v649_v24 = vpop.f32.mrb[1].mxu1  ;;  %v594_v25 = vadd.f32 %v3168_v19, %v3976_v8 }
 0x1d2   : > { %v3169_v22 = vpop.f32.mrb[6].mxu0  ;;  %v650_v28 = vadd.f32 %v3976_v8, %v649_v24  ;;  %v3185_v29 = vpop.f32.mrb[2].mxu1  ;;  %v586_v30 = vadd.f32 %v3976_v8, %v585_v20 }
 0x1d3   : > { %v597_v26 = vadd.f32 %v3169_v22, %v3976_v8  ;;  %v588_v27 = vpop.f32.mrb[7].mxu0  ;;  %v661_v32 = vadd.f32 %v3185_v29, %v3976_v8  ;;  %v652_v33 = vpop.f32.mrb[3].mxu1 }
 0x1d4   : > { %v589_v31 = vadd.f32 %v3976_v8, %v588_v27  ;;  %v653_v35 = vadd.f32 %v3976_v8, %v652_v33 }
 0x1d5   : > { %v699_v34 = vpack.c.bf16 %v597_v26, %v594_v25  ;;  %v707_v37 = vpack.c.bf16 %v661_v32, %v658_v23 }
 0x1d6   : > { %v698_v36 = vpack.c.bf16 %v589_v31, %v586_v30  ;;  %v706_v39 = vpack.c.bf16 %v653_v35, %v650_v28 }
 0x1d7   : > { %715 = vst.msk [vmem:[#allocation2 + $0x18] sm:$0xff] %vm486_vm0, %v699_v34  ;;  %723 = vst.msk [vmem:[#allocation2 + $0x58] sm:$0xff] %vm486_vm0, %v707_v37 }
 0x1d8   : > { %714 = vst.msk [vmem:[#allocation2 + $0x10] sm:$0xff] %vm486_vm0, %v698_v36  ;;  %3093 = vmatmul.mubr.msk.bf16.gmra.mrb[16].mxu1 %vm486_vm0, %v838_v38  ;;  %722 = vst.msk [vmem:[#allocation2 + $0x50] sm:$0xff] %vm486_vm0, %v706_v39 }
 0x1d9   : > { %954 = vmatprep.mubr.bf16.mxu1 %v3694_v5 }
 0x1de   : > { %v840_v60 = vld [vmem:[#allocation2 + $0x18] sm:$0xff] }
 0x1df   : > { %v839_v40 = vld [vmem:[#allocation2 + $0x10] sm:$0xff]  ;;  %v848_v36 = vld [vmem:[#allocation2 + $0x58] sm:$0xff] }
 0x1e0   : > { %v3172_v41 = vpop.f32.mrb[8].mxu0  ;;  %3094 = vmatmul.mubr.msk.bf16.gmra.mrb[20].mxu1 %vm486_vm0, %v839_v40  ;;  %v3188_v43 = vpop.f32.mrb[4].mxu1  ;;  %v847_v35 = vld [vmem:[#allocation2 + $0x50] sm:$0xff] }
 0x1e1   : > { %v601_v42 = vpop.f32.mrb[9].mxu0  ;;  %964 = vmatprep.mubr.bf16.mxu1 %v3694_v5  ;;  %v674_v45 = vadd.f32 %v3188_v43, %v3976_v8  ;;  %v665_v46 = vpop.f32.mrb[5].mxu1  ;;  %v610_v47 = vadd.f32 %v3172_v41, %v3976_v8  ;;  %v3695_v41 = vmov -inf  }
 0x1e2   : > { %v3173_v44 = vpop.f32.mrb[10].mxu0  ;;  %v666_v50 = vadd.f32 %v3976_v8, %v665_v46  ;;  %v3189_v51 = vpop.f32.mrb[6].mxu1  ;;  %v602_v52 = vadd.f32 %v3976_v8, %v601_v42  ;;  %729 = vst.msk [vmem:[#allocation3] sm:$0xff] %vm728_vm1, %v3695_v41  ;;  %730 = vst.msk [vmem:[#allocation3 + $0x8] sm:$0xff] %vm728_vm1, %v3695_v41 }
 0x1e3   : > { %v613_v48 = vadd.f32 %v3173_v44, %v3976_v8  ;;  %v604_v49 = vpop.f32.mrb[11].mxu0  ;;  %v677_v54 = vadd.f32 %v3189_v51, %v3976_v8  ;;  %v668_v55 = vpop.f32.mrb[7].mxu1  ;;  %731 = vst.msk [vmem:[#allocation3 + $0x10] sm:$0xff] %vm728_vm1, %v3695_v41  ;;  %732 = vst.msk [vmem:[#allocation3 + $0x18] sm:$0xff] %vm728_vm1, %v3695_v41 }
 0x1e4   : > { %v605_v53 = vadd.f32 %v3976_v8, %v604_v49  ;;  %v669_v57 = vadd.f32 %v3976_v8, %v668_v55  ;;  %733 = vst.msk [vmem:[#allocation3 + $0x20] sm:$0xff] %vm728_vm1, %v3695_v41  ;;  %734 = vst.msk [vmem:[#allocation3 + $0x28] sm:$0xff] %vm728_vm1, %v3695_v41 }
 0x1e5   : > { %v701_v56 = vpack.c.bf16 %v613_v48, %v610_v47  ;;  %v709_v59 = vpack.c.bf16 %v677_v54, %v674_v45  ;;  %735 = vst.msk [vmem:[#allocation3 + $0x30] sm:$0xff] %vm728_vm1, %v3695_v41  ;;  %736 = vst.msk [vmem:[#allocation3 + $0x38] sm:$0xff] %vm728_vm1, %v3695_v41 }
 0x1e6   : > { %v700_v58 = vpack.c.bf16 %v605_v53, %v602_v52  ;;  %v708_v61 = vpack.c.bf16 %v669_v57, %v666_v50  ;;  %737 = vst.msk [vmem:[#allocation3 + $0x40] sm:$0xff] %vm728_vm1, %v3695_v41  ;;  %738 = vst.msk [vmem:[#allocation3 + $0x48] sm:$0xff] %vm728_vm1, %v3695_v41 }
 0x1e7   : > { %717 = vst.msk [vmem:[#allocation2 + $0x28] sm:$0xff] %vm486_vm0, %v701_v56  ;;  %725 = vst.msk [vmem:[#allocation2 + $0x68] sm:$0xff] %vm486_vm0, %v709_v59 }
 0x1e8   : > { %716 = vst.msk [vmem:[#allocation2 + $0x20] sm:$0xff] %vm486_vm0, %v700_v58  ;;  %3095 = vmatmul.mubr.msk.bf16.gmra.mrb[24].mxu1 %vm486_vm0, %v840_v60  ;;  %724 = vst.msk [vmem:[#allocation2 + $0x60] sm:$0xff] %vm486_vm0, %v708_v61 }
 0x1e9   : > { %974 = vmatprep.mubr.bf16.mxu1 %v3694_v5  ;;  %739 = vst.msk [vmem:[#allocation3 + $0x50] sm:$0xff] %vm728_vm1, %v3695_v41  ;;  %740 = vst.msk [vmem:[#allocation3 + $0x58] sm:$0xff] %vm728_vm1, %v3695_v41 }
 0x1ea   : > { %741 = vst.msk [vmem:[#allocation3 + $0x60] sm:$0xff] %vm728_vm1, %v3695_v41  ;;  %742 = vst.msk [vmem:[#allocation3 + $0x68] sm:$0xff] %vm728_vm1, %v3695_v41 }
 0x1eb   : > { %743 = vst.msk [vmem:[#allocation3 + $0x70] sm:$0xff] %vm728_vm1, %v3695_v41  ;;  %744 = vst.msk [vmem:[#allocation3 + $0x78] sm:$0xff] %vm728_vm1, %v3695_v41 }
 0x1ec   : > { %745 = vst.msk [vmem:[#allocation3 + $0x80] sm:$0xff] %vm728_vm1, %v3695_v41  ;;  %746 = vst.msk [vmem:[#allocation3 + $0x88] sm:$0xff] %vm728_vm1, %v3695_v41 }
 0x1ed   : > { %747 = vst.msk [vmem:[#allocation3 + $0x90] sm:$0xff] %vm728_vm1, %v3695_v41  ;;  %748 = vst.msk [vmem:[#allocation3 + $0x98] sm:$0xff] %vm728_vm1, %v3695_v41 }
 0x1ee   : > { %v842_v20 = vld [vmem:[#allocation2 + $0x28] sm:$0xff]  ;;  %749 = vst.msk [vmem:[#allocation3 + $0xa0] sm:$0xff] %vm728_vm1, %v3695_v41  ;;  %750 = vst.msk [vmem:[#allocation3 + $0xa8] sm:$0xff] %vm728_vm1, %v3695_v41 }
 0x1ef   : > { %v841_v62 = vld [vmem:[#allocation2 + $0x20] sm:$0xff]  ;;  %v850_v38 = vld [vmem:[#allocation2 + $0x68] sm:$0xff]  ;;  %751 = vst.msk [vmem:[#allocation3 + $0xb0] sm:$0xff] %vm728_vm1, %v3695_v41  ;;  %752 = vst.msk [vmem:[#allocation3 + $0xb8] sm:$0xff] %vm728_vm1, %v3695_v41 }
 0x1f0   : > { %3096 = vmatmul.mubr.msk.bf16.gmra.mrb[28].mxu1 %vm486_vm0, %v841_v62  ;;  %v3176_v63 = vpop.f32.mrb[12].mxu0  ;;  %v3192_v2 = vpop.f32.mrb[8].mxu1  ;;  %v849_v37 = vld [vmem:[#allocation2 + $0x60] sm:$0xff]  ;;  %753 = vst.msk [vmem:[#allocation3 + $0xc0] sm:$0xff] %vm728_vm1, %v3695_v41  ;;  %754 = vst.msk [vmem:[#allocation3 + $0xc8] sm:$0xff] %vm728_vm1, %v3695_v41 }
 0x1f1   : > { %984 = vmatprep.mubr.bf16.mxu1 %v3694_v5  ;;  %v626_v0 = vadd.f32 %v3176_v63, %v3976_v8  ;;  %v617_v1 = vpop.f32.mrb[13].mxu0  ;;  %v690_v6 = vadd.f32 %v3192_v2, %v3976_v8  ;;  %v681_v7 = vpop.f32.mrb[9].mxu1  ;;  %755 = vst.msk [vmem:[#allocation3 + $0xd0] sm:$0xff] %vm728_vm1, %v3695_v41  ;;  %756 = vst.msk [vmem:[#allocation3 + $0xd8] sm:$0xff] %vm728_vm1, %v3695_v41 }
 0x1f2   : > { %v618_v3 = vadd.f32 %v3976_v8, %v617_v1  ;;  %v3177_v4 = vpop.f32.mrb[14].mxu0  ;;  %v682_v11 = vadd.f32 %v3976_v8, %v681_v7  ;;  %v3193_v12 = vpop.f32.mrb[10].mxu1  ;;  %757 = vst.msk [vmem:[#allocation3 + $0xe0] sm:$0xff] %vm728_vm1, %v3695_v41  ;;  %758 = vst.msk [vmem:[#allocation3 + $0xe8] sm:$0xff] %vm728_vm1, %v3695_v41  ;;  %v3696_v1 = vmov 0.0  }
 0x1f3   : > { %v629_v9 = vadd.f32 %v3177_v4, %v3976_v8  ;;  %v620_v10 = vpop.f32.mrb[15].mxu0  ;;  %v693_v14 = vadd.f32 %v3193_v12, %v3976_v8  ;;  %v684_v15 = vpop.f32.mrb[11].mxu1  ;;  %759 = vst.msk [vmem:[#allocation3 + $0xf0] sm:$0xff] %vm728_vm1, %v3695_v41  ;;  %760 = vst.msk [vmem:[#allocation3 + $0xf8] sm:$0xff] %vm728_vm1, %v3695_v41 }
 0x1f4   : > { %v621_v13 = vadd.f32 %v3976_v8, %v620_v10  ;;  %v685_v17 = vadd.f32 %v3976_v8, %v684_v15  ;;  %793 = vst.msk [vmem:[#allocation5] sm:$0xff] %vm486_vm0, %v3696_v1  ;;  %794 = vst.msk [vmem:[#allocation5 + $0x8] sm:$0xff] %vm486_vm0, %v3696_v1 }
 0x1f5   : > { %v703_v16 = vpack.c.bf16 %v629_v9, %v626_v0  ;;  %v711_v19 = vpack.c.bf16 %v693_v14, %v690_v6  ;;  %761 = vst.msk [vmem:[#allocation4] sm:$0xff] %vm728_vm1, %v3696_v1  ;;  %762 = vst.msk [vmem:[#allocation4 + $0x8] sm:$0xff] %vm728_vm1, %v3696_v1 }
 0x1f6   : > { %v702_v18 = vpack.c.bf16 %v621_v13, %v618_v3  ;;  %v710_v21 = vpack.c.bf16 %v685_v17, %v682_v11  ;;  %763 = vst.msk [vmem:[#allocation4 + $0x10] sm:$0xff] %vm728_vm1, %v3696_v1  ;;  %764 = vst.msk [vmem:[#allocation4 + $0x18] sm:$0xff] %vm728_vm1, %v3696_v1 }
 0x1f7   : > { %719 = vst.msk [vmem:[#allocation2 + $0x38] sm:$0xff] %vm486_vm0, %v703_v16  ;;  %727 = vst.msk [vmem:[#allocation2 + $0x78] sm:$0xff] %vm486_vm0, %v711_v19 }
 0x1f8   : > { %3097 = vmatmul.mubr.msk.bf16.gmra.mrb[32].mxu1 %vm486_vm0, %v842_v20  ;;  %718 = vst.msk [vmem:[#allocation2 + $0x30] sm:$0xff] %vm486_vm0, %v702_v18  ;;  %v3180_v22 = vpop.f32.mrb[16].mxu0  ;;  %726 = vst.msk [vmem:[#allocation2 + $0x70] sm:$0xff] %vm486_vm0, %v710_v21 }
 0x1f9   : > { %994 = vmatprep.mubr.bf16.mxu1 %v3694_v5  ;;  %v642_v23 = vadd.f32 %v3180_v22, %v3976_v8  ;;  %v633_v24 = vpop.f32.mrb[17].mxu0  ;;  %765 = vst.msk [vmem:[#allocation4 + $0x20] sm:$0xff] %vm728_vm1, %v3696_v1  ;;  %766 = vst.msk [vmem:[#allocation4 + $0x28] sm:$0xff] %vm728_vm1, %v3696_v1 }
 0x1fa   : > { %v634_v25 = vadd.f32 %v3976_v8, %v633_v24  ;;  %v3181_v26 = vpop.f32.mrb[18].mxu0  ;;  %767 = vst.msk [vmem:[#allocation4 + $0x30] sm:$0xff] %vm728_vm1, %v3696_v1  ;;  %768 = vst.msk [vmem:[#allocation4 + $0x38] sm:$0xff] %vm728_vm1, %v3696_v1 }
 0x1fb   : > { %v645_v27 = vadd.f32 %v3181_v26, %v3976_v8  ;;  %v636_v28 = vpop.f32.mrb[19].mxu0  ;;  %769 = vst.msk [vmem:[#allocation4 + $0x40] sm:$0xff] %vm728_vm1, %v3696_v1  ;;  %770 = vst.msk [vmem:[#allocation4 + $0x48] sm:$0xff] %vm728_vm1, %v3696_v1 }
 0x1fc   : > { %v637_v29 = vadd.f32 %v3976_v8, %v636_v28  ;;  %771 = vst.msk [vmem:[#allocation4 + $0x50] sm:$0xff] %vm728_vm1, %v3696_v1  ;;  %772 = vst.msk [vmem:[#allocation4 + $0x58] sm:$0xff] %vm728_vm1, %v3696_v1 }
 0x1fd   : > { %v705_v30 = vpack.c.bf16 %v645_v27, %v642_v23  ;;  %773 = vst.msk [vmem:[#allocation4 + $0x60] sm:$0xff] %vm728_vm1, %v3696_v1  ;;  %774 = vst.msk [vmem:[#allocation4 + $0x68] sm:$0xff] %vm728_vm1, %v3696_v1 }
 0x1fe   : > { %v704_v31 = vpack.c.bf16 %v637_v29, %v634_v25  ;;  %v844_v33 = vld [vmem:[#allocation2 + $0x38] sm:$0xff]  ;;  %775 = vst.msk [vmem:[#allocation4 + $0x70] sm:$0xff] %vm728_vm1, %v3696_v1  ;;  %776 = vst.msk [vmem:[#allocation4 + $0x78] sm:$0xff] %vm728_vm1, %v3696_v1 }
 0x1ff   : > { %v843_v32 = vld [vmem:[#allocation2 + $0x30] sm:$0xff]  ;;  %721 = vst.msk [vmem:[#allocation2 + $0x48] sm:$0xff] %vm486_vm0, %v705_v30  ;;  %v852_v40 = vld [vmem:[#allocation2 + $0x78] sm:$0xff]  ;;  %795 = vst.msk [vmem:[#allocation5 + $0x10] sm:$0xff] %vm486_vm0, %v3696_v1 }
 0x200   : > { %3098 = vmatmul.mubr.msk.bf16.gmra.mrb[36].mxu1 %vm486_vm0, %v843_v32  ;;  %720 = vst.msk [vmem:[#allocation2 + $0x40] sm:$0xff] %vm486_vm0, %v704_v31  ;;  %v851_v39 = vld [vmem:[#allocation2 + $0x70] sm:$0xff]  ;;  %796 = vst.msk [vmem:[#allocation5 + $0x18] sm:$0xff] %vm486_vm0, %v3696_v1 }
 0x201   : > { %1004 = vmatprep.mubr.bf16.mxu1 %v3694_v5  ;;  %777 = vst.msk [vmem:[#allocation4 + $0x80] sm:$0xff] %vm728_vm1, %v3696_v1  ;;  %778 = vst.msk [vmem:[#allocation4 + $0x88] sm:$0xff] %vm728_vm1, %v3696_v1 }
 0x202   : > { %779 = vst.msk [vmem:[#allocation4 + $0x90] sm:$0xff] %vm728_vm1, %v3696_v1  ;;  %780 = vst.msk [vmem:[#allocation4 + $0x98] sm:$0xff] %vm728_vm1, %v3696_v1 }
 0x203   : > { %781 = vst.msk [vmem:[#allocation4 + $0xa0] sm:$0xff] %vm728_vm1, %v3696_v1  ;;  %782 = vst.msk [vmem:[#allocation4 + $0xa8] sm:$0xff] %vm728_vm1, %v3696_v1 }
 0x204   : > { %783 = vst.msk [vmem:[#allocation4 + $0xb0] sm:$0xff] %vm728_vm1, %v3696_v1  ;;  %784 = vst.msk [vmem:[#allocation4 + $0xb8] sm:$0xff] %vm728_vm1, %v3696_v1 }
 0x205   : > { %785 = vst.msk [vmem:[#allocation4 + $0xc0] sm:$0xff] %vm728_vm1, %v3696_v1  ;;  %786 = vst.msk [vmem:[#allocation4 + $0xc8] sm:$0xff] %vm728_vm1, %v3696_v1 }
 0x206   : > { %v846_v8 = vld [vmem:[#allocation2 + $0x48] sm:$0xff]  ;;  %787 = vst.msk [vmem:[#allocation4 + $0xd0] sm:$0xff] %vm728_vm1, %v3696_v1  ;;  %788 = vst.msk [vmem:[#allocation4 + $0xd8] sm:$0xff] %vm728_vm1, %v3696_v1 }
 0x207   : > { %v845_v34 = vld [vmem:[#allocation2 + $0x40] sm:$0xff]  ;;  %789 = vst.msk [vmem:[#allocation4 + $0xe0] sm:$0xff] %vm728_vm1, %v3696_v1  ;;  %790 = vst.msk [vmem:[#allocation4 + $0xe8] sm:$0xff] %vm728_vm1, %v3696_v1 }
 0x208   : > { %3099 = vmatmul.mubr.msk.bf16.gmra.mrb[40].mxu1 %vm486_vm0, %v844_v33  ;;  %791 = vst.msk [vmem:[#allocation4 + $0xf0] sm:$0xff] %vm728_vm1, %v3696_v1  ;;  %792 = vst.msk [vmem:[#allocation4 + $0xf8] sm:$0xff] %vm728_vm1, %v3696_v1 }
 0x209   : > { %1014 = vmatprep.mubr.bf16.mxu1 %v3694_v5  ;;  %797 = vst.msk [vmem:[#allocation5 + $0x20] sm:$0xff] %vm486_vm0, %v3696_v1  ;;  %798 = vst.msk [vmem:[#allocation5 + $0x28] sm:$0xff] %vm486_vm0, %v3696_v1 }
 0x20a   : > { %799 = vst.msk [vmem:[#allocation5 + $0x30] sm:$0xff] %vm486_vm0, %v3696_v1  ;;  %800 = vst.msk [vmem:[#allocation5 + $0x38] sm:$0xff] %vm486_vm0, %v3696_v1 }
 0x20b   : > { %801 = vst.msk [vmem:[#allocation5 + $0x40] sm:$0xff] %vm486_vm0, %v3696_v1  ;;  %802 = vst.msk [vmem:[#allocation5 + $0x48] sm:$0xff] %vm486_vm0, %v3696_v1 }
 0x20c   : > { %803 = vst.msk [vmem:[#allocation5 + $0x50] sm:$0xff] %vm486_vm0, %v3696_v1  ;;  %804 = vst.msk [vmem:[#allocation5 + $0x58] sm:$0xff] %vm486_vm0, %v3696_v1 }
 0x20d   : > { %805 = vst.msk [vmem:[#allocation5 + $0x60] sm:$0xff] %vm486_vm0, %v3696_v1  ;;  %806 = vst.msk [vmem:[#allocation5 + $0x68] sm:$0xff] %vm486_vm0, %v3696_v1 }
 0x20e   : > { %807 = vst.msk [vmem:[#allocation5 + $0x70] sm:$0xff] %vm486_vm0, %v3696_v1  ;;  %808 = vst.msk [vmem:[#allocation5 + $0x78] sm:$0xff] %vm486_vm0, %v3696_v1 }
 0x20f   : > { %809 = vst.msk [vmem:[#allocation5 + $0x80] sm:$0xff] %vm486_vm0, %v3696_v1  ;;  %810 = vst.msk [vmem:[#allocation5 + $0x88] sm:$0xff] %vm486_vm0, %v3696_v1 }
 0x210   : > { %3100 = vmatmul.mubr.msk.bf16.gmra.mrb[44].mxu1 %vm486_vm0, %v845_v34  ;;  %811 = vst.msk [vmem:[#allocation5 + $0x90] sm:$0xff] %vm486_vm0, %v3696_v1  ;;  %812 = vst.msk [vmem:[#allocation5 + $0x98] sm:$0xff] %vm486_vm0, %v3696_v1 }
 0x211   : > { %1024 = vmatprep.mubr.bf16.mxu1 %v3694_v5  ;;  %813 = vst.msk [vmem:[#allocation5 + $0xa0] sm:$0xff] %vm486_vm0, %v3696_v1  ;;  %814 = vst.msk [vmem:[#allocation5 + $0xa8] sm:$0xff] %vm486_vm0, %v3696_v1 }
 0x212   : > { %815 = vst.msk [vmem:[#allocation5 + $0xb0] sm:$0xff] %vm486_vm0, %v3696_v1  ;;  %816 = vst.msk [vmem:[#allocation5 + $0xb8] sm:$0xff] %vm486_vm0, %v3696_v1 }
 0x213   : > { %817 = vst.msk [vmem:[#allocation5 + $0xc0] sm:$0xff] %vm486_vm0, %v3696_v1  ;;  %818 = vst.msk [vmem:[#allocation5 + $0xc8] sm:$0xff] %vm486_vm0, %v3696_v1 }
 0x214   : > { %819 = vst.msk [vmem:[#allocation5 + $0xd0] sm:$0xff] %vm486_vm0, %v3696_v1  ;;  %820 = vst.msk [vmem:[#allocation5 + $0xd8] sm:$0xff] %vm486_vm0, %v3696_v1 }
 0x215   : > { %821 = vst.msk [vmem:[#allocation5 + $0xe0] sm:$0xff] %vm486_vm0, %v3696_v1  ;;  %822 = vst.msk [vmem:[#allocation5 + $0xe8] sm:$0xff] %vm486_vm0, %v3696_v1 }
 0x216   : > { %823 = vst.msk [vmem:[#allocation5 + $0xf0] sm:$0xff] %vm486_vm0, %v3696_v1  ;;  %824 = vst.msk [vmem:[#allocation5 + $0xf8] sm:$0xff] %vm486_vm0, %v3696_v1 }
 0x218   : > { %3101 = vmatmul.mubr.msk.bf16.gmra.mrb[48].mxu1 %vm486_vm0, %v846_v8 }
 0x219   : > { %1034 = vmatprep.mubr.bf16.mxu1 %v3694_v5 }
 0x220   : > { %3102 = vmatmul.mubr.msk.bf16.gmra.mrb[52].mxu1 %vm486_vm0, %v847_v35 }
 0x221   : > { %1044 = vmatprep.mubr.bf16.mxu1 %v3694_v5 }
 0x228   : > { %3103 = vmatmul.mubr.msk.bf16.gmra.mrb[56].mxu1 %vm486_vm0, %v848_v36 }
 0x229   : > { %1054 = vmatprep.mubr.bf16.mxu1 %v3694_v5 }
 0x230   : > { %3104 = vmatmul.mubr.msk.bf16.gmra.mrb[60].mxu1 %vm486_vm0, %v849_v37 }
 0x231   : > { %1064 = vmatprep.mubr.bf16.mxu1 %v3694_v5 }
 0x238   : > { %3105 = vmatmul.mubr.msk.bf16.gmra.mrb[64].mxu1 %vm486_vm0, %v850_v38 }
 0x239   : > { %1074 = vmatprep.mubr.bf16.mxu1 %v3694_v5 }
 0x240   : > { %3106 = vmatmul.mubr.msk.bf16.gmra.mrb[68].mxu1 %vm486_vm0, %v851_v39 }
 0x241   : > { %1084 = vmatprep.mubr.bf16.mxu1 %v3694_v5 }
 0x248   : > { %3107 = vmatmul.mubr.msk.bf16.gmra.mrb[72].mxu1 %vm486_vm0, %v852_v40 }
 0x2a3   : > { %v4089_v5 = vpop.f32.mrb[12].mxu1 }
 0x2a4   : > { %v4091_v42 = vpop.f32.mrb[13].mxu1 }
 0x2a5   : > { %v4093_v43 = vpop.f32.mrb[14].mxu1  ;;  %v1127_v44 = vmax.f32 %v4089_v5, %v4091_v42 }
 0x2a6   : > { %v4097_v45 = vpop.f32.mrb[15].mxu1 }
 0x2a7   : > { %1128 = vmax.xlane.f32.xlu0 %v1127_v44  ;;  %v1130_v46 = vmax.f32 %v4093_v43, %v4097_v45 }
 0x2a9   : > { %1131 = vmax.xlane.f32.xlu1 %v1130_v46 }
 0x2ab   : > { %v4101_v47 = vpop.f32.mrb[16].mxu1 }
 0x2ac   : > { %v4103_v48 = vpop.f32.mrb[17].mxu1 }
 0x2ad   : > { %v4105_v49 = vpop.f32.mrb[18].mxu1  ;;  %v1133_v50 = vmax.f32 %v4101_v47, %v4103_v48 }
 0x2ae   : > { %v4109_v51 = vpop.f32.mrb[19].mxu1 }
 0x2af   : > { %1134 = vmax.xlane.f32.xlu1 %v1133_v50  ;;  %v1136_v52 = vmax.f32 %v4105_v49, %v4109_v51 }
 0x2b3   : > { %1137 = vmax.xlane.f32.xlu1 %v1136_v52  ;;  %v4113_v53 = vpop.f32.mrb[20].mxu1 }
 0x2b4   : > { %v4115_v54 = vpop.f32.mrb[21].mxu1 }
 0x2b5   : > { %v4117_v55 = vpop.f32.mrb[22].mxu1  ;;  %v1139_v56 = vmax.f32 %v4113_v53, %v4115_v54 }
 0x2b6   : > { %v4121_v57 = vpop.f32.mrb[23].mxu1 }
 0x2b7   : > { %1140 = vmax.xlane.f32.xlu0 %v1139_v56  ;;  %v1142_v58 = vmax.f32 %v4117_v55, %v4121_v57 }
 0x2b9   : > { %1143 = vmax.xlane.f32.xlu1 %v1142_v58 }
 0x2bb   : > { %v4125_v59 = vpop.f32.mrb[24].mxu1 }
 0x2bc   : > { %v4127_v60 = vpop.f32.mrb[25].mxu1 }
 0x2bd   : > { %v4129_v61 = vpop.f32.mrb[26].mxu1  ;;  %v1145_v62 = vmax.f32 %v4125_v59, %v4127_v60 }
 0x2be   : > { %v4133_v63 = vpop.f32.mrb[27].mxu1 }
 0x2bf   : > { %1146 = vmax.xlane.f32.xlu0 %v1145_v62  ;;  %v1148_v0 = vmax.f32 %v4129_v61, %v4133_v63 }
 0x2c1   : > { %1149 = vmax.xlane.f32.xlu1 %v1148_v0 }
 0x2c3   : > { %v4268_v2 = vpop.f32.mrb[28].mxu1 }
 0x2c4   : > { %v4270_v3 = vpop.f32.mrb[29].mxu1 }
 0x2c5   : > { %v4272_v4 = vpop.f32.mrb[30].mxu1  ;;  %v1151_v6 = vmax.f32 %v4268_v2, %v4270_v3 }
 0x2c6   : > { %v4276_v7 = vpop.f32.mrb[31].mxu1 }
 0x2c7   : > { %1152 = vmax.xlane.f32.xlu0 %v1151_v6  ;;  %v1154_v9 = vmax.f32 %v4272_v4, %v4276_v7 }
 0x2c9   : > { %1155 = vmax.xlane.f32.xlu1 %v1154_v9 }
 0x2cb   : > { %v4280_v10 = vpop.f32.mrb[32].mxu1 }
 0x2cc   : > { %v4282_v11 = vpop.f32.mrb[33].mxu1 }
 0x2cd   : > { %v4284_v12 = vpop.f32.mrb[34].mxu1  ;;  %v1157_v13 = vmax.f32 %v4280_v10, %v4282_v11 }
 0x2ce   : > { %v4288_v14 = vpop.f32.mrb[35].mxu1 }
 0x2cf   : > { %1158 = vmax.xlane.f32.xlu0 %v1157_v13  ;;  %v1160_v15 = vmax.f32 %v4284_v12, %v4288_v14 }
 0x2d1   : > { %1161 = vmax.xlane.f32.xlu1 %v1160_v15 }
 0x2d3   : > { %v4292_v16 = vpop.f32.mrb[36].mxu1 }
 0x2d4   : > { %5470 = vst [vmem:[#allocation17_spill] sm:$0xff] %v4292_v16  ;;  %v4294_v17 = vpop.f32.mrb[37].mxu1 }
 0x2d5   : > { %5471 = vst [vmem:[#allocation18_spill] sm:$0xff] %v4294_v17  ;;  %v4296_v18 = vpop.f32.mrb[38].mxu1  ;;  %v1163_v19 = vmax.f32 %v4292_v16, %v4294_v17 }
 0x2d6   : > { %5472 = vst [vmem:[#allocation19_spill] sm:$0xff] %v4296_v18  ;;  %v4300_v20 = vpop.f32.mrb[39].mxu1 }
 0x2d7   : > { %5473 = vst [vmem:[#allocation20_spill] sm:$0xff] %v4300_v20  ;;  %1164 = vmax.xlane.f32.xlu0 %v1163_v19  ;;  %v1166_v21 = vmax.f32 %v4296_v18, %v4300_v20 }
 0x2d9   : > { %1167 = vmax.xlane.f32.xlu1 %v1166_v21 }
 0x2db   : > { %v4304_v22 = vpop.f32.mrb[40].mxu1 }
 0x2dc   : > { %5474 = vst [vmem:[#allocation21_spill] sm:$0xff] %v4304_v22  ;;  %v4306_v23 = vpop.f32.mrb[41].mxu1 }
 0x2dd   : > { %5475 = vst [vmem:[#allocation22_spill] sm:$0xff] %v4306_v23  ;;  %v4308_v24 = vpop.f32.mrb[42].mxu1  ;;  %v1169_v25 = vmax.f32 %v4304_v22, %v4306_v23 }
 0x2de   : > { %5476 = vst [vmem:[#allocation23_spill] sm:$0xff] %v4308_v24  ;;  %v4312_v26 = vpop.f32.mrb[43].mxu1 }
 0x2df   : > { %5477 = vst [vmem:[#allocation24_spill] sm:$0xff] %v4312_v26  ;;  %1170 = vmax.xlane.f32.xlu0 %v1169_v25  ;;  %v1172_v27 = vmax.f32 %v4308_v24, %v4312_v26 }
 0x2e1   : > { %1173 = vmax.xlane.f32.xlu1 %v1172_v27 }
 0x2e3   : > { %v4316_v28 = vpop.f32.mrb[44].mxu1 }
 0x2e4   : > { %5478 = vst [vmem:[#allocation25_spill] sm:$0xff] %v4316_v28  ;;  %v4318_v29 = vpop.f32.mrb[45].mxu1 }
 0x2e5   : > { %5479 = vst [vmem:[#allocation26_spill] sm:$0xff] %v4318_v29  ;;  %v4320_v30 = vpop.f32.mrb[46].mxu1  ;;  %v1175_v31 = vmax.f32 %v4316_v28, %v4318_v29  ;;  %v4502_v29 = vld [vmem:[#allocation3 + $0x58] sm:$0xff] }
 0x2e6   : > { %5480 = vst [vmem:[#allocation27_spill] sm:$0xff] %v4320_v30  ;;  %v4324_v32 = vpop.f32.mrb[47].mxu1  ;;  %5508 = vst [vmem:[#allocation55_spill] sm:$0xff] %v4502_v29 }
 0x2e7   : > { %5481 = vst [vmem:[#allocation28_spill] sm:$0xff] %v4324_v32  ;;  %1176 = vmax.xlane.f32.xlu0 %v1175_v31  ;;  %v1178_v33 = vmax.f32 %v4320_v30, %v4324_v32  ;;  %v4522_v32 = vld [vmem:[#allocation3 + $0x68] sm:$0xff] }
 0x2e8   : > { %5511 = vst [vmem:[#allocation58_spill] sm:$0xff] %v4522_v32 }
 0x2e9   : > { %1179 = vmax.xlane.f32.xlu1 %v1178_v33 }
 0x2eb   : > { %v4328_v34 = vpop.f32.mrb[48].mxu1 }
 0x2ec   : > { %5482 = vst [vmem:[#allocation29_spill] sm:$0xff] %v4328_v34  ;;  %v4330_v8 = vpop.f32.mrb[49].mxu1 }
 0x2ed   : > { %5483 = vst [vmem:[#allocation30_spill] sm:$0xff] %v4330_v8  ;;  %v4332_v35 = vpop.f32.mrb[50].mxu1  ;;  %v1181_v36 = vmax.f32 %v4328_v34, %v4330_v8  ;;  %v4500_v34 = vld [vmem:[#allocation3 + $0x50] sm:$0xff] }
 0x2ee   : > { %5484 = vst [vmem:[#allocation31_spill] sm:$0xff] %v4332_v35  ;;  %v4336_v37 = vpop.f32.mrb[51].mxu1 }
 0x2ef   : > { %5485 = vst [vmem:[#allocation32_spill] sm:$0xff] %v4336_v37  ;;  %1182 = vmax.xlane.f32.xlu0 %v1181_v36  ;;  %v1184_v38 = vmax.f32 %v4332_v35, %v4336_v37 }
 0x2f1   : > { %1185 = vmax.xlane.f32.xlu1 %v1184_v38 }
 0x2f3   : > { %v4340_v39 = vpop.f32.mrb[52].mxu1 }
 0x2f4   : > { %5486 = vst [vmem:[#allocation33_spill] sm:$0xff] %v4340_v39  ;;  %v4342_v40 = vpop.f32.mrb[53].mxu1 }
 0x2f5   : > { %5487 = vst [vmem:[#allocation34_spill] sm:$0xff] %v4342_v40  ;;  %v4344_v41 = vpop.f32.mrb[54].mxu1  ;;  %v1187_v44 = vmax.f32 %v4340_v39, %v4342_v40  ;;  %v4481_v40 = vld [vmem:[#allocation3 + $0x40] sm:$0xff]  ;;  %v4484_v39 = vld [vmem:[#allocation3 + $0x48] sm:$0xff] }
 0x2f6   : > { %5488 = vst [vmem:[#allocation35_spill] sm:$0xff] %v4344_v41  ;;  %v4348_v46 = vpop.f32.mrb[55].mxu1 }
 0x2f7   : > { %5489 = vst [vmem:[#allocation36_spill] sm:$0xff] %v4348_v46  ;;  %1188 = vmax.xlane.f32.xlu1 %v1187_v44  ;;  %v1190_v50 = vmax.f32 %v4344_v41, %v4348_v46  ;;  %v4466_v46 = vld [vmem:[#allocation3 + $0x38] sm:$0xff] }
 0x2f9   : > { %1191 = vmax.xlane.f32.xlu0 %v1190_v50 }
 0x2fb   : > { %v4352_v52 = vpop.f32.mrb[56].mxu1 }
 0x2fc   : > { %5490 = vst [vmem:[#allocation37_spill] sm:$0xff] %v4352_v52  ;;  %v4354_v56 = vpop.f32.mrb[57].mxu1 }
 0x2fd   : > { %5491 = vst [vmem:[#allocation38_spill] sm:$0xff] %v4354_v56  ;;  %v4356_v58 = vpop.f32.mrb[58].mxu1  ;;  %v1193_v62 = vmax.f32 %v4352_v52, %v4354_v56  ;;  %v4464_v56 = vld [vmem:[#allocation3 + $0x30] sm:$0xff] }
 0x2fe   : > { %5492 = vst [vmem:[#allocation39_spill] sm:$0xff] %v4356_v58  ;;  %v4360_v0 = vpop.f32.mrb[59].mxu1 }
 0x2ff   : > { %5493 = vst [vmem:[#allocation40_spill] sm:$0xff] %v4360_v0  ;;  %1194 = vmax.xlane.f32.xlu0 %v1193_v62  ;;  %v1196_v1 = vmax.f32 %v4356_v58, %v4360_v0 }
 0x301   : > { %1197 = vmax.xlane.f32.xlu1 %v1196_v1 }
 0x303   : > { %v4364_v6 = vpop.f32.mrb[60].mxu1 }
 0x304   : > { %5494 = vst [vmem:[#allocation41_spill] sm:$0xff] %v4364_v6  ;;  %v4366_v9 = vpop.f32.mrb[61].mxu1 }
 0x305   : > { %5495 = vst [vmem:[#allocation42_spill] sm:$0xff] %v4366_v9  ;;  %v4368_v13 = vpop.f32.mrb[62].mxu1  ;;  %v1199_v15 = vmax.f32 %v4364_v6, %v4366_v9  ;;  %v4445_v9 = vld [vmem:[#allocation3 + $0x20] sm:$0xff]  ;;  %v4450_v6 = vld [vmem:[#allocation3 + $0x28] sm:$0xff] }
 0x306   : > { %5496 = vst [vmem:[#allocation43_spill] sm:$0xff] %v4368_v13  ;;  %v4372_v19 = vpop.f32.mrb[63].mxu1 }
 0x307   : > { %5497 = vst [vmem:[#allocation44_spill] sm:$0xff] %v4372_v19  ;;  %1200 = vmax.xlane.f32.xlu0 %v1199_v15  ;;  %v1202_v21 = vmax.f32 %v4368_v13, %v4372_v19  ;;  %v4435_v19 = vld [vmem:[#allocation3 + $0x18] sm:$0xff] }
 0x309   : > { %1203 = vmax.xlane.f32.xlu1 %v1202_v21 }
 0x30b   : > { %v4376_v25 = vpop.f32.mrb[64].mxu1 }
 0x30c   : > { %5498 = vst [vmem:[#allocation45_spill] sm:$0xff] %v4376_v25  ;;  %v4378_v27 = vpop.f32.mrb[65].mxu1 }
 0x30d   : > { %5499 = vst [vmem:[#allocation46_spill] sm:$0xff] %v4378_v27  ;;  %v4380_v31 = vpop.f32.mrb[66].mxu1  ;;  %v1205_v33 = vmax.f32 %v4376_v25, %v4378_v27  ;;  %v4414_v25 = vld [vmem:[#allocation3 + $0x8] sm:$0xff] }
 0x30e   : > { %5500 = vst [vmem:[#allocation47_spill] sm:$0xff] %v4380_v31  ;;  %v4384_v36 = vpop.f32.mrb[67].mxu1 }
 0x30f   : > { %5501 = vst [vmem:[#allocation48_spill] sm:$0xff] %v4384_v36  ;;  %1206 = vmax.xlane.f32.xlu0 %v1205_v33  ;;  %v1208_v38 = vmax.f32 %v4380_v31, %v4384_v36 }
 0x311   : > { %1209 = vmax.xlane.f32.xlu1 %v1208_v38 }
 0x313   : > { %v4388_v44 = vpop.f32.mrb[68].mxu1 }
 0x314   : > { %5502 = vst [vmem:[#allocation49_spill] sm:$0xff] %v4388_v44  ;;  %v4390_v50 = vpop.f32.mrb[69].mxu1 }
 0x315   : > { %5503 = vst [vmem:[#allocation50_spill] sm:$0xff] %v4390_v50  ;;  %v1211_v62 = vmax.f32 %v4388_v44, %v4390_v50  ;;  %v4394_v1 = vpop.f32.mrb[70].mxu1  ;;  %v4412_v44 = vld [vmem:[#allocation3] sm:$0xff] }
 0x316   : > { %5504 = vst [vmem:[#allocation51_spill] sm:$0xff] %v4394_v1  ;;  %v4396_v15 = vpop.f32.mrb[71].mxu1 }
 0x317   : > { %5505 = vst [vmem:[#allocation52_spill] sm:$0xff] %v4396_v15  ;;  %1212 = vmax.xlane.f32.xlu0 %v1211_v62  ;;  %v1214_v21 = vmax.f32 %v4394_v1, %v4396_v15 }
 0x319   : > { %1215 = vmax.xlane.f32.xlu1 %v1214_v21 }
 0x31b   : > { %v4400_v33 = vpop.f32.mrb[72].mxu1 }
 0x31c   : > { %5506 = vst [vmem:[#allocation53_spill] sm:$0xff] %v4400_v33  ;;  %v4402_v36 = vpop.f32.mrb[73].mxu1 }
 0x31d   : > { %5507 = vst [vmem:[#allocation54_spill] sm:$0xff] %v4402_v36  ;;  %v4404_v38 = vpop.f32.mrb[74].mxu1  ;;  %v1217_v31 = vmax.f32 %v4400_v33, %v4402_v36  ;;  %v4430_v36 = vld [vmem:[#allocation3 + $0x10] sm:$0xff] }
 0x31e   : > { %v4408_v27 = vpop.f32.mrb[75].mxu1 }
 0x334   : > { %v1129_v62 = vpop.xlane.xlu0 %1128 }
 0x335   : > { %v4417_v21 = vmax.f32 %v4412_v44, %v1129_v62 }
 0x336   : > { %v1132_v15 = vpop.xlane.xlu1 %1131 }
 0x337   : > { %2409 = vst.msk [vmem:[#allocation3] sm:$0xff] %vm728_vm1, %v4417_v21  ;;  %v4422_v1 = vmax.f32 %v4414_v25, %v1132_v15  ;;  %1353 = vperm.xlu0 %3280, %v4417_v21   ;;  %v1255_v24 = vsub.f32 %v4412_v44, %v4417_v21 }
 0x339   : > { %2410 = vst.msk [vmem:[#allocation3 + $0x8] sm:$0xff] %vm728_vm1, %v4422_v1  ;;  %1358 = vperm.xlu1 %3281, %v4422_v1   ;;  %v1287_v8 = vmul.f32 1.442695, %v1255_v24  ;;  %v4560_v24 = vld [vmem:[#allocation3 + $0x80] sm:$0xff] }
 0x33b   : > { %3286 = vpow2.f32 %v1287_v8  ;;  %v4576_v8 = vld [vmem:[#allocation3 + $0x90] sm:$0xff] }
 0x33c   : > { %v1135_v62 = vpop.xlane.xlu1 %1134 }
 0x33d   : > { %v4433_v33 = vmax.f32 %v4430_v36, %v1135_v62 }
 0x33f   : > { %2411 = vst.msk [vmem:[#allocation3 + $0x10] sm:$0xff] %vm728_vm1, %v4433_v33  ;;  %1363 = vperm.xlu1 %3281, %v4433_v33  }
 0x340   : > { %v1138_v50 = vpop.xlane.xlu1 %1137 }
 0x341   : > { %v4443_v13 = vmax.f32 %v4435_v19, %v1138_v50 }
 0x343   : > { %2412 = vst.msk [vmem:[#allocation3 + $0x18] sm:$0xff] %vm728_vm1, %v4443_v13  ;;  %1368 = vperm.xlu1 %3281, %v4443_v13  }
 0x344   : > { %v1141_v62 = vpop.xlane.xlu0 %1140 }
 0x345   : > { %v4453_v15 = vmax.f32 %v4445_v9, %v1141_v62 }
 0x346   : > { %v1144_v0 = vpop.xlane.xlu1 %1143 }
 0x347   : > { %2413 = vst.msk [vmem:[#allocation3 + $0x20] sm:$0xff] %vm728_vm1, %v4453_v15  ;;  %v4460_v50 = vmax.f32 %v4450_v6, %v1144_v0 }
 0x349   : > { %2414 = vst.msk [vmem:[#allocation3 + $0x28] sm:$0xff] %vm728_vm1, %v4460_v50 }
 0x34c   : > { %v1147_v52 = vpop.xlane.xlu0 %1146 }
 0x34d   : > { %v4469_v62 = vmax.f32 %v4464_v56, %v1147_v52 }
 0x34e   : > { %v1150_v41 = vpop.xlane.xlu1 %1149 }
 0x34f   : > { %2415 = vst.msk [vmem:[#allocation3 + $0x30] sm:$0xff] %vm728_vm1, %v4469_v62  ;;  %v4476_v0 = vmax.f32 %v4466_v46, %v1150_v41  ;;  %1383 = vperm.xlu1 %3281, %v4469_v62  }
 0x351   : > { %2416 = vst.msk [vmem:[#allocation3 + $0x38] sm:$0xff] %vm728_vm1, %v4476_v0  ;;  %v1262_v16 = vsub.f32 %v4466_v46, %v4476_v0 }
 0x353   : > { %1388 = vperm.xlu1 %3281, %v4476_v0   ;;  %v1301_v46 = vmul.f32 1.442695, %v1262_v16  ;;  %v4622_v0 = vld [vmem:[#allocation3 + $0xb0] sm:$0xff] }
 0x354   : > { %v1153_v52 = vpop.xlane.xlu0 %1152 }
 0x355   : > { %v4487_v58 = vmax.f32 %v4481_v40, %v1153_v52 }
 0x356   : > { %v1156_v37 = vpop.xlane.xlu1 %1155  ;;  %1218 = vmax.xlane.f32.xlu0 %v1217_v31 }
 0x357   : > { %2417 = vst.msk [vmem:[#allocation3 + $0x40] sm:$0xff] %vm728_vm1, %v4487_v58  ;;  %v4494_v35 = vmax.f32 %v4484_v39, %v1156_v37 }
 0x359   : > { %2418 = vst.msk [vmem:[#allocation3 + $0x48] sm:$0xff] %vm728_vm1, %v4494_v35 }
 0x35c   : > { %v1159_v52 = vpop.xlane.xlu0 %1158 }
 0x35d   : > { %v4505_v31 = vmax.f32 %v4500_v34, %v1159_v52  ;;  %v4519_v52 = vld [vmem:[#allocation3 + $0x60] sm:$0xff] }
 0x35e   : > { %v1162_v41 = vpop.xlane.xlu1 %1161  ;;  %5510 = vst [vmem:[#allocation57_spill] sm:$0xff] %v4519_v52 }
 0x35f   : > { %2419 = vst.msk [vmem:[#allocation3 + $0x50] sm:$0xff] %vm728_vm1, %v4505_v31  ;;  %v4512_v37 = vmax.f32 %v4502_v29, %v1162_v41  ;;  %1403 = vperm.xlu1 %3281, %v4505_v31  }
 0x361   : > { %5509 = vst [vmem:[#allocation56_spill] sm:$0xff] %v4512_v37  ;;  %2420 = vst.msk [vmem:[#allocation3 + $0x58] sm:$0xff] %vm728_vm1, %v4512_v37 }
 0x363   : > { %1408 = vperm.xlu1 %3281, %v4512_v37   ;;  %v4578_v37 = vpop.eup %3286 }
 0x364   : > { %v1165_v28 = vpop.xlane.xlu0 %1164  ;;  %5518 = vst [vmem:[#allocation65_spill] sm:$0xff] %v4578_v37 }
 0x365   : > { %v4525_v30 = vmax.f32 %v4519_v52, %v1165_v28  ;;  %v4540_v28 = vld [vmem:[#allocation3 + $0x70] sm:$0xff] }
 0x366   : > { %v1168_v41 = vpop.xlane.xlu1 %1167  ;;  %5514 = vst [vmem:[#allocation61_spill] sm:$0xff] %v4540_v28 }
 0x367   : > { %5512 = vst [vmem:[#allocation59_spill] sm:$0xff] %v4525_v30  ;;  %v4528_v26 = vmax.f32 %v4522_v32, %v1168_v41  ;;  %2421 = vst.msk [vmem:[#allocation3 + $0x60] sm:$0xff] %vm728_vm1, %v4525_v30  ;;  %v4543_v41 = vld [vmem:[#allocation3 + $0x78] sm:$0xff] }
 0x368   : > { %5515 = vst [vmem:[#allocation62_spill] sm:$0xff] %v4543_v41 }
 0x369   : > { %5513 = vst [vmem:[#allocation60_spill] sm:$0xff] %v4528_v26  ;;  %2422 = vst.msk [vmem:[#allocation3 + $0x68] sm:$0xff] %vm728_vm1, %v4528_v26 }
 0x36c   : > { %1373 = vperm.xlu0 %3280, %v4453_v15   ;;  %v1171_v29 = vpop.xlane.xlu0 %1170 }
 0x36d   : > { %v4546_v52 = vmax.f32 %v4540_v28, %v1171_v29 }
 0x36e   : > { %v1174_v23 = vpop.xlane.xlu1 %1173 }
 0x36f   : > { %5516 = vst [vmem:[#allocation63_spill] sm:$0xff] %v4546_v52  ;;  %v4549_v44 = vmax.f32 %v4543_v41, %v1174_v23  ;;  %2423 = vst.msk [vmem:[#allocation3 + $0x70] sm:$0xff] %vm728_vm1, %v4546_v52  ;;  %v4563_v23 = vld [vmem:[#allocation3 + $0x88] sm:$0xff] }
 0x370   : > { %1378 = vperm.xlu0 %3280, %v4460_v50  }
 0x371   : > { %5517 = vst [vmem:[#allocation64_spill] sm:$0xff] %v4549_v44  ;;  %2424 = vst.msk [vmem:[#allocation3 + $0x78] sm:$0xff] %vm728_vm1, %v4549_v44 }
 0x374   : > { %1393 = vperm.xlu0 %3280, %v4487_v58   ;;  %v1177_v29 = vpop.xlane.xlu0 %1176 }
 0x375   : > { %v4566_v21 = vmax.f32 %v4560_v24, %v1177_v29  ;;  %v4581_v29 = vld [vmem:[#allocation3 + $0x98] sm:$0xff] }
 0x376   : > { %v1180_v28 = vpop.xlane.xlu1 %1179 }
 0x377   : > { %v4569_v32 = vmax.f32 %v4563_v23, %v1180_v28  ;;  %2425 = vst.msk [vmem:[#allocation3 + $0x80] sm:$0xff] %vm728_vm1, %v4566_v21  ;;  %v1258_v28 = vsub.f32 %v4435_v19, %v4443_v13  ;;  %v4598_v13 = vld [vmem:[#allocation3 + $0xa0] sm:$0xff] }
 0x378   : > { %1398 = vperm.xlu0 %3280, %v4494_v35  }
 0x379   : > { %2426 = vst.msk [vmem:[#allocation3 + $0x88] sm:$0xff] %vm728_vm1, %v4569_v32  ;;  %v1293_v17 = vmul.f32 1.442695, %v1258_v28 }
 0x37b   : > { %3288 = vpow2.f32 %v1293_v17  ;;  %v5520_v17 = vsub.f32 %v4414_v25, %v4422_v1 }
 0x37c   : > { %1962 = vperm.xlu0 %3280, %v4578_v37   ;;  %v1183_v41 = vpop.xlane.xlu0 %1182  ;;  %v1260_v37 = vsub.f32 %v4450_v6, %v4460_v50  ;;  %v5519_v6 = vmax.f32 %v4404_v38, %v4408_v27 }
 0x37d   : > { %v4586_v22 = vmax.f32 %v4576_v8, %v1183_v41  ;;  %v4601_v41 = vld [vmem:[#allocation3 + $0xa8] sm:$0xff] }
 0x37e   : > { %v1186_v20 = vpop.xlane.xlu1 %1185 }
 0x37f   : > { %v4589_v18 = vmax.f32 %v4581_v29, %v1186_v20  ;;  %2427 = vst.msk [vmem:[#allocation3 + $0x90] sm:$0xff] %vm728_vm1, %v4586_v22  ;;  %v1297_v20 = vmul.f32 1.442695, %v1260_v37  ;;  %v1289_v37 = vmul.f32 1.442695, %v5520_v17 }
 0x380   : > { %1413 = vperm.xlu0 %3280, %v4525_v30  }
 0x381   : > { %2428 = vst.msk [vmem:[#allocation3 + $0x98] sm:$0xff] %vm728_vm1, %v4589_v18  ;;  %3290 = vpow2.f32 %v1297_v20  ;;  %v5522_v20 = vsub.f32 %v4430_v36, %v4433_v33 }
 0x382   : > { %3292 = vpow2.f32 %v1289_v37  ;;  %v4643_v37 = vld [vmem:[#allocation3 + $0xc0] sm:$0xff] }
 0x383   : > { %3294 = vpow2.f32 %v1301_v46  ;;  %v1291_v17 = vmul.f32 1.442695, %v5522_v20 }
 0x384   : > { %1418 = vperm.xlu0 %3280, %v4528_v26   ;;  %v1189_v19 = vpop.xlane.xlu1 %1188 }
 0x385   : > { %v4606_v28 = vmax.f32 %v4598_v13, %v1189_v19  ;;  %v4625_v19 = vld [vmem:[#allocation3 + $0xb8] sm:$0xff]  ;;  %v4630_v1 = vpop.eup %3288  ;;  %3296 = vpow2.f32 %v1291_v17  ;;  %v1271_v17 = vsub.f32 %v4560_v24, %v4566_v21 }
 0x386   : > { %v1192_v30 = vpop.xlane.xlu0 %1191  ;;  %5521 = vst [vmem:[#allocation66_spill] sm:$0xff] %v4630_v1  ;;  %v4680_v24 = vld [vmem:[#allocation3 + $0xd8] sm:$0xff] }
 0x387   : > { %1221 = vmax.xlane.f32.xlu1 %v5519_v6  ;;  %2429 = vst.msk [vmem:[#allocation3 + $0xa0] sm:$0xff] %vm728_vm1, %v4606_v28  ;;  %v4614_v50 = vmax.f32 %v4601_v41, %v1192_v30 }
 0x388   : > { %1423 = vperm.xlu0 %3280, %v4546_v52   ;;  %v5523_v52 = vsub.f32 %v4445_v9, %v4453_v15  ;;  %v5525_v9 = vsub.f32 %v4464_v56, %v4469_v62  ;;  %v1273_v56 = vsub.f32 %v4576_v8, %v4586_v22 }
 0x389   : > { %2430 = vst.msk [vmem:[#allocation3 + $0xa8] sm:$0xff] %vm728_vm1, %v4614_v50 }
 0x38a   : > { %v1299_v15 = vmul.f32 1.442695, %v5525_v9  ;;  %v1323_v8 = vmul.f32 1.442695, %v1273_v56 }
 0x38b   : > { %v4645_v46 = vpop.eup %3290 }
 0x38c   : > { %1428 = vperm.xlu0 %3280, %v4549_v44   ;;  %v1195_v30 = vpop.xlane.xlu0 %1194  ;;  %v1295_v44 = vmul.f32 1.442695, %v5523_v52  ;;  %v4656_v33 = vpop.eup %3292  ;;  %v1272_v52 = vsub.f32 %v4563_v23, %v4569_v32 }
 0x38d   : > { %v4628_v6 = vmax.f32 %v4622_v0, %v1195_v30  ;;  %v4648_v30 = vld [vmem:[#allocation3 + $0xc8] sm:$0xff]  ;;  %5524 = vst [vmem:[#allocation67_spill] sm:$0xff] %v4656_v33  ;;  %v4658_v26 = vpop.eup %3294 }
 0x38e   : > { %v1198_v25 = vpop.xlane.xlu1 %1197  ;;  %3298 = vpow2.f32 %v1295_v44 }
 0x38f   : > { %v4633_v16 = vmax.f32 %v4625_v19, %v1198_v25  ;;  %2431 = vst.msk [vmem:[#allocation3 + $0xb0] sm:$0xff] %vm728_vm1, %v4628_v6  ;;  %3300 = vpow2.f32 %v1299_v15  ;;  %v4687_v9 = vpop.eup %3296 }
 0x390   : > { %1977 = vperm.xlu0 %3280, %v4630_v1  }
 0x391   : > { %2432 = vst.msk [vmem:[#allocation3 + $0xb8] sm:$0xff] %vm728_vm1, %v4633_v16 }
 0x394   : > { %1987 = vperm.xlu0 %3280, %v4645_v46   ;;  %v1201_v25 = vpop.xlane.xlu0 %1200 }
 0x395   : > { %v4654_v36 = vmax.f32 %v4643_v37, %v1201_v25  ;;  %v4676_v25 = vld [vmem:[#allocation3 + $0xd0] sm:$0xff] }
 0x396   : > { %v1204_v20 = vpop.xlane.xlu1 %1203 }
 0x397   : > { %v4661_v1 = vmax.f32 %v4648_v30, %v1204_v20  ;;  %2433 = vst.msk [vmem:[#allocation3 + $0xc0] sm:$0xff] %vm728_vm1, %v4654_v36  ;;  %v1319_v20 = vmul.f32 1.442695, %v1271_v17 }
 0x398   : > { %1967 = vperm.xlu1 %3281, %v4656_v33   ;;  %1997 = vperm.xlu0 %3280, %v4658_v26   ;;  %v1321_v33 = vmul.f32 1.442695, %v1272_v52  ;;  %v4704_v52 = vld [vmem:[#allocation3 + $0xe0] sm:$0xff] }
 0x399   : > { %2434 = vst.msk [vmem:[#allocation3 + $0xc8] sm:$0xff] %vm728_vm1, %v4661_v1  ;;  %3302 = vpow2.f32 %v1319_v20  ;;  %5526 = vst [vmem:[#allocation68_spill] sm:$0xff] %v4704_v52 }
 0x39a   : > { %3304 = vpow2.f32 %v1321_v33  ;;  %v4710_v33 = vld [vmem:[#allocation3 + $0xe8] sm:$0xff] }
 0x39b   : > { %5527 = vst [vmem:[#allocation69_spill] sm:$0xff] %v4710_v33  ;;  %3306 = vpow2.f32 %v1323_v8 }
 0x39c   : > { %1438 = vperm.xlu0 %3280, %v4569_v32   ;;  %1433 = vperm.xlu1 %3281, %v4566_v21   ;;  %v1207_v44 = vpop.xlane.xlu0 %1206  ;;  %v1274_v21 = vsub.f32 %v4581_v29, %v4589_v18  ;;  %v1275_v29 = vsub.f32 %v4598_v13, %v4606_v28 }
 0x39d   : > { %v4685_v62 = vmax.f32 %v4676_v25, %v1207_v44  ;;  %v4706_v44 = vpop.eup %3298 }
 0x39e   : > { %v1210_v23 = vpop.xlane.xlu1 %1209  ;;  %v1325_v20 = vmul.f32 1.442695, %v1274_v21  ;;  %v4717_v15 = vpop.eup %3300  ;;  %v1327_v13 = vmul.f32 1.442695, %v1275_v29  ;;  %v1276_v21 = vsub.f32 %v4601_v41, %v4614_v50  ;;  %v1278_v29 = vsub.f32 %v4625_v19, %v4633_v16 }
 0x39f   : > { %v4690_v17 = vmax.f32 %v4680_v24, %v1210_v23  ;;  %2435 = vst.msk [vmem:[#allocation3 + $0xd0] sm:$0xff] %vm728_vm1, %v4685_v62 }
 0x3a0   : > { %1972 = vperm.xlu1 %3281, %v4687_v9   ;;  %1443 = vperm.xlu0 %3280, %v4586_v22   ;;  %3308 = vpow2.f32 %v1325_v20  ;;  %v1277_v20 = vsub.f32 %v4622_v0, %v4628_v6  ;;  %v5529_v0 = vsub.f32 %v4481_v40, %v4487_v58 }
 0x3a1   : > { %2436 = vst.msk [vmem:[#allocation3 + $0xd8] sm:$0xff] %vm728_vm1, %v4690_v17  ;;  %3310 = vpow2.f32 %v1327_v13 }
 0x3a2   : > { %v1303_v13 = vmul.f32 1.442695, %v5529_v0 }
 0x3a4   : > { %1982 = vperm.xlu1 %3281, %v4706_v44   ;;  %1448 = vperm.xlu0 %3280, %v4589_v18   ;;  %v1213_v22 = vpop.xlane.xlu0 %1212 }
 0x3a5   : > { %v4715_v56 = vmax.f32 %v4704_v52, %v1213_v22  ;;  %v4734_v22 = vpop.eup %3302  ;;  %v1333_v52 = vmul.f32 1.442695, %v1278_v29 }
 0x3a6   : > { %v1216_v23 = vpop.xlane.xlu1 %1215  ;;  %v4736_v32 = vpop.eup %3304 }
 0x3a7   : > { %5528 = vst [vmem:[#allocation70_spill] sm:$0xff] %v4715_v56  ;;  %2437 = vst.msk [vmem:[#allocation3 + $0xe0] sm:$0xff] %vm728_vm1, %v4715_v56  ;;  %v4724_v18 = vmax.f32 %v4710_v33, %v1216_v23  ;;  %v4742_v41 = vpop.eup %3306  ;;  %v1331_v23 = vmul.f32 1.442695, %v1277_v20 }
 0x3a8   : > { %1992 = vperm.xlu1 %3281, %v4717_v15   ;;  %1453 = vperm.xlu0 %3280, %v4606_v28   ;;  %v1329_v28 = vmul.f32 1.442695, %v1276_v21 }
 0x3a9   : > { %2438 = vst.msk [vmem:[#allocation3 + $0xe8] sm:$0xff] %vm728_vm1, %v4724_v18 }
 0x3aa   : > { %3312 = vpow2.f32 %v1329_v28  ;;  %v4748_v8 = vpop.eup %3308 }
 0x3ab   : > { %3314 = vpow2.f32 %v1331_v23  ;;  %v4755_v19 = vpop.eup %3310 }
 0x3ac   : > { %2042 = vperm.xlu1 %3281, %v4734_v22   ;;  %2047 = vperm.xlu0 %3280, %v4736_v32   ;;  %3316 = vpow2.f32 %v1333_v52 }
 0x3ad   : > { %3318 = vpow2.f32 %v1303_v13 }
 0x3b0   : > { %2052 = vperm.xlu1 %3281, %v4742_v41   ;;  %1458 = vperm.xlu0 %3280, %v4614_v50  }
 0x3b4   : > { %2057 = vperm.xlu0 %3280, %v4748_v8   ;;  %1463 = vperm.xlu1 %3281, %v4628_v6   ;;  %v4763_v58 = vpop.eup %3312 }
 0x3b5   : > { %v4772_v52 = vpop.eup %3314 }
 0x3b6   : > { %v1354_v21 = vpop.permute.xlu0 %1353  ;;  %5531 = vst [vmem:[#allocation71_spill] sm:$0xff] %v4772_v52 }
 0x3b7   : > { %v1511_v33 = vsub.f32 %v4089_v5, %v1354_v21  ;;  %v1512_v50 = vsub.f32 %v4091_v42, %v1354_v21  ;;  %v5530_v42 = vsub.f32 %v4484_v39, %v4494_v35  ;;  %v1280_v35 = vsub.f32 %v4648_v30, %v4661_v1  ;;  %v4780_v21 = vpop.eup %3316 }
 0x3b8   : > { %v1359_v28 = vpop.permute.xlu1 %1358  ;;  %1468 = vperm.xlu0 %3280, %v4633_v16   ;;  %2062 = vperm.xlu1 %3281, %v4755_v19   ;;  %5532 = vst [vmem:[#allocation72_spill] sm:$0xff] %v4780_v21 }
 0x3b9   : > { %v1575_v20 = vmul.f32 1.442695, %v1511_v33  ;;  %v1577_v6 = vmul.f32 1.442695, %v1512_v50  ;;  %v1513_v29 = vsub.f32 %v4093_v43, %v1359_v28  ;;  %v1514_v40 = vsub.f32 %v4097_v45, %v1359_v28 }
 0x3ba   : > { %v1305_v16 = vmul.f32 1.442695, %v5530_v42  ;;  %v1279_v43 = vsub.f32 %v4643_v37, %v4654_v36 }
 0x3bb   : > { %3320 = vpow2.f32 %v1575_v20  ;;  %v1579_v23 = vmul.f32 1.442695, %v1513_v29  ;;  %v1581_v5 = vmul.f32 1.442695, %v1514_v40 }
 0x3bc   : > { %3322 = vpow2.f32 %v1577_v6  ;;  %2067 = vperm.xlu0 %3280, %v4763_v58   ;;  %1473 = vperm.xlu1 %3281, %v4654_v36   ;;  %v1335_v37 = vmul.f32 1.442695, %v1279_v43 }
 0x3bd   : > { %3324 = vpow2.f32 %v1579_v23 }
 0x3be   : > { %3326 = vpow2.f32 %v1581_v5  ;;  %v1364_v45 = vpop.permute.xlu1 %1363 }
 0x3bf   : > { %v1515_v33 = vsub.f32 %v4101_v47, %v1364_v45  ;;  %v1516_v0 = vsub.f32 %v4103_v48, %v1364_v45  ;;  %3328 = vpow2.f32 %v1305_v16  ;;  %v4784_v48 = vpop.eup %3318 }
 0x3c0   : > { %1478 = vperm.xlu0 %3280, %v4661_v1   ;;  %2072 = vperm.xlu1 %3281, %v4772_v52   ;;  %v1337_v1 = vmul.f32 1.442695, %v1280_v35 }
 0x3c1   : > { %v1583_v39 = vmul.f32 1.442695, %v1515_v33  ;;  %v1585_v13 = vmul.f32 1.442695, %v1516_v0 }
 0x3c2   : > { %v1369_v36 = vpop.permute.xlu1 %1368 }
 0x3c3   : > { %3330 = vpow2.f32 %v1583_v39  ;;  %v1517_v50 = vsub.f32 %v4105_v49, %v1369_v36  ;;  %v1518_v47 = vsub.f32 %v4109_v51, %v1369_v36 }
 0x3c4   : > { %3332 = vpow2.f32 %v1585_v13  ;;  %2077 = vperm.xlu0 %3280, %v4780_v21   ;;  %1483 = vperm.xlu1 %3281, %v4685_v62  }
 0x3c5   : > { %v3321_v28 = vpop.eup %3320  ;;  %v1587_v30 = vmul.f32 1.442695, %v1517_v50  ;;  %v1589_v20 = vmul.f32 1.442695, %v1518_v47  ;;  %3334 = vpow2.f32 %v1335_v37 }
 0x3c6   : > { %v3323_v6 = vpop.eup %3322 }
 0x3c7   : > { %v3325_v29 = vpop.eup %3324  ;;  %3336 = vpow2.f32 %v1587_v30  ;;  %v4788_v40 = vadd.f32 %v3323_v6, %v3321_v28 }
 0x3c8   : > { %v3327_v49 = vpop.eup %3326  ;;  %3338 = vpow2.f32 %v1589_v20  ;;  %1488 = vperm.xlu0 %3280, %v4690_v17   ;;  %2002 = vperm.xlu1 %3281, %v4784_v48   ;;  %v2152_v51 = vpack.c.bf16 %v3325_v29, %v3321_v28 }
 0x3c9   : > { %3340 = vpow2.f32 %v1337_v1  ;;  %v2153_v23 = vpack.c.bf16 %v3327_v49, %v3323_v6  ;;  %v4792_v5 = vadd.f32 %v3327_v49, %v3325_v29  ;;  %v4794_v42 = vpop.eup %3328  ;;  %v5535_v49 = vsub.f32 %v4500_v34, %v4505_v31  ;;  %v4828_v34 = vld [vmem:[#allocation3 + $0xf0] sm:$0xff] }
 0x3ca   : > { %5536 = vst [vmem:[#allocation75_spill] sm:$0xff] %v4828_v34 }
 0x3cb   : > { %2216 = vmatprep.mubr.bf16.mxu0 %v2153_v23 }
 0x3cc   : > { %2217 = vmatmul.mubr.bf16.vlgmr.msra.gmra.mrb[20].mxu0 %v2152_v51  ;;  %2007 = vperm.xlu0 %3280, %v4794_v42   ;;  %v1307_v51 = vmul.f32 1.442695, %v5535_v49 }
 0x3cd   : > { %v3331_v16 = vpop.eup %3330  ;;  %1493 = vperm.xlu1 %3281, %v4715_v56   ;;  %v5560_v56 = vld [vmem:[#allocation30_spill] sm:$0xff] }
 0x3ce   : > { %v3333_v43 = vpop.eup %3332  ;;  %v1384_v45 = vpop.permute.xlu1 %1383 }
 0x3cf   : > { %v1523_v33 = vsub.f32 %v4125_v59, %v1384_v45  ;;  %v1524_v0 = vsub.f32 %v4127_v60, %v1384_v45  ;;  %v4800_v35 = vadd.f32 %v3333_v43, %v3331_v16  ;;  %v4802_v39 = vpop.eup %3334 }
 0x3d0   : > { %5533 = vst [vmem:[#allocation73_spill] sm:$0xff] %v4802_v39  ;;  %1498 = vperm.xlu0 %3280, %v4724_v18  }
 0x3d1   : > { %v3337_v13 = vpop.eup %3336  ;;  %v1599_v37 = vmul.f32 1.442695, %v1523_v33  ;;  %v1601_v36 = vmul.f32 1.442695, %v1524_v0  ;;  %2082 = vperm.xlu1 %3281, %v4802_v39   ;;  %v5541_v39 = vld [vmem:[#allocation19_spill] sm:$0xff] }
 0x3d2   : > { %v3339_v50 = vpop.eup %3338  ;;  %v1389_v47 = vpop.permute.xlu1 %1388  ;;  %v2154_v28 = vpack.c.bf16 %v3337_v13, %v3331_v16 }
 0x3d3   : > { %v4806_v1 = vpop.eup %3340  ;;  %3342 = vpow2.f32 %v1599_v37  ;;  %v1525_v59 = vsub.f32 %v4129_v61, %v1389_v47  ;;  %v1526_v60 = vsub.f32 %v4133_v63, %v1389_v47  ;;  %v2155_v30 = vpack.c.bf16 %v3339_v50, %v3333_v43 }
 0x3d4   : > { %5534 = vst [vmem:[#allocation74_spill] sm:$0xff] %v4806_v1  ;;  %3344 = vpow2.f32 %v1601_v36  ;;  %2087 = vperm.xlu0 %3280, %v4806_v1   ;;  %v4811_v20 = vadd.f32 %v3339_v50, %v3337_v13 }
 0x3d5   : > { %v1603_v6 = vmul.f32 1.442695, %v1525_v59  ;;  %v1605_v29 = vmul.f32 1.442695, %v1526_v60  ;;  %2224 = vmatprep.mubr.bf16.mxu0 %v2155_v30 }
 0x3d6   : > { %2225 = vmatmul.mubr.bf16.gmra.mrb[24].mxu0 %v2154_v28 }
 0x3d7   : > { %3346 = vpow2.f32 %v1603_v6 }
 0x3d8   : > { %3348 = vpow2.f32 %v1605_v29 }
 0x3d9   : > { %3350 = vpow2.f32 %v1307_v51 }
 0x3dd   : > { %v4816_v23 = vpop.eup %3342 }
 0x3de   : > { %v4818_v61 = vpop.eup %3344  ;;  %v1404_v63 = vpop.permute.xlu1 %1403 }
 0x3df   : > { %v1531_v16 = vsub.f32 %v4280_v10, %v1404_v63  ;;  %v1532_v43 = vsub.f32 %v4282_v11, %v1404_v63  ;;  %v4824_v45 = vadd.f32 %v4818_v61, %v4816_v23 }
 0x3e1   : > { %v4826_v33 = vpop.eup %3346  ;;  %v1615_v0 = vmul.f32 1.442695, %v1531_v16  ;;  %v1617_v13 = vmul.f32 1.442695, %v1532_v43 }
 0x3e2   : > { %v4830_v31 = vpop.eup %3348  ;;  %v1409_v37 = vpop.permute.xlu1 %1408 }
 0x3e3   : > { %3352 = vpow2.f32 %v1615_v0  ;;  %v1533_v10 = vsub.f32 %v4284_v12, %v1409_v37  ;;  %v1534_v11 = vsub.f32 %v4288_v14, %v1409_v37  ;;  %v1219_v50 = vpop.xlane.xlu0 %1218  ;;  %v4843_v59 = vadd.f32 %v4830_v31, %v4826_v33  ;;  %v4850_v12 = vpop.eup %3350 }
 0x3e4   : > { %3354 = vpow2.f32 %v1617_v13  ;;  %v4839_v28 = vmax.f32 %v4828_v34, %v1219_v50 }
 0x3e5   : > { %v1619_v60 = vmul.f32 1.442695, %v1533_v10  ;;  %v1621_v30 = vmul.f32 1.442695, %v1534_v11 }
 0x3e6   : > { %5537 = vst [vmem:[#allocation76_spill] sm:$0xff] %v4839_v28  ;;  %2439 = vst.msk [vmem:[#allocation3 + $0xf0] sm:$0xff] %vm728_vm1, %v4839_v28  ;;  %1503 = vperm.xlu1 %3281, %v4839_v28   ;;  %v5542_v28 = vld [vmem:[#allocation20_spill] sm:$0xff] }
 0x3e7   : > { %3356 = vpow2.f32 %v1619_v60 }
 0x3e8   : > { %3358 = vpow2.f32 %v1621_v30 }
 0x3ea   : > { %2012 = vperm.xlu1 %3281, %v4850_v12  }
 0x3eb   : > { %v1374_v14 = vpop.permute.xlu0 %1373 }
 0x3ec   : > { %v1519_v29 = vsub.f32 %v4113_v53, %v1374_v14  ;;  %v1520_v49 = vsub.f32 %v4115_v54, %v1374_v14 }
 0x3ed   : > { %v4855_v51 = vpop.eup %3352 }
 0x3ee   : > { %v4857_v63 = vpop.eup %3354  ;;  %v1591_v16 = vmul.f32 1.442695, %v1519_v29  ;;  %v1593_v43 = vmul.f32 1.442695, %v1520_v49 }
 0x3ef   : > { %v1379_v0 = vpop.permute.xlu0 %1378  ;;  %v4861_v13 = vadd.f32 %v4857_v63, %v4855_v51 }
 0x3f0   : > { %3360 = vpow2.f32 %v1591_v16  ;;  %v1521_v37 = vsub.f32 %v4117_v55, %v1379_v0  ;;  %v1522_v10 = vsub.f32 %v4121_v57, %v1379_v0 }
 0x3f1   : > { %v4865_v11 = vpop.eup %3356  ;;  %3362 = vpow2.f32 %v1593_v43 }
 0x3f2   : > { %v4867_v53 = vpop.eup %3358  ;;  %v1595_v54 = vmul.f32 1.442695, %v1521_v37  ;;  %v1597_v50 = vmul.f32 1.442695, %v1522_v10 }
 0x3f3   : > { %v1394_v30 = vpop.permute.xlu0 %1393  ;;  %v4875_v29 = vadd.f32 %v4867_v53, %v4865_v11 }
 0x3f4   : > { %3364 = vpow2.f32 %v1595_v54  ;;  %v1527_v55 = vsub.f32 %v4268_v2, %v1394_v30  ;;  %v1528_v57 = vsub.f32 %v4270_v3, %v1394_v30 }
 0x3f5   : > { %3366 = vpow2.f32 %v1597_v50 }
 0x3f6   : > { %v1607_v49 = vmul.f32 1.442695, %v1527_v55  ;;  %v1609_v16 = vmul.f32 1.442695, %v1528_v57  ;;  %v5538_v55 = vld [vmem:[#allocation17_spill] sm:$0xff] }
 0x3f7   : > { %v1399_v43 = vpop.permute.xlu0 %1398 }
 0x3f8   : > { %3368 = vpow2.f32 %v1607_v49  ;;  %v1529_v0 = vsub.f32 %v4272_v4, %v1399_v43  ;;  %v1530_v37 = vsub.f32 %v4276_v7, %v1399_v43  ;;  %v5539_v4 = vld [vmem:[#allocation18_spill] sm:$0xff] }
 0x3f9   : > { %3370 = vpow2.f32 %v1609_v16 }
 0x3fa   : > { %v3361_v10 = vpop.eup %3360  ;;  %v1611_v6 = vmul.f32 1.442695, %v1529_v0  ;;  %v1613_v60 = vmul.f32 1.442695, %v1530_v37 }
 0x3fb   : > { %v3363_v14 = vpop.eup %3362  ;;  %v4881_v36 = vpop.permute.xlu0 %1962 }
 0x3fc   : > { %3372 = vpow2.f32 %v1611_v6  ;;  %v4883_v2 = vadd.f32 %v3363_v14, %v3361_v10 }
 0x3fd   : > { %3374 = vpow2.f32 %v1613_v60  ;;  %v5540_v60 = vpack.c.bf16 %v4830_v31, %v4818_v61 }
 0x3fe   : > { %v3365_v3 = vpop.eup %3364 }
 0x3ff   : > { %v3367_v54 = vpop.eup %3366  ;;  %v1414_v50 = vpop.permute.xlu0 %1413  ;;  %v2156_v30 = vpack.c.bf16 %v3365_v3, %v3361_v10 }
 0x400   : > { %v1535_v57 = vsub.f32 %v5538_v55, %v1414_v50  ;;  %v1536_v49 = vsub.f32 %v5539_v4, %v1414_v50  ;;  %v2157_v7 = vpack.c.bf16 %v3367_v54, %v3363_v14  ;;  %v1782_v16 = vadd.f32 %v3367_v54, %v3365_v3 }
 0x402   : > { %v3369_v43 = vpop.eup %3368  ;;  %v1623_v0 = vmul.f32 1.442695, %v1535_v57  ;;  %v1625_v37 = vmul.f32 1.442695, %v1536_v49  ;;  %2232 = vmatprep.mubr.bf16.mxu0 %v2157_v7  ;;  %v5544_v7 = vld [vmem:[#allocation22_spill] sm:$0xff] }
 0x403   : > { %v3371_v47 = vpop.eup %3370  ;;  %2233 = vmatmul.mubr.bf16.gmra.mrb[28].mxu0 %v2156_v30  ;;  %v1419_v6 = vpop.permute.xlu0 %1418  ;;  %v5543_v30 = vld [vmem:[#allocation21_spill] sm:$0xff] }
 0x404   : > { %3376 = vpow2.f32 %v1623_v0  ;;  %2240 = vmatprep.mubr.bf16.mxu0 %v5540_v60  ;;  %v1537_v10 = vsub.f32 %v5541_v39, %v1419_v6  ;;  %v1538_v55 = vsub.f32 %v5542_v28, %v1419_v6  ;;  %v4892_v34 = vadd.f32 %v3371_v47, %v3369_v43  ;;  %v5545_v28 = vld [vmem:[#allocation55_spill] sm:$0xff]  ;;  %v5546_v6 = vld [vmem:[#allocation56_spill] sm:$0xff] }
 0x405   : > { %3378 = vpow2.f32 %v1625_v37  ;;  %v5547_v1 = vsub.f32 %v5545_v28, %v5546_v6 }
 0x406   : > { %v3373_v14 = vpop.eup %3372  ;;  %v1627_v3 = vmul.f32 1.442695, %v1537_v10  ;;  %v1629_v54 = vmul.f32 1.442695, %v1538_v55  ;;  %v5548_v10 = vpack.c.bf16 %v4826_v33, %v4816_v23 }
 0x407   : > { %v3375_v50 = vpop.eup %3374  ;;  %v1424_v57 = vpop.permute.xlu0 %1423  ;;  %v2160_v4 = vpack.c.bf16 %v3373_v14, %v3369_v43  ;;  %v1309_v37 = vmul.f32 1.442695, %v5547_v1  ;;  %v5549_v43 = vld [vmem:[#allocation23_spill] sm:$0xff] }
 0x408   : > { %3380 = vpow2.f32 %v1627_v3  ;;  %v1539_v49 = vsub.f32 %v5543_v30, %v1424_v57  ;;  %v1540_v0 = vsub.f32 %v5544_v7, %v1424_v57  ;;  %v2161_v61 = vpack.c.bf16 %v3375_v50, %v3371_v47  ;;  %v5550_v30 = vld [vmem:[#allocation24_spill] sm:$0xff] }
 0x409   : > { %3382 = vpow2.f32 %v1629_v54  ;;  %v1794_v31 = vadd.f32 %v3375_v50, %v3373_v14 }
 0x40a   : > { %v1631_v39 = vmul.f32 1.442695, %v1539_v49  ;;  %v1633_v60 = vmul.f32 1.442695, %v1540_v0  ;;  %v4913_v49 = vld [vmem:[#allocation3 + $0xf8] sm:$0xff] }
 0x40b   : > { %2241 = vmatmul.mubr.bf16.gmra.mrb[32].mxu0 %v5548_v10  ;;  %v1429_v55 = vpop.permute.xlu0 %1428  ;;  %5551 = vst [vmem:[#allocation17_spill] sm:$0xff] %v4913_v49 }
 0x40c   : > { %3384 = vpow2.f32 %v1631_v39  ;;  %2248 = vmatprep.mubr.bf16.mxu0 %v2161_v61  ;;  %v1541_v3 = vsub.f32 %v5549_v43, %v1429_v55  ;;  %v1542_v57 = vsub.f32 %v5550_v30, %v1429_v55  ;;  %v5552_v61 = vpack.c.bf16 %v4867_v53, %v4857_v63 }
 0x40d   : > { %3386 = vpow2.f32 %v1633_v60 }
 0x40e   : > { %v4904_v47 = vpop.eup %3376  ;;  %v1635_v14 = vmul.f32 1.442695, %v1541_v3  ;;  %v1637_v54 = vmul.f32 1.442695, %v1542_v57  ;;  %1768 = vadd.xlane.f32.xlu1 %v4788_v40  ;;  %3388 = vpow2.f32 %v1309_v37  ;;  %v5554_v3 = vpack.c.bf16 %v4865_v11, %v4855_v51 }
 0x40f   : > { %v3379_v50 = vpop.eup %3378  ;;  %v4907_v1 = vpop.permute.xlu0 %1977 }
 0x410   : > { %3390 = vpow2.f32 %v1635_v14  ;;  %v4910_v23 = vadd.f32 %v3379_v50, %v4904_v47 }
 0x411   : > { %3392 = vpow2.f32 %v1637_v54  ;;  %v5556_v54 = vld [vmem:[#allocation28_spill] sm:$0xff] }
 0x412   : > { %v3381_v33 = vpop.eup %3380  ;;  %1777 = vadd.xlane.f32.xlu1 %v4811_v20 }
 0x413   : > { %v3383_v7 = vpop.eup %3382  ;;  %2249 = vmatmul.mubr.bf16.gmra.mrb[36].mxu0 %v2160_v4  ;;  %v4915_v0 = vpop.permute.xlu0 %1987  ;;  %v2164_v40 = vpack.c.bf16 %v3381_v33, %v4904_v47  ;;  %v5555_v47 = vld [vmem:[#allocation27_spill] sm:$0xff]  ;;  %v5558_v4 = vld [vmem:[#allocation26_spill] sm:$0xff] }
 0x414   : > { %2256 = vmatprep.mubr.bf16.mxu0 %v5552_v61  ;;  %v1222_v39 = vpop.xlane.xlu1 %1221  ;;  %v2165_v60 = vpack.c.bf16 %v3383_v7, %v3379_v50  ;;  %v1806_v28 = vadd.f32 %v3383_v7, %v3381_v33 }
 0x415   : > { %v4922_v6 = vmax.f32 %v4913_v49, %v1222_v39  ;;  %v5557_v39 = vld [vmem:[#allocation25_spill] sm:$0xff] }
 0x416   : > { %v4924_v37 = vpop.eup %3384  ;;  %1783 = vadd.xlane.f32.xlu1 %v1782_v16 }
 0x417   : > { %5553 = vst [vmem:[#allocation18_spill] sm:$0xff] %v4922_v6  ;;  %v3387_v20 = vpop.eup %3386  ;;  %2440 = vst.msk [vmem:[#allocation3 + $0xf8] sm:$0xff] %vm728_vm1, %v4922_v6  ;;  %1508 = vperm.xlu0 %3280, %v4922_v6   ;;  %v4931_v63 = vpop.permute.xlu0 %1997 }
 0x418   : > { %v4933_v53 = vpop.permute.xlu1 %1967  ;;  %v4936_v10 = vadd.f32 %v3387_v20, %v4924_v37  ;;  %v4938_v55 = vpop.eup %3388 }
 0x41a   : > { %v3391_v43 = vpop.eup %3390  ;;  %1789 = vadd.xlane.f32.xlu1 %v4843_v59 }
 0x41b   : > { %v3393_v16 = vpop.eup %3392  ;;  %2257 = vmatmul.mubr.bf16.gmra.mrb[40].mxu0 %v5554_v3  ;;  %2017 = vperm.xlu0 %3280, %v4938_v55   ;;  %v1439_v30 = vpop.permute.xlu0 %1438  ;;  %v2166_v57 = vpack.c.bf16 %v3391_v43, %v4924_v37  ;;  %v5559_v37 = vld [vmem:[#allocation29_spill] sm:$0xff] }
 0x41c   : > { %2264 = vmatprep.mubr.bf16.mxu0 %v2165_v60  ;;  %v1545_v14 = vsub.f32 %v5555_v47, %v1439_v30  ;;  %v1546_v50 = vsub.f32 %v5556_v54, %v1439_v30  ;;  %v1434_v33 = vpop.permute.xlu1 %1433  ;;  %v2167_v7 = vpack.c.bf16 %v3393_v16, %v3387_v20  ;;  %v1812_v61 = vadd.f32 %v3393_v16, %v3391_v43  ;;  %v5563_v54 = vld [vmem:[#allocation33_spill] sm:$0xff] }
 0x41d   : > { %v1543_v59 = vsub.f32 %v5557_v39, %v1434_v33  ;;  %v1544_v6 = vsub.f32 %v5558_v4, %v1434_v33 }
 0x41e   : > { %v1643_v49 = vmul.f32 1.442695, %v1545_v14  ;;  %v1645_v51 = vmul.f32 1.442695, %v1546_v50  ;;  %1795 = vadd.xlane.f32.xlu1 %v1794_v31  ;;  %v5561_v31 = vld [vmem:[#allocation31_spill] sm:$0xff] }
 0x41f   : > { %v1639_v11 = vmul.f32 1.442695, %v1543_v59  ;;  %v1641_v3 = vmul.f32 1.442695, %v1544_v6  ;;  %v1444_v21 = vpop.permute.xlu0 %1443 }
 0x420   : > { %3394 = vpow2.f32 %v1643_v49  ;;  %v1547_v60 = vsub.f32 %v5559_v37, %v1444_v21  ;;  %v1548_v47 = vsub.f32 %v5560_v56, %v1444_v21  ;;  %v4952_v52 = vpop.permute.xlu1 %1972  ;;  %v5562_v49 = vld [vmem:[#allocation32_spill] sm:$0xff] }
 0x421   : > { %3396 = vpow2.f32 %v1645_v51 }
 0x422   : > { %3398 = vpow2.f32 %v1639_v11  ;;  %v1647_v20 = vmul.f32 1.442695, %v1547_v60  ;;  %v1649_v43 = vmul.f32 1.442695, %v1548_v47  ;;  %1801 = vadd.xlane.f32.xlu1 %v4875_v29  ;;  %v5564_v29 = vld [vmem:[#allocation34_spill] sm:$0xff] }
 0x423   : > { %3400 = vpow2.f32 %v1641_v3  ;;  %2265 = vmatmul.mubr.bf16.gmra.mrb[44].mxu0 %v2164_v40  ;;  %v1449_v4 = vpop.permute.xlu0 %1448 }
 0x424   : > { %3402 = vpow2.f32 %v1647_v20  ;;  %2272 = vmatprep.mubr.bf16.mxu0 %v2167_v7  ;;  %v1549_v6 = vsub.f32 %v5561_v31, %v1449_v4  ;;  %v1550_v16 = vsub.f32 %v5562_v49, %v1449_v4  ;;  %v4957_v30 = vpop.permute.xlu1 %1982  ;;  %v5566_v49 = vld [vmem:[#allocation36_spill] sm:$0xff] }
 0x425   : > { %3404 = vpow2.f32 %v1649_v43 }
 0x426   : > { %v1651_v56 = vmul.f32 1.442695, %v1549_v6  ;;  %v1653_v21 = vmul.f32 1.442695, %v1550_v16  ;;  %1807 = vadd.xlane.f32.xlu1 %v1806_v28 }
 0x427   : > { %v1454_v14 = vpop.permute.xlu0 %1453 }
 0x428   : > { %3406 = vpow2.f32 %v1651_v56  ;;  %v1551_v50 = vsub.f32 %v5563_v54, %v1454_v14  ;;  %v1552_v33 = vsub.f32 %v5564_v29, %v1454_v14  ;;  %v4961_v40 = vpop.permute.xlu1 %1992 }
 0x429   : > { %3408 = vpow2.f32 %v1653_v21 }
 0x42a   : > { %v3395_v7 = vpop.eup %3394  ;;  %v1655_v39 = vmul.f32 1.442695, %v1551_v50  ;;  %v1657_v59 = vmul.f32 1.442695, %v1552_v33  ;;  %1813 = vadd.xlane.f32.xlu1 %v1812_v61  ;;  %v5565_v61 = vld [vmem:[#allocation35_spill] sm:$0xff] }
 0x42b   : > { %v3397_v51 = vpop.eup %3396  ;;  %2273 = vmatmul.mubr.bf16.gmra.mrb[48].mxu0 %v2166_v57  ;;  %v4963_v11 = vpop.permute.xlu0 %2047 }
 0x42c   : > { %v3399_v3 = vpop.eup %3398  ;;  %3410 = vpow2.f32 %v1655_v39  ;;  %v4965_v28 = vpop.permute.xlu1 %2042  ;;  %v1818_v37 = vadd.f32 %v3397_v51, %v3395_v7 }
 0x42d   : > { %v3401_v60 = vpop.eup %3400  ;;  %3412 = vpow2.f32 %v1657_v59  ;;  %v2168_v47 = vpack.c.bf16 %v3395_v7, %v3399_v3 }
 0x42e   : > { %v3403_v20 = vpop.eup %3402  ;;  %v2169_v43 = vpack.c.bf16 %v3397_v51, %v3401_v60  ;;  %1819 = vadd.xlane.f32.xlu1 %v1818_v37  ;;  %v4967_v4 = vadd.f32 %v3401_v60, %v3399_v3  ;;  %v5569_v3 = vld [vmem:[#allocation37_spill] sm:$0xff]  ;;  %v5570_v60 = vld [vmem:[#allocation38_spill] sm:$0xff] }
 0x42f   : > { %v3405_v31 = vpop.eup %3404  ;;  %v1459_v6 = vpop.permute.xlu0 %1458 }
 0x430   : > { %2280 = vmatprep.mubr.bf16.mxu0 %v2169_v43  ;;  %v1553_v57 = vsub.f32 %v5565_v61, %v1459_v6  ;;  %v1554_v16 = vsub.f32 %v5566_v49, %v1459_v6  ;;  %v4971_v56 = vpop.permute.xlu1 %2052  ;;  %v4973_v21 = vadd.f32 %v3405_v31, %v3403_v20 }
 0x431   : > { %5567 = vst [vmem:[#allocation19_spill] sm:$0xff] %v4971_v56 }
 0x432   : > { %v3407_v14 = vpop.eup %3406  ;;  %v1659_v54 = vmul.f32 1.442695, %v1553_v57  ;;  %v1661_v50 = vmul.f32 1.442695, %v1554_v16 }
 0x433   : > { %v3409_v29 = vpop.eup %3408  ;;  %2281 = vmatmul.mubr.bf16.gmra.mrb[52].mxu0 %v2168_v47  ;;  %v4975_v33 = vpop.permute.xlu0 %2057  ;;  %v2170_v7 = vpack.c.bf16 %v3407_v14, %v3403_v20  ;;  %v5571_v47 = vld [vmem:[#allocation39_spill] sm:$0xff] }
 0x434   : > { %5568 = vst [vmem:[#allocation20_spill] sm:$0xff] %v4975_v33  ;;  %3414 = vpow2.f32 %v1659_v54  ;;  %v1464_v39 = vpop.permute.xlu1 %1463  ;;  %v2171_v59 = vpack.c.bf16 %v3409_v29, %v3405_v31  ;;  %v1824_v51 = vadd.f32 %v3409_v29, %v3407_v14  ;;  %v5572_v33 = vld [vmem:[#allocation40_spill] sm:$0xff] }
 0x435   : > { %3416 = vpow2.f32 %v1661_v50  ;;  %v1555_v37 = vsub.f32 %v5569_v3, %v1464_v39  ;;  %v1556_v43 = vsub.f32 %v5570_v60, %v1464_v39  ;;  %v5574_v3 = vld [vmem:[#allocation42_spill] sm:$0xff] }
 0x436   : > { %v3411_v6 = vpop.eup %3410  ;;  %2288 = vmatprep.mubr.bf16.mxu0 %v2171_v59  ;;  %1825 = vadd.xlane.f32.xlu1 %v1824_v51  ;;  %v5573_v59 = vld [vmem:[#allocation41_spill] sm:$0xff] }
 0x437   : > { %v3413_v61 = vpop.eup %3412  ;;  %v1663_v57 = vmul.f32 1.442695, %v1555_v37  ;;  %v1665_v49 = vmul.f32 1.442695, %v1556_v43  ;;  %v1469_v16 = vpop.permute.xlu0 %1468 }
 0x438   : > { %v1557_v56 = vsub.f32 %v5571_v47, %v1469_v16  ;;  %v1558_v20 = vsub.f32 %v5572_v33, %v1469_v16  ;;  %v4981_v54 = vpop.permute.xlu1 %2062  ;;  %v4983_v31 = vadd.f32 %v3413_v61, %v3411_v6  ;;  %v5575_v16 = vld [vmem:[#allocation43_spill] sm:$0xff] }
 0x439   : > { %3418 = vpow2.f32 %v1663_v57 }
 0x43a   : > { %3420 = vpow2.f32 %v1665_v49  ;;  %v1667_v14 = vmul.f32 1.442695, %v1557_v56  ;;  %v1669_v50 = vmul.f32 1.442695, %v1558_v20  ;;  %1771 = vadd.xlane.f32.xlu0 %v4792_v5 }
 0x43b   : > { %2289 = vmatmul.mubr.bf16.gmra.mrb[56].mxu0 %v2170_v7  ;;  %v4986_v29 = vpop.permute.xlu0 %2067  ;;  %v5576_v7 = vld [vmem:[#allocation44_spill] sm:$0xff] }
 0x43c   : > { %3422 = vpow2.f32 %v1667_v14  ;;  %v1474_v39 = vpop.permute.xlu1 %1473 }
 0x43d   : > { %3424 = vpow2.f32 %v1669_v50  ;;  %v1559_v51 = vsub.f32 %v5573_v59, %v1474_v39  ;;  %v1560_v33 = vsub.f32 %v5574_v3, %v1474_v39 }
 0x43e   : > { %v3415_v37 = vpop.eup %3414  ;;  %1774 = vadd.xlane.f32.xlu0 %v4800_v35 }
 0x43f   : > { %v3417_v60 = vpop.eup %3416  ;;  %v1671_v43 = vmul.f32 1.442695, %v1559_v51  ;;  %v1673_v57 = vmul.f32 1.442695, %v1560_v33  ;;  %v1479_v56 = vpop.permute.xlu0 %1478  ;;  %v2172_v49 = vpack.c.bf16 %v3415_v37, %v3411_v6  ;;  %v5577_v51 = vsub.f32 %v4676_v25, %v4685_v62 }
 0x440   : > { %v1561_v5 = vsub.f32 %v5575_v16, %v1479_v56  ;;  %v1562_v47 = vsub.f32 %v5576_v7, %v1479_v56  ;;  %v4993_v20 = vpop.permute.xlu1 %2072  ;;  %v2173_v14 = vpack.c.bf16 %v3417_v60, %v3413_v61  ;;  %v1830_v50 = vadd.f32 %v3417_v60, %v3415_v37  ;;  %v5579_v37 = vld [vmem:[#allocation45_spill] sm:$0xff]  ;;  %v5581_v7 = vld [vmem:[#allocation47_spill] sm:$0xff] }
 0x441   : > { %3426 = vpow2.f32 %v1671_v43  ;;  %v1339_v3 = vmul.f32 1.442695, %v5577_v51  ;;  %v5580_v43 = vld [vmem:[#allocation46_spill] sm:$0xff] }
 0x442   : > { %3428 = vpow2.f32 %v1673_v57  ;;  %v1675_v59 = vmul.f32 1.442695, %v1561_v5  ;;  %v1677_v39 = vmul.f32 1.442695, %v1562_v47  ;;  %2296 = vmatprep.mubr.bf16.mxu0 %v2173_v14  ;;  %1831 = vadd.xlane.f32.xlu1 %v1830_v50  ;;  %v5582_v14 = vld [vmem:[#allocation48_spill] sm:$0xff] }
 0x443   : > { %v3419_v35 = vpop.eup %3418  ;;  %1780 = vadd.xlane.f32.xlu0 %v4883_v2  ;;  %2297 = vmatmul.mubr.bf16.gmra.mrb[60].mxu0 %v2172_v49  ;;  %v4999_v6 = vpop.permute.xlu0 %2077 }
 0x444   : > { %5578 = vst [vmem:[#allocation21_spill] sm:$0xff] %v4999_v6  ;;  %v3421_v33 = vpop.eup %3420  ;;  %3430 = vpow2.f32 %v1675_v59  ;;  %v1484_v61 = vpop.permute.xlu1 %1483 }
 0x445   : > { %3432 = vpow2.f32 %v1677_v39  ;;  %v1563_v60 = vsub.f32 %v5579_v37, %v1484_v61  ;;  %v1564_v57 = vsub.f32 %v5580_v43, %v1484_v61  ;;  %v5003_v56 = vadd.f32 %v3421_v33, %v3419_v35  ;;  %v5583_v43 = vld [vmem:[#allocation49_spill] sm:$0xff] }
 0x446   : > { %v3423_v16 = vpop.eup %3422  ;;  %3434 = vpow2.f32 %v1339_v3 }
 0x447   : > { %v3425_v5 = vpop.eup %3424  ;;  %v1679_v25 = vmul.f32 1.442695, %v1563_v60  ;;  %v1681_v62 = vmul.f32 1.442695, %v1564_v57  ;;  %1786 = vadd.xlane.f32.xlu0 %v4824_v45  ;;  %v1489_v2 = vpop.permute.xlu0 %1488  ;;  %v2174_v49 = vpack.c.bf16 %v3423_v16, %v3419_v35 }
 0x448   : > { %v1565_v47 = vsub.f32 %v5581_v7, %v1489_v2  ;;  %v1566_v50 = vsub.f32 %v5582_v14, %v1489_v2  ;;  %v5008_v59 = vpop.permute.xlu1 %2002  ;;  %v2175_v39 = vpack.c.bf16 %v3425_v5, %v3421_v33  ;;  %v5010_v51 = vadd.f32 %v3425_v5, %v3423_v16  ;;  %v5584_v33 = vld [vmem:[#allocation50_spill] sm:$0xff] }
 0x449   : > { %3436 = vpow2.f32 %v1679_v25 }
 0x44a   : > { %3438 = vpow2.f32 %v1681_v62  ;;  %v1683_v61 = vmul.f32 1.442695, %v1565_v47  ;;  %v1685_v37 = vmul.f32 1.442695, %v1566_v50  ;;  %2304 = vmatprep.mubr.bf16.mxu0 %v2175_v39  ;;  %v5585_v47 = vld [vmem:[#allocation51_spill] sm:$0xff]  ;;  %v5586_v50 = vld [vmem:[#allocation52_spill] sm:$0xff] }
 0x44b   : > { %v3427_v3 = vpop.eup %3426  ;;  %1792 = vadd.xlane.f32.xlu0 %v4892_v34  ;;  %2305 = vmatmul.mubr.bf16.gmra.mrb[64].mxu0 %v2174_v49  ;;  %v5013_v45 = vpop.permute.xlu0 %2007 }
 0x44c   : > { %v3429_v35 = vpop.eup %3428  ;;  %3440 = vpow2.f32 %v1683_v61  ;;  %v1494_v60 = vpop.permute.xlu1 %1493 }
 0x44d   : > { %3442 = vpow2.f32 %v1685_v37  ;;  %v1567_v57 = vsub.f32 %v5583_v43, %v1494_v60  ;;  %v1568_v16 = vsub.f32 %v5584_v33, %v1494_v60  ;;  %v5017_v5 = vadd.f32 %v3429_v35, %v3427_v3 }
 0x44e   : > { %v3431_v25 = vpop.eup %3430 }
 0x44f   : > { %v3433_v62 = vpop.eup %3432  ;;  %v1687_v2 = vmul.f32 1.442695, %v1567_v57  ;;  %v1689_v7 = vmul.f32 1.442695, %v1568_v16  ;;  %1798 = vadd.xlane.f32.xlu0 %v4861_v13  ;;  %v1499_v34 = vpop.permute.xlu0 %1498  ;;  %v2176_v49 = vpack.c.bf16 %v3431_v25, %v3427_v3 }
 0x450   : > { %v1569_v14 = vsub.f32 %v5585_v47, %v1499_v34  ;;  %v1570_v39 = vsub.f32 %v5586_v50, %v1499_v34  ;;  %v2177_v61 = vpack.c.bf16 %v3433_v62, %v3429_v35  ;;  %v1842_v37 = vadd.f32 %v3433_v62, %v3431_v25  ;;  %v5022_v6 = vpop.eup %3434 }
 0x451   : > { %3444 = vpow2.f32 %v1687_v2 }
 0x452   : > { %3446 = vpow2.f32 %v1689_v7  ;;  %v1691_v60 = vmul.f32 1.442695, %v1569_v14  ;;  %v1693_v43 = vmul.f32 1.442695, %v1570_v39  ;;  %2312 = vmatprep.mubr.bf16.mxu0 %v2177_v61  ;;  %v5033_v39 = vpop.permute.xlu1 %2082  ;;  %v5587_v61 = vld [vmem:[#allocation53_spill] sm:$0xff] }
 0x453   : > { %v3437_v33 = vpop.eup %3436  ;;  %1804 = vadd.xlane.f32.xlu0 %v4910_v23  ;;  %2092 = vperm.xlu1 %3281, %v5022_v6  }
 0x454   : > { %v3439_v13 = vpop.eup %3438  ;;  %3448 = vpow2.f32 %v1691_v60  ;;  %2313 = vmatmul.mubr.bf16.gmra.mrb[68].mxu0 %v2176_v49  ;;  %v5588_v60 = vld [vmem:[#allocation54_spill] sm:$0xff] }
 0x455   : > { %3450 = vpow2.f32 %v1693_v43  ;;  %v5026_v3 = vadd.f32 %v3439_v13, %v3437_v33 }
 0x456   : > { %v3441_v35 = vpop.eup %3440 }
 0x457   : > { %v3443_v57 = vpop.eup %3442  ;;  %1810 = vadd.xlane.f32.xlu0 %v4936_v10  ;;  %v2178_v16 = vpack.c.bf16 %v3441_v35, %v3437_v33 }
 0x458   : > { %v2179_v25 = vpack.c.bf16 %v3443_v57, %v3439_v13  ;;  %v1848_v62 = vadd.f32 %v3443_v57, %v3441_v35 }
 0x45a   : > { %2320 = vmatprep.mubr.bf16.mxu0 %v2179_v25  ;;  %v5052_v25 = vpop.permute.xlu0 %2087 }
 0x45b   : > { %v3445_v2 = vpop.eup %3444  ;;  %1816 = vadd.xlane.f32.xlu0 %v4967_v4 }
 0x45c   : > { %v3447_v23 = vpop.eup %3446  ;;  %2321 = vmatmul.mubr.bf16.gmra.mrb[72].mxu0 %v2178_v16 }
 0x45d   : > { %v5030_v7 = vadd.f32 %v3447_v23, %v3445_v2 }
 0x45e   : > { %v3449_v34 = vpop.eup %3448 }
 0x45f   : > { %v3451_v49 = vpop.eup %3450  ;;  %1822 = vadd.xlane.f32.xlu0 %v4973_v21  ;;  %v2180_v47 = vpack.c.bf16 %v3449_v34, %v3445_v2  ;;  %v5589_v21 = vsub.f32 %v4680_v24, %v4690_v17 }
 0x460   : > { %v2181_v14 = vpack.c.bf16 %v3451_v49, %v3447_v23  ;;  %v1854_v50 = vadd.f32 %v3451_v49, %v3449_v34  ;;  %v1703_v34 = vld [vmem:[#allocation4] sm:$0xff] }
 0x461   : > { %v1341_v35 = vmul.f32 1.442695, %v5589_v21 }
 0x462   : > { %2328 = vmatprep.mubr.bf16.mxu0 %v2181_v14  ;;  %v1928_v14 = vld [vmem:[#allocation5] sm:$0xff] }
 0x463   : > { %1828 = vadd.xlane.f32.xlu0 %v4983_v31 }
 0x464   : > { %2329 = vmatmul.mubr.bf16.gmra.mrb[76].mxu0 %v2180_v47 }
 0x465   : > { %v1504_v10 = vpop.permute.xlu1 %1503 }
 0x466   : > { %v1571_v4 = vsub.f32 %v5587_v61, %v1504_v10  ;;  %v1572_v43 = vsub.f32 %v5588_v60, %v1504_v10  ;;  %v1706_v61 = vld [vmem:[#allocation4 + $0x18] sm:$0xff] }
 0x467   : > { %1834 = vadd.xlane.f32.xlu0 %v5003_v56 }
 0x468   : > { %v1695_v33 = vmul.f32 1.442695, %v1571_v4  ;;  %v1697_v13 = vmul.f32 1.442695, %v1572_v43  ;;  %v2120_v4 = vmul.f32 %v4881_v36, %v1928_v14 }
 0x469   : > { %v5054_v17 = vpop.permute.xlu1 %2012 }
 0x46a   : > { %3452 = vpow2.f32 %v1695_v33  ;;  %v1708_v33 = vld [vmem:[#allocation4 + $0x28] sm:$0xff] }
 0x46b   : > { %3454 = vpow2.f32 %v1697_v13 }
 0x46c   : > { %3456 = vpow2.f32 %v1341_v35 }
 0x474   : > { %v5042_v57 = vpop.eup %3452 }
 0x475   : > { %v5044_v31 = vpop.eup %3454 }
 0x476   : > { %v1857_v16 = vadd.f32 %v5044_v31, %v5042_v57  ;;  %v5049_v56 = vpop.eup %3456 }
 0x477   : > { %1837 = vadd.xlane.f32.xlu1 %v5010_v51  ;;  %v5590_v51 = vld [vmem:[#allocation65_spill] sm:$0xff] }
 0x47b   : > { %1843 = vadd.xlane.f32.xlu1 %v1842_v37  ;;  %v1735_v37 = vmul.f32 %v5590_v51, %v1703_v34  ;;  %v1740_v51 = vmul.f32 %v4645_v46, %v1708_v33 }
 0x47d   : > { %2097 = vperm.xlu0 %3280, %v5049_v56  }
 0x47f   : > { %1849 = vadd.xlane.f32.xlu1 %v1848_v62 }
 0x483   : > { %1855 = vadd.xlane.f32.xlu1 %v1854_v50  ;;  %v1929_v50 = vld [vmem:[#allocation5 + $0x8] sm:$0xff] }
 0x484   : > { %v2121_v13 = vmul.f32 %v4933_v53, %v1929_v50  ;;  %v1710_v53 = vld [vmem:[#allocation4 + $0x38] sm:$0xff] }
 0x496   : > { %v1509_v24 = vpop.permute.xlu0 %1508 }
 0x497   : > { %v1573_v2 = vsub.f32 %v4404_v38, %v1509_v24  ;;  %v1574_v23 = vsub.f32 %v4408_v27, %v1509_v24  ;;  %v5591_v38 = vld [vmem:[#allocation66_spill] sm:$0xff] }
 0x498   : > { %v1738_v27 = vmul.f32 %v5591_v38, %v1706_v61  ;;  %v5596_v61 = vld [vmem:[#allocation64_spill] sm:$0xff] }
 0x499   : > { %v1699_v49 = vmul.f32 1.442695, %v1573_v2  ;;  %v1701_v47 = vmul.f32 1.442695, %v1574_v23  ;;  %v5592_v2 = vld [vmem:[#allocation58_spill] sm:$0xff]  ;;  %v5593_v23 = vld [vmem:[#allocation60_spill] sm:$0xff] }
 0x49b   : > { %3458 = vpow2.f32 %v1699_v49  ;;  %v1769_v10 = vpop.xlane.xlu1 %1768 }
 0x49c   : > { %3460 = vpow2.f32 %v1701_v47  ;;  %v1863_v62 = vadd.f32 %v1769_v10, %v1735_v37  ;;  %1840 = vadd.xlane.f32.xlu0 %v5017_v5  ;;  %v5594_v5 = vsub.f32 %v5592_v2, %v5593_v23  ;;  %v5595_v10 = vld [vmem:[#allocation62_spill] sm:$0xff] }
 0x49e   : > { %1896 = vst.msk [vmem:[#allocation4] sm:$0xff] %vm728_vm1, %v1863_v62  ;;  %v1313_v34 = vmul.f32 1.442695, %v5594_v5  ;;  %v5597_v62 = vsub.f32 %v5595_v10, %v5596_v61  ;;  %v1718_v10 = vld [vmem:[#allocation4 + $0x78] sm:$0xff] }
 0x49f   : > { %v2218_v60 = vpop.f32.mrb[20].mxu0  ;;  %v1778_v43 = vpop.xlane.xlu1 %1777 }
 0x4a0   : > { %v2345_v21 = vadd.f32 %v2218_v60, %v2120_v4  ;;  %v2220_v35 = vpop.f32.mrb[21].mxu0  ;;  %v1866_v24 = vadd.f32 %v1778_v43, %v1738_v27  ;;  %1846 = vadd.xlane.f32.xlu0 %v5026_v3  ;;  %3462 = vpow2.f32 %v1313_v34  ;;  %v1317_v50 = vmul.f32 1.442695, %v5597_v62  ;;  %v1930_v4 = vld [vmem:[#allocation5 + $0x10] sm:$0xff]  ;;  %v1931_v60 = vld [vmem:[#allocation5 + $0x18] sm:$0xff] }
 0x4a1   : > { %v2221_v49 = vpop.f32.mrb[22].mxu0  ;;  %v1742_v27 = vmul.f32 %v4658_v26, %v1710_v53  ;;  %v2123_v2 = vmul.f32 %v4907_v1, %v1931_v60  ;;  %v1714_v34 = vld [vmem:[#allocation4 + $0x58] sm:$0xff] }
 0x4a2   : > { %2377 = vst.msk [vmem:[#allocation5] sm:$0xff] %vm486_vm0, %v2345_v21  ;;  %v2346_v36 = vadd.f32 %v2221_v49, %v2121_v13  ;;  %v2223_v47 = vpop.f32.mrb[23].mxu0  ;;  %v2122_v21 = vmul.f32 %v4952_v52, %v1930_v4  ;;  %3464 = vpow2.f32 %v1317_v50  ;;  %v1746_v1 = vmul.f32 %v4938_v55, %v1714_v34  ;;  %v1720_v50 = vld [vmem:[#allocation4 + $0x88] sm:$0xff] }
 0x4a3   : > { %1899 = vst.msk [vmem:[#allocation4 + $0x18] sm:$0xff] %vm728_vm1, %v1866_v24  ;;  %v1784_v37 = vpop.xlane.xlu1 %1783 }
 0x4a4   : > { %2378 = vst.msk [vmem:[#allocation5 + $0x8] sm:$0xff] %vm486_vm0, %v2346_v36  ;;  %v1868_v14 = vadd.f32 %v1784_v37, %v1740_v51  ;;  %1852 = vadd.xlane.f32.xlu0 %v5030_v7  ;;  %v1712_v7 = vld [vmem:[#allocation4 + $0x48] sm:$0xff] }
 0x4a5   : > { %v3459_v3 = vpop.eup %3458  ;;  %v1744_v23 = vmul.f32 %v4794_v42, %v1712_v7  ;;  %v2444_v49 = vld [vmem:[#allocation4] sm:$0xff]  ;;  %v1716_v42 = vld [vmem:[#allocation4 + $0x68] sm:$0xff] }
 0x4a6   : > { %v3461_v38 = vpop.eup %3460  ;;  %1901 = vst.msk [vmem:[#allocation4 + $0x28] sm:$0xff] %vm728_vm1, %v1868_v14  ;;  %v2182_v46 = vpack.c.bf16 %v3459_v3, %v5042_v57  ;;  %3466 = vrcp.f32 %v2444_v49  ;;  %v5599_v49 = vld [vmem:[#allocation57_spill] sm:$0xff] }
 0x4a7   : > { %v1790_v43 = vpop.xlane.xlu1 %1789  ;;  %v2183_v33 = vpack.c.bf16 %v3461_v38, %v5044_v31  ;;  %v1860_v13 = vadd.f32 %v3461_v38, %v3459_v3 }
 0x4a8   : > { %v1870_v35 = vadd.f32 %v1790_v43, %v1742_v27  ;;  %1858 = vadd.xlane.f32.xlu0 %v1857_v16  ;;  %v1752_v27 = vmul.f32 %v4736_v32, %v1720_v50  ;;  %v1722_v43 = vld [vmem:[#allocation4 + $0x98] sm:$0xff] }
 0x4a9   : > { %v2226_v24 = vpop.f32.mrb[24].mxu0  ;;  %2336 = vmatprep.mubr.bf16.mxu0 %v2183_v33  ;;  %1861 = vadd.xlane.f32.xlu1 %v1860_v13  ;;  %v1754_v33 = vmul.f32 %v4748_v8, %v1722_v43  ;;  %v5100_v13 = vpop.permute.xlu0 %2017  ;;  %v1707_v8 = vld [vmem:[#allocation4 + $0x20] sm:$0xff] }
 0x4aa   : > { %1903 = vst.msk [vmem:[#allocation4 + $0x38] sm:$0xff] %vm728_vm1, %v1870_v35  ;;  %v2347_v26 = vadd.f32 %v2226_v24, %v2122_v21  ;;  %v2228_v57 = vpop.f32.mrb[25].mxu0  ;;  %2337 = vmatmul.mubr.bf16.gmra.mrb[80].mxu0 %v2182_v46  ;;  %v5088_v47 = vpop.eup %3462  ;;  %v1704_v21 = vld [vmem:[#allocation4 + $0x8] sm:$0xff]  ;;  %v5598_v24 = vld [vmem:[#allocation67_spill] sm:$0xff] }
 0x4ab   : > { %v2229_v31 = vpop.f32.mrb[26].mxu0  ;;  %v1796_v5 = vpop.xlane.xlu1 %1795  ;;  %v1748_v53 = vmul.f32 %v5088_v47, %v1716_v42  ;;  %v1705_v57 = vld [vmem:[#allocation4 + $0x10] sm:$0xff]  ;;  %v1739_v42 = vmul.f32 %v4706_v44, %v1707_v8  ;;  %v1933_v44 = vld [vmem:[#allocation5 + $0x28] sm:$0xff] }
 0x4ac   : > { %2379 = vst.msk [vmem:[#allocation5 + $0x10] sm:$0xff] %vm486_vm0, %v2347_v26  ;;  %v2348_v52 = vadd.f32 %v2229_v31, %v2123_v2  ;;  %v2231_v16 = vpop.f32.mrb[27].mxu0  ;;  %v1872_v36 = vadd.f32 %v1796_v5, %v1744_v23  ;;  %v5092_v14 = vpop.eup %3464  ;;  %v1736_v2 = vmul.f32 %v5598_v24, %v1704_v21  ;;  %v1737_v32 = vmul.f32 %v4687_v9, %v1705_v57  ;;  %v1724_v5 = vld [vmem:[#allocation4 + $0xa8] sm:$0xff] }
 0x4ad   : > { %v1750_v62 = vmul.f32 %v5092_v14, %v1718_v10  ;;  %v2125_v21 = vmul.f32 %v4915_v0, %v1933_v44 }
 0x4ae   : > { %2380 = vst.msk [vmem:[#allocation5 + $0x18] sm:$0xff] %vm486_vm0, %v2348_v52  ;;  %v5600_v52 = vld [vmem:[#allocation59_spill] sm:$0xff] }
 0x4af   : > { %1905 = vst.msk [vmem:[#allocation4 + $0x48] sm:$0xff] %vm728_vm1, %v1872_v36  ;;  %v1802_v51 = vpop.xlane.xlu1 %1801  ;;  %v5601_v16 = vsub.f32 %v5599_v49, %v5600_v52  ;;  %v1935_v52 = vld [vmem:[#allocation5 + $0x38] sm:$0xff] }
 0x4b0   : > { %v1874_v37 = vadd.f32 %v1802_v51, %v1746_v1  ;;  %v3467_v38 = vpop.eup %3466  ;;  %v1756_v1 = vmul.f32 %v4763_v58, %v1724_v5  ;;  %v1934_v5 = vld [vmem:[#allocation5 + $0x30] sm:$0xff] }
 0x4b1   : > { %v1311_v36 = vmul.f32 1.442695, %v5601_v16  ;;  %v2451_v0 = vld [vmem:[#allocation4 + $0x38] sm:$0xff] }
 0x4b2   : > { %1907 = vst.msk [vmem:[#allocation4 + $0x58] sm:$0xff] %vm728_vm1, %v1874_v37  ;;  %v5602_v37 = vld [vmem:[#allocation61_spill] sm:$0xff] }
 0x4b3   : > { %v1808_v3 = vpop.xlane.xlu1 %1807  ;;  %3468 = vpow2.f32 %v1311_v36  ;;  %v1715_v36 = vld [vmem:[#allocation4 + $0x60] sm:$0xff] }
 0x4b4   : > { %v1876_v61 = vadd.f32 %v1808_v3, %v1748_v53  ;;  %v5603_v53 = vld [vmem:[#allocation63_spill] sm:$0xff] }
 0x4b5   : > { %v5604_v3 = vsub.f32 %v5602_v37, %v5603_v53 }
 0x4b6   : > { %1909 = vst.msk [vmem:[#allocation4 + $0x68] sm:$0xff] %vm728_vm1, %v1876_v61 }
 0x4b7   : > { %v1814_v55 = vpop.xlane.xlu1 %1813  ;;  %v1315_v10 = vmul.f32 1.442695, %v5604_v3 }
 0x4b8   : > { %v1878_v4 = vadd.f32 %v1814_v55, %v1750_v62  ;;  %v1709_v62 = vld [vmem:[#allocation4 + $0x30] sm:$0xff] }
 0x4b9   : > { %v1741_v58 = vmul.f32 %v4717_v15, %v1709_v62 }
 0x4ba   : > { %1911 = vst.msk [vmem:[#allocation4 + $0x78] sm:$0xff] %vm728_vm1, %v1878_v4  ;;  %2542 = vperm.xlu1 %3281, %v3467_v38   ;;  %v1932_v4 = vld [vmem:[#allocation5 + $0x20] sm:$0xff]  ;;  %v2447_v38 = vld [vmem:[#allocation4 + $0x18] sm:$0xff] }
 0x4bb   : > { %v1820_v46 = vpop.xlane.xlu1 %1819 }
 0x4bc   : > { %v1880_v60 = vadd.f32 %v1820_v46, %v1752_v27  ;;  %v1711_v46 = vld [vmem:[#allocation4 + $0x40] sm:$0xff] }
 0x4bd   : > { %v1743_v15 = vmul.f32 %v4784_v48, %v1711_v46  ;;  %v5123_v8 = vpop.eup %3468 }
 0x4be   : > { %1913 = vst.msk [vmem:[#allocation4 + $0x88] sm:$0xff] %vm728_vm1, %v1880_v60  ;;  %v2124_v60 = vmul.f32 %v4957_v30, %v1932_v4  ;;  %v1747_v62 = vmul.f32 %v5123_v8, %v1715_v36  ;;  %v1717_v4 = vld [vmem:[#allocation4 + $0x70] sm:$0xff]  ;;  %v1939_v36 = vld [vmem:[#allocation5 + $0x58] sm:$0xff] }
 0x4c3   : > { %v1826_v7 = vpop.xlane.xlu1 %1825 }
 0x4c4   : > { %v1882_v35 = vadd.f32 %v1826_v7, %v1754_v33 }
 0x4c5   : > { %v2461_v46 = vld [vmem:[#allocation4 + $0x88] sm:$0xff] }
 0x4c6   : > { %1915 = vst.msk [vmem:[#allocation4 + $0x98] sm:$0xff] %vm728_vm1, %v1882_v35  ;;  %v2449_v35 = vld [vmem:[#allocation4 + $0x28] sm:$0xff] }
 0x4c7   : > { %v1772_v26 = vpop.xlane.xlu0 %1771 }
 0x4c8   : > { %v1864_v23 = vadd.f32 %v1772_v26, %v1736_v2 }
 0x4ca   : > { %1897 = vst.msk [vmem:[#allocation4 + $0x8] sm:$0xff] %vm728_vm1, %v1864_v23  ;;  %v1713_v23 = vld [vmem:[#allocation4 + $0x50] sm:$0xff] }
 0x4cb   : > { %v1775_v31 = vpop.xlane.xlu0 %1774  ;;  %v1745_v48 = vmul.f32 %v4850_v12, %v1713_v23 }
 0x4cc   : > { %v1865_v34 = vadd.f32 %v1775_v31, %v1737_v32 }
 0x4ce   : > { %1898 = vst.msk [vmem:[#allocation4 + $0x10] sm:$0xff] %vm728_vm1, %v1865_v34 }
 0x4cf   : > { %v1832_v51 = vpop.xlane.xlu1 %1831 }
 0x4d0   : > { %v1884_v9 = vadd.f32 %v1832_v51, %v1756_v1  ;;  %v1781_v61 = vpop.xlane.xlu0 %1780  ;;  %v2126_v1 = vmul.f32 %v4961_v40, %v1934_v5 }
 0x4d1   : > { %v2445_v55 = vld [vmem:[#allocation4 + $0x8] sm:$0xff]  ;;  %v1867_v50 = vadd.f32 %v1781_v61, %v1739_v42 }
 0x4d2   : > { %3470 = vrcp.f32 %v2445_v55  ;;  %1917 = vst.msk [vmem:[#allocation4 + $0xa8] sm:$0xff] %vm728_vm1, %v1884_v9  ;;  %v2453_v9 = vld [vmem:[#allocation4 + $0x48] sm:$0xff] }
 0x4d3   : > { %1900 = vst.msk [vmem:[#allocation4 + $0x20] sm:$0xff] %vm728_vm1, %v1867_v50  ;;  %3472 = vpow2.f32 %v1315_v10  ;;  %v2127_v10 = vmul.f32 %v4931_v63, %v1935_v52  ;;  %v1936_v63 = vld [vmem:[#allocation5 + $0x40] sm:$0xff]  ;;  %v1938_v52 = vld [vmem:[#allocation5 + $0x50] sm:$0xff] }
 0x4d4   : > { %v1787_v27 = vpop.xlane.xlu0 %1786  ;;  %3474 = vrcp.f32 %v2447_v38 }
 0x4d5   : > { %v2446_v43 = vld [vmem:[#allocation4 + $0x10] sm:$0xff]  ;;  %v1869_v33 = vadd.f32 %v1787_v27, %v1741_v58 }
 0x4d6   : > { %3476 = vrcp.f32 %v2446_v43  ;;  %v2234_v7 = vpop.f32.mrb[28].mxu0 }
 0x4d7   : > { %1902 = vst.msk [vmem:[#allocation4 + $0x30] sm:$0xff] %vm728_vm1, %v1869_v33  ;;  %v2349_v24 = vadd.f32 %v2234_v7, %v2124_v60  ;;  %v2236_v2 = vpop.f32.mrb[29].mxu0  ;;  %3478 = vrcp.f32 %v2449_v35  ;;  %v1937_v33 = vld [vmem:[#allocation5 + $0x48] sm:$0xff] }
 0x4d8   : > { %v2237_v26 = vpop.f32.mrb[30].mxu0  ;;  %v1793_v57 = vpop.xlane.xlu0 %1792 }
 0x4d9   : > { %2381 = vst.msk [vmem:[#allocation5 + $0x20] sm:$0xff] %vm486_vm0, %v2349_v24  ;;  %v2350_v30 = vadd.f32 %v2237_v26, %v2125_v21  ;;  %v1871_v32 = vadd.f32 %v1793_v57, %v1743_v15  ;;  %v2239_v31 = vpop.f32.mrb[31].mxu0  ;;  %v1719_v21 = vld [vmem:[#allocation4 + $0x80] sm:$0xff]  ;;  %v2128_v24 = vmul.f32 %v5008_v59, %v1936_v63  ;;  %v2129_v26 = vmul.f32 %v5013_v45, %v1937_v33  ;;  %v2463_v45 = vld [vmem:[#allocation4 + $0x98] sm:$0xff] }
 0x4da   : > { %v2448_v34 = vld [vmem:[#allocation4 + $0x20] sm:$0xff]  ;;  %v2455_v33 = vld [vmem:[#allocation4 + $0x58] sm:$0xff] }
 0x4db   : > { %3480 = vrcp.f32 %v2448_v34  ;;  %2382 = vst.msk [vmem:[#allocation5 + $0x28] sm:$0xff] %vm486_vm0, %v2350_v30  ;;  %v1751_v30 = vmul.f32 %v4734_v22, %v1719_v21  ;;  %v1721_v34 = vld [vmem:[#allocation4 + $0x90] sm:$0xff] }
 0x4dc   : > { %1904 = vst.msk [vmem:[#allocation4 + $0x40] sm:$0xff] %vm728_vm1, %v1871_v32  ;;  %v3471_v49 = vpop.eup %3470  ;;  %v1799_v16 = vpop.xlane.xlu0 %1798  ;;  %3482 = vrcp.f32 %v2451_v0  ;;  %v1753_v22 = vmul.f32 %v4742_v41, %v1721_v34 }
 0x4dd   : > { %v1873_v51 = vadd.f32 %v1799_v16, %v1745_v48  ;;  %2547 = vperm.xlu0 %3280, %v3471_v49   ;;  %v5129_v42 = vpop.eup %3472  ;;  %v5171_v34 = vpop.permute.xlu1 %2092 }
 0x4de   : > { %v2450_v37 = vld [vmem:[#allocation4 + $0x30] sm:$0xff]  ;;  %v2242_v53 = vpop.f32.mrb[32].mxu0  ;;  %v3475_v3 = vpop.eup %3474  ;;  %v1749_v60 = vmul.f32 %v5129_v42, %v1717_v4 }
 0x4df   : > { %3484 = vrcp.f32 %v2450_v37  ;;  %1906 = vst.msk [vmem:[#allocation4 + $0x50] sm:$0xff] %vm728_vm1, %v1873_v51  ;;  %v2351_v12 = vadd.f32 %v2242_v53, %v2126_v1  ;;  %v2244_v61 = vpop.f32.mrb[33].mxu0  ;;  %v1723_v51 = vld [vmem:[#allocation4 + $0xa0] sm:$0xff]  ;;  %v2130_v53 = vmul.f32 %v5054_v17, %v1938_v52 }
 0x4e0   : > { %v3477_v55 = vpop.eup %3476  ;;  %v2245_v40 = vpop.f32.mrb[34].mxu0  ;;  %3486 = vrcp.f32 %v2453_v9  ;;  %v1944_v52 = vld [vmem:[#allocation5 + $0x80] sm:$0xff] }
 0x4e1   : > { %v1805_v50 = vpop.xlane.xlu0 %1804  ;;  %2383 = vst.msk [vmem:[#allocation5 + $0x30] sm:$0xff] %vm486_vm0, %v2351_v12  ;;  %v2352_v38 = vadd.f32 %v2245_v40, %v2127_v10  ;;  %v2247_v44 = vpop.f32.mrb[35].mxu0  ;;  %2557 = vperm.xlu0 %3280, %v3475_v3   ;;  %2552 = vperm.xlu1 %3281, %v3477_v55   ;;  %v5605_v10 = vld [vmem:[#allocation69_spill] sm:$0xff]  ;;  %v1755_v40 = vmul.f32 %v4755_v19, %v1723_v51 }
 0x4e2   : > { %v1875_v58 = vadd.f32 %v1805_v50, %v1747_v62  ;;  %v3479_v43 = vpop.eup %3478  ;;  %v5606_v9 = vsub.f32 %v5605_v10, %v4724_v18  ;;  %v2131_v62 = vmul.f32 %v5100_v13, %v1939_v36  ;;  %v5607_v13 = vld [vmem:[#allocation71_spill] sm:$0xff]  ;;  %v1945_v36 = vld [vmem:[#allocation5 + $0x88] sm:$0xff] }
 0x4e3   : > { %v2452_v27 = vld [vmem:[#allocation4 + $0x40] sm:$0xff]  ;;  %2384 = vst.msk [vmem:[#allocation5 + $0x38] sm:$0xff] %vm486_vm0, %v2352_v38  ;;  %v1725_v38 = vld [vmem:[#allocation4 + $0xb0] sm:$0xff] }
 0x4e4   : > { %3488 = vrcp.f32 %v2452_v27  ;;  %1908 = vst.msk [vmem:[#allocation4 + $0x60] sm:$0xff] %vm728_vm1, %v1875_v58  ;;  %v1345_v12 = vmul.f32 1.442695, %v5606_v9  ;;  %v2465_v27 = vld [vmem:[#allocation4 + $0xa8] sm:$0xff]  ;;  %v1757_v19 = vmul.f32 %v5607_v13, %v1725_v38 }
 0x4e5   : > { %v1811_v7 = vpop.xlane.xlu0 %1810  ;;  %v3481_v35 = vpop.eup %3480  ;;  %2567 = vperm.xlu0 %3280, %v3479_v43   ;;  %3490 = vrcp.f32 %v2461_v46 }
 0x4e6   : > { %v1877_v2 = vadd.f32 %v1811_v7, %v1749_v60  ;;  %v2250_v15 = vpop.f32.mrb[36].mxu0  ;;  %2562 = vperm.xlu1 %3281, %v3481_v35   ;;  %v3483_v32 = vpop.eup %3482  ;;  %3492 = vrcp.f32 %v2463_v45  ;;  %v5611_v45 = vld [vmem:[#allocation72_spill] sm:$0xff] }
 0x4e7   : > { %v2353_v57 = vadd.f32 %v2250_v15, %v2128_v24  ;;  %v2252_v23 = vpop.f32.mrb[37].mxu0  ;;  %3494 = vpow2.f32 %v1345_v12  ;;  %v5608_v15 = vld [vmem:[#allocation68_spill] sm:$0xff]  ;;  %v2137_v12 = vmul.f32 %v4963_v11, %v1945_v36 }
 0x4e8   : > { %1910 = vst.msk [vmem:[#allocation4 + $0x70] sm:$0xff] %vm728_vm1, %v1877_v2  ;;  %v2253_v31 = vpop.f32.mrb[38].mxu0 }
 0x4e9   : > { %v1817_v5 = vpop.xlane.xlu0 %1816  ;;  %v3485_v0 = vpop.eup %3484  ;;  %2385 = vst.msk [vmem:[#allocation5 + $0x40] sm:$0xff] %vm486_vm0, %v2353_v57  ;;  %v2354_v59 = vadd.f32 %v2253_v31, %v2129_v26  ;;  %2577 = vperm.xlu0 %3280, %v3483_v32   ;;  %v5609_v26 = vld [vmem:[#allocation70_spill] sm:$0xff] }
 0x4ea   : > { %v1879_v48 = vadd.f32 %v1817_v5, %v1751_v30  ;;  %v2255_v49 = vpop.f32.mrb[39].mxu0  ;;  %2572 = vperm.xlu1 %3281, %v3485_v0   ;;  %v3487_v16 = vpop.eup %3486  ;;  %v5610_v57 = vsub.f32 %v5608_v15, %v5609_v26 }
 0x4eb   : > { %2386 = vst.msk [vmem:[#allocation5 + $0x48] sm:$0xff] %vm486_vm0, %v2354_v59 }
 0x4ec   : > { %1912 = vst.msk [vmem:[#allocation4 + $0x80] sm:$0xff] %vm728_vm1, %v1879_v48  ;;  %v1343_v23 = vmul.f32 1.442695, %v5610_v57  ;;  %v1726_v48 = vld [vmem:[#allocation4 + $0xb8] sm:$0xff] }
 0x4ed   : > { %v1823_v1 = vpop.xlane.xlu0 %1822  ;;  %2587 = vperm.xlu0 %3280, %v3487_v16  }
 0x4ee   : > { %v3489_v37 = vpop.eup %3488  ;;  %v1881_v3 = vadd.f32 %v1823_v1, %v1753_v22  ;;  %v2258_v61 = vpop.f32.mrb[40].mxu0  ;;  %v1758_v22 = vmul.f32 %v5611_v45, %v1726_v48  ;;  %v2454_v1 = vld [vmem:[#allocation4 + $0x50] sm:$0xff]  ;;  %v1949_v48 = vld [vmem:[#allocation5 + $0xa8] sm:$0xff] }
 0x4ef   : > { %2582 = vperm.xlu1 %3281, %v3489_v37   ;;  %v2355_v41 = vadd.f32 %v2258_v61, %v2130_v53  ;;  %v2260_v55 = vpop.f32.mrb[41].mxu0  ;;  %v3491_v50 = vpop.eup %3490  ;;  %v1728_v37 = vld [vmem:[#allocation4 + $0xc8] sm:$0xff] }
 0x4f0   : > { %1914 = vst.msk [vmem:[#allocation4 + $0x90] sm:$0xff] %vm728_vm1, %v1881_v3  ;;  %v2261_v4 = vpop.f32.mrb[42].mxu0  ;;  %v3493_v21 = vpop.eup %3492  ;;  %v2136_v3 = vmul.f32 %v4965_v28, %v1944_v52 }
 0x4f1   : > { %v1829_v17 = vpop.xlane.xlu0 %1828  ;;  %2387 = vst.msk [vmem:[#allocation5 + $0x50] sm:$0xff] %vm486_vm0, %v2355_v41  ;;  %v2356_v58 = vadd.f32 %v2261_v4, %v2131_v62  ;;  %v2263_v44 = vpop.f32.mrb[43].mxu0  ;;  %2627 = vperm.xlu0 %3280, %v3491_v50   ;;  %v5612_v62 = vld [vmem:[#allocation74_spill] sm:$0xff]  ;;  %v1730_v4 = vld [vmem:[#allocation4 + $0xd8] sm:$0xff] }
 0x4f2   : > { %v1883_v18 = vadd.f32 %v1829_v17, %v1755_v40  ;;  %v1760_v41 = vmul.f32 %v5612_v62, %v1728_v37  ;;  %v1762_v11 = vmul.f32 %v5049_v56, %v1730_v4  ;;  %v1947_v44 = vld [vmem:[#allocation5 + $0x98] sm:$0xff]  ;;  %v2457_v4 = vld [vmem:[#allocation4 + $0x68] sm:$0xff] }
 0x4f3   : > { %v2460_v63 = vld [vmem:[#allocation4 + $0x80] sm:$0xff]  ;;  %2388 = vst.msk [vmem:[#allocation5 + $0x58] sm:$0xff] %vm486_vm0, %v2356_v58 }
 0x4f4   : > { %3496 = vrcp.f32 %v2460_v63  ;;  %1916 = vst.msk [vmem:[#allocation4 + $0xa0] sm:$0xff] %vm728_vm1, %v1883_v18  ;;  %v1946_v18 = vld [vmem:[#allocation5 + $0x90] sm:$0xff] }
 0x4f5   : > { %v1835_v46 = vpop.xlane.xlu0 %1834  ;;  %2027 = vperm.xlu0 %3280, %v5088_v47   ;;  %3498 = vrcp.f32 %v2465_v27  ;;  %v5166_v47 = vpop.eup %3494  ;;  %v1732_v27 = vld [vmem:[#allocation4 + $0xe8] sm:$0xff] }
 0x4f6   : > { %v1885_v60 = vadd.f32 %v1835_v46, %v1757_v19  ;;  %v5158_v43 = vpop.f32.mrb[44].mxu0  ;;  %3500 = vrcp.f32 %v2455_v33  ;;  %v5613_v19 = vld [vmem:[#allocation19_spill] sm:$0xff]  ;;  %v1764_v26 = vmul.f32 %v5166_v47, %v1732_v27 }
 0x4f7   : > { %v2268_v7 = vpop.f32.mrb[45].mxu0  ;;  %v2462_v35 = vld [vmem:[#allocation4 + $0x90] sm:$0xff]  ;;  %v2138_v46 = vmul.f32 %v5613_v19, %v1946_v18 }
 0x4f8   : > { %1918 = vst.msk [vmem:[#allocation4 + $0xb0] sm:$0xff] %vm728_vm1, %v1885_v60  ;;  %v5161_v24 = vpop.f32.mrb[46].mxu0  ;;  %3502 = vrcp.f32 %v2462_v35  ;;  %v5619_v18 = vld [vmem:[#allocation75_spill] sm:$0xff] }
 0x4f9   : > { %v2271_v2 = vpop.f32.mrb[47].mxu0  ;;  %2637 = vperm.xlu0 %3280, %v3493_v21   ;;  %3504 = vpow2.f32 %v1343_v23  ;;  %v5614_v21 = vld [vmem:[#allocation20_spill] sm:$0xff] }
 0x4fa   : > { %v2139_v35 = vmul.f32 %v5614_v21, %v1947_v44  ;;  %v2459_v21 = vld [vmem:[#allocation4 + $0x78] sm:$0xff] }
 0x4fb   : > { %v2464_v0 = vld [vmem:[#allocation4 + $0xa0] sm:$0xff] }
 0x4fc   : > { %3506 = vrcp.f32 %v2464_v0  ;;  %v1948_v0 = vld [vmem:[#allocation5 + $0xa0] sm:$0xff]  ;;  %v2098_v19 = vpop.permute.xlu0 %2097 }
 0x4fd   : > { %2107 = vperm.xlu0 %3280, %v5166_v47   ;;  %3508 = vrcp.f32 %v2454_v1  ;;  %v2140_v45 = vmul.f32 %v4981_v54, %v1948_v0  ;;  %v1951_v54 = vld [vmem:[#allocation5 + $0xb8] sm:$0xff] }
 0x4fe   : > { %v3497_v30 = vpop.eup %3496  ;;  %v5169_v32 = vpop.f32.mrb[48].mxu0 }
 0x4ff   : > { %2622 = vperm.xlu1 %3281, %v3497_v30   ;;  %v2276_v31 = vpop.f32.mrb[49].mxu0  ;;  %v3499_v5 = vpop.eup %3498  ;;  %v2466_v55 = vld [vmem:[#allocation4 + $0xb0] sm:$0xff] }
 0x500   : > { %v5173_v59 = vpop.f32.mrb[50].mxu0  ;;  %v3501_v16 = vpop.eup %3500  ;;  %3510 = vrcp.f32 %v2466_v55 }
 0x501   : > { %v2279_v49 = vpop.f32.mrb[51].mxu0  ;;  %2647 = vperm.xlu0 %3280, %v3499_v5  }
 0x502   : > { %v3503_v53 = vpop.eup %3502 }
 0x503   : > { %2022 = vperm.xlu1 %3281, %v5123_v8   ;;  %v5181_v17 = vpop.eup %3504 }
 0x504   : > { %v1838_v51 = vpop.xlane.xlu1 %1837 }
 0x505   : > { %v1886_v10 = vadd.f32 %v1838_v51, %v1758_v22  ;;  %2597 = vperm.xlu0 %3280, %v3501_v16   ;;  %v5615_v22 = vld [vmem:[#allocation17_spill] sm:$0xff]  ;;  %v5616_v16 = vld [vmem:[#allocation18_spill] sm:$0xff]  ;;  %v2141_v51 = vmul.f32 %v4986_v29, %v1949_v48 }
 0x506   : > { %v2282_v9 = vpop.f32.mrb[52].mxu0  ;;  %v3507_v13 = vpop.eup %3506  ;;  %v5617_v36 = vsub.f32 %v5615_v22, %v5616_v16 }
 0x507   : > { %2632 = vperm.xlu1 %3281, %v3503_v53   ;;  %1919 = vst.msk [vmem:[#allocation4 + $0xb8] sm:$0xff] %vm728_vm1, %v1886_v10  ;;  %v2361_v8 = vadd.f32 %v2282_v9, %v2136_v3  ;;  %v2284_v61 = vpop.f32.mrb[53].mxu0  ;;  %v3509_v23 = vpop.eup %3508 }
 0x508   : > { %v2285_v40 = vpop.f32.mrb[54].mxu0  ;;  %v1844_v50 = vpop.xlane.xlu1 %1843  ;;  %v1349_v1 = vmul.f32 1.442695, %v5617_v36 }
 0x509   : > { %2393 = vst.msk [vmem:[#allocation5 + $0x80] sm:$0xff] %vm486_vm0, %v2361_v8  ;;  %v2362_v28 = vadd.f32 %v2285_v40, %v2137_v12  ;;  %v1888_v38 = vadd.f32 %v1844_v50, %v1760_v41  ;;  %v2287_v58 = vpop.f32.mrb[55].mxu0  ;;  %v1950_v8 = vld [vmem:[#allocation5 + $0xb0] sm:$0xff]  ;;  %v5618_v41 = vld [vmem:[#allocation21_spill] sm:$0xff] }
 0x50a   : > { %v3511_v52 = vpop.eup %3510  ;;  %v2142_v29 = vmul.f32 %v4993_v20, %v1950_v8  ;;  %v2143_v55 = vmul.f32 %v5618_v41, %v1951_v54  ;;  %v1952_v20 = vld [vmem:[#allocation5 + $0xc0] sm:$0xff]  ;;  %v1734_v54 = vld [vmem:[#allocation4 + $0xf8] sm:$0xff] }
 0x50b   : > { %2102 = vperm.xlu1 %3281, %v5181_v17   ;;  %2394 = vst.msk [vmem:[#allocation5 + $0x88] sm:$0xff] %vm486_vm0, %v2362_v28 }
 0x50c   : > { %1921 = vst.msk [vmem:[#allocation4 + $0xc8] sm:$0xff] %vm728_vm1, %v1888_v38  ;;  %v1850_v63 = vpop.xlane.xlu1 %1849 }
 0x50d   : > { %v1890_v60 = vadd.f32 %v1850_v63, %v1762_v11  ;;  %v5620_v11 = vld [vmem:[#allocation76_spill] sm:$0xff] }
 0x50e   : > { %v2467_v33 = vld [vmem:[#allocation4 + $0xb8] sm:$0xff]  ;;  %v2290_v7 = vpop.f32.mrb[56].mxu0  ;;  %v5621_v44 = vsub.f32 %v5619_v18, %v5620_v11  ;;  %v2456_v18 = vld [vmem:[#allocation4 + $0x60] sm:$0xff] }
 0x50f   : > { %2642 = vperm.xlu1 %3281, %v3507_v13   ;;  %3512 = vrcp.f32 %v2467_v33  ;;  %1923 = vst.msk [vmem:[#allocation4 + $0xd8] sm:$0xff] %vm728_vm1, %v1890_v60  ;;  %v2363_v2 = vadd.f32 %v2290_v7, %v2138_v46  ;;  %v2292_v15 = vpop.f32.mrb[57].mxu0  ;;  %v1953_v13 = vld [vmem:[#allocation5 + $0xc8] sm:$0xff]  ;;  %v1727_v46 = vld [vmem:[#allocation4 + $0xc0] sm:$0xff]  ;;  %v2144_v60 = vmul.f32 %v5033_v39, %v1952_v20  ;;  %v1954_v39 = vld [vmem:[#allocation5 + $0xd0] sm:$0xff] }
 0x510   : > { %v2293_v56 = vpop.f32.mrb[58].mxu0  ;;  %v1856_v57 = vpop.xlane.xlu1 %1855  ;;  %v1347_v63 = vmul.f32 1.442695, %v5621_v44  ;;  %v2145_v7 = vmul.f32 %v5052_v25, %v1953_v13  ;;  %v5622_v15 = vld [vmem:[#allocation73_spill] sm:$0xff]  ;;  %v2458_v20 = vld [vmem:[#allocation4 + $0x70] sm:$0xff] }
 0x511   : > { %2395 = vst.msk [vmem:[#allocation5 + $0x90] sm:$0xff] %vm486_vm0, %v2363_v2  ;;  %v2364_v30 = vadd.f32 %v2293_v56, %v2139_v35  ;;  %v1892_v31 = vadd.f32 %v1856_v57, %v1764_v26  ;;  %v2295_v5 = vpop.f32.mrb[59].mxu0  ;;  %v1759_v26 = vmul.f32 %v5622_v15, %v1727_v46  ;;  %v2753_v46 = vld [vmem:[%s5387_s5 + $0x8] sm:$0xff] }
 0x513   : > { %2592 = vperm.xlu1 %3281, %v3509_v23   ;;  %2396 = vst.msk [vmem:[#allocation5 + $0x98] sm:$0xff] %vm486_vm0, %v2364_v30  ;;  %v2469_v49 = vld [vmem:[#allocation4 + $0xc8] sm:$0xff]  ;;  %v1729_v30 = vld [vmem:[#allocation4 + $0xd0] sm:$0xff] }
 0x514   : > { %1925 = vst.msk [vmem:[#allocation4 + $0xe8] sm:$0xff] %vm728_vm1, %v1892_v31  ;;  %3514 = vrcp.f32 %v2469_v49  ;;  %v1761_v25 = vmul.f32 %v5022_v6, %v1729_v30  ;;  %v1955_v49 = vld [vmem:[#allocation5 + $0xd8] sm:$0xff] }
 0x515   : > { %3516 = vpow2.f32 %v1349_v1  ;;  %v2147_v1 = vmul.f32 %v2098_v19, %v1955_v49 }
 0x516   : > { %v2298_v47 = vpop.f32.mrb[60].mxu0  ;;  %v2471_v61 = vld [vmem:[#allocation4 + $0xd8] sm:$0xff] }
 0x517   : > { %2652 = vperm.xlu1 %3281, %v3511_v52   ;;  %v2365_v37 = vadd.f32 %v2298_v47, %v2140_v45  ;;  %v2300_v53 = vpop.f32.mrb[61].mxu0  ;;  %3518 = vrcp.f32 %v2471_v61  ;;  %v1731_v45 = vld [vmem:[#allocation4 + $0xe0] sm:$0xff]  ;;  %v2146_v47 = vmul.f32 %v5171_v34, %v1954_v39  ;;  %v2517_v39 = vld [vmem:[#allocation5 + $0x48] sm:$0xff] }
 0x518   : > { %v2301_v3 = vpop.f32.mrb[62].mxu0  ;;  %3520 = vrcp.f32 %v2457_v4  ;;  %v1763_v53 = vmul.f32 %v5181_v17, %v1731_v45 }
 0x519   : > { %v3513_v10 = vpop.eup %3512  ;;  %2397 = vst.msk [vmem:[#allocation5 + $0xa0] sm:$0xff] %vm486_vm0, %v2365_v37  ;;  %v2366_v9 = vadd.f32 %v2301_v3, %v2141_v51  ;;  %v2303_v12 = vpop.f32.mrb[63].mxu0  ;;  %3522 = vpow2.f32 %v1347_v63 }
 0x51a   : > { %2657 = vperm.xlu0 %3280, %v3513_v10  }
 0x51b   : > { %2032 = vperm.xlu1 %3281, %v5129_v42   ;;  %2398 = vst.msk [vmem:[#allocation5 + $0xa8] sm:$0xff] %vm486_vm0, %v2366_v9  ;;  %v1733_v9 = vld [vmem:[#allocation4 + $0xf0] sm:$0xff] }
 0x51e   : > { %v2306_v62 = vpop.f32.mrb[64].mxu0  ;;  %2037 = vperm.xlu0 %3280, %v5092_v14   ;;  %v3515_v38 = vpop.eup %3514  ;;  %v2473_v14 = vld [vmem:[#allocation4 + $0xe8] sm:$0xff] }
 0x51f   : > { %v2367_v40 = vadd.f32 %v2306_v62, %v2142_v29  ;;  %v2308_v50 = vpop.f32.mrb[65].mxu0  ;;  %v3517_v27 = vpop.eup %3516  ;;  %3524 = vrcp.f32 %v2473_v14 }
 0x520   : > { %v2309_v28 = vpop.f32.mrb[66].mxu0  ;;  %3526 = vrcp.f32 %v2459_v21  ;;  %v1766_v41 = vmul.f32 %v3517_v27, %v1734_v54  ;;  %v2524_v54 = vld [vmem:[#allocation5 + $0x80] sm:$0xff] }
 0x521   : > { %2399 = vst.msk [vmem:[#allocation5 + $0xb0] sm:$0xff] %vm486_vm0, %v2367_v40  ;;  %v2368_v42 = vadd.f32 %v2309_v28, %v2143_v55  ;;  %v2311_v58 = vpop.f32.mrb[67].mxu0  ;;  %v3519_v56 = vpop.eup %3518 }
 0x522   : > { %2667 = vperm.xlu0 %3280, %v3515_v38   ;;  %v3521_v48 = vpop.eup %3520 }
 0x523   : > { %2400 = vst.msk [vmem:[#allocation5 + $0xb8] sm:$0xff] %vm486_vm0, %v2368_v42  ;;  %v3523_v36 = vpop.eup %3522 }
 0x524   : > { %v1765_v29 = vmul.f32 %v3523_v36, %v1733_v9 }
 0x526   : > { %2117 = vperm.xlu0 %3280, %v3517_v27  }
 0x527   : > { %v2314_v33 = vpop.f32.mrb[68].mxu0 }
 0x528   : > { %v2369_v35 = vadd.f32 %v2314_v33, %v2144_v60  ;;  %v2316_v2 = vpop.f32.mrb[69].mxu0  ;;  %v2755_v33 = vld [vmem:[%s5387_s5 + $0x18] sm:$0xff] }
 0x529   : > { %v2317_v57 = vpop.f32.mrb[70].mxu0  ;;  %v1841_v23 = vpop.xlane.xlu0 %1840 }
 0x52a   : > { %2401 = vst.msk [vmem:[#allocation5 + $0xc0] sm:$0xff] %vm486_vm0, %v2369_v35  ;;  %v2370_v31 = vadd.f32 %v2317_v57, %v2145_v7  ;;  %v2319_v5 = vpop.f32.mrb[71].mxu0  ;;  %v1887_v0 = vadd.f32 %v1841_v23, %v1759_v26  ;;  %2677 = vperm.xlu0 %3280, %v3519_v56   ;;  %v3525_v3 = vpop.eup %3524  ;;  %v2752_v35 = vld [vmem:[%s5387_s5] sm:$0xff]  ;;  %v2754_v26 = vld [vmem:[%s5387_s5 + $0x10] sm:$0xff] }
 0x52b   : > { %v3527_v62 = vpop.eup %3526  ;;  %v5245_v56 = vld [vmem:[%s5386_s4] sm:$0xff]  }
 0x52c   : > { %2402 = vst.msk [vmem:[#allocation5 + $0xc8] sm:$0xff] %vm486_vm0, %v2370_v31  ;;  %3154 = vmatprep.mubr.msk.bf16.mxu1 %vm486_vm0, %v5245_v56 }
 0x52d   : > { %1920 = vst.msk [vmem:[#allocation4 + $0xc0] sm:$0xff] %vm728_vm1, %v1887_v0  ;;  %v1847_v52 = vpop.xlane.xlu0 %1846 }
 0x52e   : > { %v1889_v22 = vadd.f32 %v1847_v52, %v1761_v25  ;;  %2607 = vperm.xlu0 %3280, %v3521_v48   ;;  %v2516_v48 = vld [vmem:[#allocation5 + $0x40] sm:$0xff] }
 0x52f   : > { %v2322_v16 = vpop.f32.mrb[72].mxu0 }
 0x530   : > { %1922 = vst.msk [vmem:[#allocation4 + $0xd0] sm:$0xff] %vm728_vm1, %v1889_v22  ;;  %v2371_v51 = vadd.f32 %v2322_v16, %v2146_v47  ;;  %v2324_v37 = vpop.f32.mrb[73].mxu0  ;;  %v1941_v16 = vld [vmem:[#allocation5 + $0x68] sm:$0xff] }
 0x531   : > { %v2325_v10 = vpop.f32.mrb[74].mxu0  ;;  %v1853_v6 = vpop.xlane.xlu0 %1852 }
 0x532   : > { %2403 = vst.msk [vmem:[#allocation5 + $0xd0] sm:$0xff] %vm486_vm0, %v2371_v51  ;;  %v2372_v12 = vadd.f32 %v2325_v10, %v2147_v1  ;;  %v2327_v8 = vpop.f32.mrb[75].mxu0  ;;  %v1891_v34 = vadd.f32 %v1853_v6, %v1763_v53  ;;  %2687 = vperm.xlu0 %3280, %v3525_v3   ;;  %v2509_v53 = vld [vmem:[#allocation5 + $0x8] sm:$0xff]  ;;  %v2508_v6 = vld [vmem:[#allocation5] sm:$0xff] }
 0x533   : > { %v1957_v10 = vld [vmem:[#allocation5 + $0xe8] sm:$0xff] }
 0x534   : > { %v2468_v61 = vld [vmem:[#allocation4 + $0xc0] sm:$0xff]  ;;  %2404 = vst.msk [vmem:[#allocation5 + $0xd8] sm:$0xff] %vm486_vm0, %v2372_v12  ;;  %v2525_v8 = vld [vmem:[#allocation5 + $0x88] sm:$0xff] }
 0x535   : > { %3528 = vrcp.f32 %v2468_v61  ;;  %1924 = vst.msk [vmem:[#allocation4 + $0xe0] sm:$0xff] %vm728_vm1, %v1891_v34  ;;  %v1859_v17 = vpop.xlane.xlu0 %1858 }
 0x536   : > { %v1893_v55 = vadd.f32 %v1859_v17, %v1765_v29  ;;  %v1862_v40 = vpop.xlane.xlu1 %1861  ;;  %2617 = vperm.xlu0 %3280, %v3527_v62  }
 0x537   : > { %v5224_v50 = vpop.f32.mrb[76].mxu0  ;;  %v1894_v4 = vadd.f32 %v1862_v40, %v1766_v41  ;;  %v2470_v38 = vld [vmem:[#allocation4 + $0xd0] sm:$0xff] }
 0x538   : > { %1926 = vst.msk [vmem:[#allocation4 + $0xf0] sm:$0xff] %vm728_vm1, %v1893_v55  ;;  %v2332_v28 = vpop.f32.mrb[77].mxu0  ;;  %3530 = vrcp.f32 %v2470_v38 }
 0x539   : > { %1927 = vst.msk [vmem:[#allocation4 + $0xf8] sm:$0xff] %vm728_vm1, %v1894_v4  ;;  %v5228_v42 = vpop.f32.mrb[78].mxu0  ;;  %3532 = vrcp.f32 %v2456_v18  ;;  %v1940_v4 = vld [vmem:[#allocation5 + $0x60] sm:$0xff]  ;;  %v2511_v18 = vld [vmem:[#allocation5 + $0x18] sm:$0xff] }
 0x53a   : > { %v2335_v58 = vpop.f32.mrb[79].mxu0  ;;  %v2543_v2 = vpop.permute.xlu1 %2542 }
 0x53b   : > { %v2700_v9 = vmul.f32 %v2543_v2, %v2508_v6  ;;  %v2510_v58 = vld [vmem:[#allocation5 + $0x10] sm:$0xff]  ;;  %v2513_v2 = vld [vmem:[#allocation5 + $0x28] sm:$0xff] }
 0x53c   : > { %v2472_v63 = vld [vmem:[#allocation4 + $0xe0] sm:$0xff] }
 0x53f   : > { %v3529_v11 = vpop.eup %3528  ;;  %v2474_v27 = vld [vmem:[#allocation4 + $0xf0] sm:$0xff] }
 0x540   : > { %2662 = vperm.xlu1 %3281, %v3529_v11   ;;  %v2475_v44 = vld [vmem:[#allocation4 + $0xf8] sm:$0xff] }
 0x541   : > { %3534 = vrcp.f32 %v2475_v44 }
 0x542   : > { %3536 = vrcp.f32 %v2472_v63  ;;  %v3531_v14 = vpop.eup %3530 }
 0x543   : > { %3538 = vrcp.f32 %v2458_v20  ;;  %v3533_v13 = vpop.eup %3532 }
 0x544   : > { %2112 = vperm.xlu1 %3281, %v3523_v36   ;;  %3540 = vrcp.f32 %v2474_v27  ;;  %v2527_v27 = vld [vmem:[#allocation5 + $0x98] sm:$0xff] }
 0x548   : > { %2672 = vperm.xlu1 %3281, %v3531_v14  }
 0x54b   : > { %v3535_v19 = vpop.eup %3534 }
 0x54c   : > { %2602 = vperm.xlu1 %3281, %v3533_v13   ;;  %2697 = vperm.xlu0 %3280, %v3535_v19   ;;  %v3537_v60 = vpop.eup %3536  ;;  %v2526_v13 = vld [vmem:[#allocation5 + $0x90] sm:$0xff] }
 0x54d   : > { %v3539_v7 = vpop.eup %3538 }
 0x54e   : > { %v3541_v21 = vpop.eup %3540 }
 0x550   : > { %2682 = vperm.xlu1 %3281, %v3537_v60   ;;  %2763 = vperm.xlu0 %3280, %v2753_v46  }
 0x554   : > { %2612 = vperm.xlu1 %3281, %v3539_v7   ;;  %2773 = vperm.xlu0 %3280, %v2755_v33   ;;  %v1956_v7 = vld [vmem:[#allocation5 + $0xe0] sm:$0xff] }
 0x558   : > { %2692 = vperm.xlu1 %3281, %v3541_v21  }
 0x55c   : > { %2758 = vperm.xlu1 %3281, %v2752_v35   ;;  %v2548_v15 = vpop.permute.xlu0 %2547  ;;  %v2512_v35 = vld [vmem:[#allocation5 + $0x20] sm:$0xff] }
 0x55d   : > { %v2701_v3 = vmul.f32 %v2548_v15, %v2509_v53  ;;  %v2515_v53 = vld [vmem:[#allocation5 + $0x38] sm:$0xff] }
 0x55f   : > { %v2732_v62 = vpack.c.bf16 %v2701_v3, %v2700_v9  ;;  %v1942_v9 = vld [vmem:[#allocation5 + $0x70] sm:$0xff] }
 0x560   : > { %2768 = vperm.xlu1 %3281, %v2754_v26   ;;  %v2553_v57 = vpop.permute.xlu1 %2552  ;;  %v2558_v23 = vpop.permute.xlu0 %2557 }
 0x561   : > { %v2702_v44 = vmul.f32 %v2553_v57, %v2510_v58  ;;  %v2703_v63 = vmul.f32 %v2558_v23, %v2511_v18  ;;  %v2793_v14 = vsel %vm486_vm0, %v2732_v62, 0  ;;  %v1959_v18 = vld [vmem:[#allocation5 + $0xf8] sm:$0xff] }
 0x563   : > { %v2733_v46 = vpack.c.bf16 %v2703_v63, %v2702_v44  ;;  %v2533_v63 = vld [vmem:[#allocation5 + $0xc8] sm:$0xff] }
 0x564   : > { %v2568_v30 = vpop.permute.xlu0 %2567 }
 0x565   : > { %v2563_v31 = vpop.permute.xlu1 %2562  ;;  %v2705_v57 = vmul.f32 %v2568_v30, %v2513_v2 }
 0x566   : > { %v2704_v26 = vmul.f32 %v2563_v31, %v2512_v35 }
 0x568   : > { %v5249_v5 = vpop.permute.xlu0 %2577 }
 0x569   : > { %v5251_v0 = vpop.permute.xlu1 %2572  ;;  %v2707_v6 = vmul.f32 %v5249_v5, %v2515_v53 }
 0x56c   : > { %v2588_v25 = vpop.permute.xlu0 %2587 }
 0x56d   : > { %v5253_v52 = vmul.f32 %v2588_v25, %v2517_v39 }
 0x56e   : > { %v2583_v49 = vpop.permute.xlu1 %2582 }
 0x56f   : > { %v5255_v45 = vmul.f32 %v2583_v49, %v2516_v48  ;;  %v2529_v48 = vld [vmem:[#allocation5 + $0xa8] sm:$0xff]  ;;  %v2528_v49 = vld [vmem:[#allocation5 + $0xa0] sm:$0xff] }
 0x570   : > { %v2628_v22 = vpop.permute.xlu0 %2627 }
 0x571   : > { %v2736_v47 = vpack.c.bf16 %v5253_v52, %v5255_v45  ;;  %v2717_v17 = vmul.f32 %v2628_v22, %v2525_v8 }
 0x574   : > { %v2028_v36 = vpop.permute.xlu0 %2027 }
 0x575   : > { %v2133_v1 = vmul.f32 %v2028_v36, %v1941_v16  ;;  %v2734_v16 = vpack.c.bf16 %v2705_v57, %v2704_v26  ;;  %v2535_v26 = vld [vmem:[#allocation5 + $0xd8] sm:$0xff]  ;;  %v2534_v57 = vld [vmem:[#allocation5 + $0xd0] sm:$0xff] }
 0x577   : > { %v2358_v51 = vadd.f32 %v5161_v24, %v2133_v1  ;;  %v2799_v30 = vsel %vm486_vm0, %v2734_v16, 0 }
 0x578   : > { %v2638_v37 = vpop.permute.xlu0 %2637 }
 0x579   : > { %2390 = vst.msk [vmem:[#allocation5 + $0x68] sm:$0xff] %vm486_vm0, %v2358_v51  ;;  %v2719_v60 = vmul.f32 %v2638_v37, %v2527_v27  ;;  %v2514_v37 = vld [vmem:[#allocation5 + $0x30] sm:$0xff] }
 0x57c   : > { %v2108_v12 = vpop.permute.xlu0 %2107 }
 0x57d   : > { %v5261_v34 = vpop.f32.mrb[80].mxu0  ;;  %v2149_v29 = vmul.f32 %v2108_v12, %v1957_v10  ;;  %v2530_v12 = vld [vmem:[#allocation5 + $0xb0] sm:$0xff] }
 0x57e   : > { %v2623_v61 = vpop.permute.xlu1 %2622  ;;  %v2340_v55 = vpop.f32.mrb[81].mxu0 }
 0x57f   : > { %v2716_v41 = vmul.f32 %v2623_v61, %v2524_v54  ;;  %v2374_v24 = vadd.f32 %v5228_v42, %v2149_v29  ;;  %v5264_v40 = vpop.f32.mrb[82].mxu0  ;;  %v2531_v54 = vld [vmem:[#allocation5 + $0xb8] sm:$0xff] }
 0x580   : > { %v2343_v38 = vpop.f32.mrb[83].mxu0  ;;  %v2648_v39 = vpop.permute.xlu0 %2647  ;;  %v1943_v55 = vld [vmem:[#allocation5 + $0x78] sm:$0xff]  ;;  %v2521_v16 = vld [vmem:[#allocation5 + $0x68] sm:$0xff] }
 0x581   : > { %v2740_v28 = vpack.c.bf16 %v2717_v17, %v2716_v41  ;;  %2406 = vst.msk [vmem:[#allocation5 + $0xe8] sm:$0xff] %vm486_vm0, %v2374_v24  ;;  %v2721_v36 = vmul.f32 %v2648_v39, %v2529_v48 }
 0x582   : > { %v2023_v11 = vpop.permute.xlu1 %2022 }
 0x583   : > { %v2132_v20 = vmul.f32 %v2023_v11, %v1940_v4  ;;  %3198 = vmatprep.subr.msk.bf16.mxu1 %vm486_vm0, %v2740_v28 }
 0x584   : > { %3139 = vmatpush3.bf16.xpose.msra.mxu1 %v2793_v14  ;;  %v2598_v3 = vpop.permute.xlu0 %2597  ;;  %v2532_v14 = vld [vmem:[#allocation5 + $0xc0] sm:$0xff] }
 0x585   : > { %v2357_v42 = vadd.f32 %v5158_v43, %v2132_v20  ;;  %v2796_v43 = vsel %vm486_vm0, %v2733_v46, 0 }
 0x586   : > { %v2633_v19 = vpop.permute.xlu1 %2632 }
 0x587   : > { %2389 = vst.msk [vmem:[#allocation5 + $0x60] sm:$0xff] %vm486_vm0, %v2357_v42  ;;  %v2718_v33 = vmul.f32 %v2633_v19, %v2526_v13  ;;  %v1958_v19 = vld [vmem:[#allocation5 + $0xf0] sm:$0xff] }
 0x589   : > { %v2741_v21 = vpack.c.bf16 %v2719_v60, %v2718_v33  ;;  %v2518_v60 = vld [vmem:[#allocation5 + $0x50] sm:$0xff] }
 0x58a   : > { %v2103_v15 = vpop.permute.xlu1 %2102 }
 0x58b   : > { %v2148_v23 = vmul.f32 %v2103_v15, %v1956_v7  ;;  %3199 = vmatprep.subr.msk.bf16.mxu1 %vm486_vm0, %v2741_v21  ;;  %v2519_v21 = vld [vmem:[#allocation5 + $0x58] sm:$0xff] }
 0x58c   : > { %3141 = vmatpush3.bf16.xpose.msra.mxu1 %v2796_v43  ;;  %v2711_v2 = vmul.f32 %v2598_v3, %v2519_v21 }
 0x58d   : > { %v2373_v25 = vadd.f32 %v5224_v50, %v2148_v23  ;;  %v2706_v50 = vmul.f32 %v5251_v0, %v2514_v37 }
 0x58e   : > { %v2643_v22 = vpop.permute.xlu1 %2642 }
 0x58f   : > { %2405 = vst.msk [vmem:[#allocation5 + $0xe0] sm:$0xff] %vm486_vm0, %v2373_v25  ;;  %v2720_v1 = vmul.f32 %v2643_v22, %v2528_v49  ;;  %v2735_v29 = vpack.c.bf16 %v2707_v6, %v2706_v50  ;;  %v2520_v22 = vld [vmem:[#allocation5 + $0x60] sm:$0xff] }
 0x591   : > { %v2742_v51 = vpack.c.bf16 %v2721_v36, %v2720_v1  ;;  %v2802_v5 = vsel %vm486_vm0, %v2735_v29, 0  ;;  %v2537_v36 = vld [vmem:[#allocation5 + $0xe8] sm:$0xff] }
 0x592   : > { %v2593_v31 = vpop.permute.xlu1 %2592 }
 0x593   : > { %3200 = vmatprep.subr.msk.bf16.mxu1 %vm486_vm0, %v2742_v51  ;;  %v2710_v33 = vmul.f32 %v2593_v31, %v2518_v60 }
 0x594   : > { %3143 = vmatpush3.bf16.xpose.msra.mxu1 %v2799_v30 }
 0x595   : > { %v2737_v43 = vpack.c.bf16 %v2711_v2, %v2710_v33 }
 0x596   : > { %v2653_v10 = vpop.permute.xlu1 %2652  ;;  %v2536_v1 = vld [vmem:[#allocation5 + $0xe0] sm:$0xff] }
 0x597   : > { %v2722_v62 = vmul.f32 %v2653_v10, %v2530_v12 }
 0x599   : > { %v2658_v61 = vpop.permute.xlu0 %2657 }
 0x59a   : > { %v2033_v8 = vpop.permute.xlu1 %2032  ;;  %v2723_v41 = vmul.f32 %v2658_v61, %v2531_v54 }
 0x59b   : > { %v2134_v17 = vmul.f32 %v2033_v8, %v1942_v9 }
 0x59c   : > { %v2743_v4 = vpack.c.bf16 %v2723_v41, %v2722_v62 }
 0x59d   : > { %v2359_v24 = vadd.f32 %v5169_v32, %v2134_v17  ;;  %v2038_v28 = vpop.permute.xlu0 %2037 }
 0x59e   : > { %v2135_v38 = vmul.f32 %v2038_v28, %v1943_v55  ;;  %3201 = vmatprep.subr.msk.bf16.mxu1 %vm486_vm0, %v2743_v4  ;;  %v3285_v28 = vld [vmem:[%s5386_s4 + $0x8] sm:$0xff]  }
 0x59f   : > { %2391 = vst.msk [vmem:[#allocation5 + $0x70] sm:$0xff] %vm486_vm0, %v2359_v24  ;;  %3145 = vmatpush3.bf16.xpose.msra.mxu1 %v2802_v5 }
 0x5a0   : > { %v2360_v0 = vadd.f32 %v5173_v59, %v2135_v38 }
 0x5a1   : > { %v2668_v58 = vpop.permute.xlu0 %2667 }
 0x5a2   : > { %2392 = vst.msk [vmem:[#allocation5 + $0x78] sm:$0xff] %vm486_vm0, %v2360_v0  ;;  %v2725_v27 = vmul.f32 %v2668_v58, %v2533_v63  ;;  %v2894_v0 = vstv %s2893_s0 }
 0x5a5   : > { %v2118_v11 = vpop.permute.xlu0 %2117 }
 0x5a6   : > { %v2151_v44 = vmul.f32 %v2118_v11, %v1959_v18  ;;  %v2522_v10 = vld [vmem:[#allocation5 + $0x70] sm:$0xff] }
 0x5a8   : > { %v2376_v32 = vadd.f32 %v5264_v40, %v2151_v44  ;;  %v2805_v40 = vsel %vm486_vm0, %v2736_v47, 0  ;;  %v2808_v47 = vsel %vm486_vm0, %v2737_v43, 0  ;;  %v2903_v44 = vld [vmem:[%s3918_s24] sm:$0xff] }
 0x5a9   : > { %v2678_v20 = vpop.permute.xlu0 %2677  ;;  %v2523_v12 = vld [vmem:[#allocation5 + $0x78] sm:$0xff] }
 0x5aa   : > { %2408 = vst.msk [vmem:[#allocation5 + $0xf8] sm:$0xff] %vm486_vm0, %v2376_v32  ;;  %v2727_v39 = vmul.f32 %v2678_v20, %v2535_v26 }
 0x5ad   : > { %v2608_v35 = vpop.permute.xlu0 %2607 }
 0x5b1   : > { %v2688_v49 = vpop.permute.xlu0 %2687  ;;  %v2539_v61 = vld [vmem:[#allocation5 + $0xf8] sm:$0xff] }
 0x5b2   : > { %v2729_v31 = vmul.f32 %v2688_v49, %v2537_v36  ;;  %v2910_v36 = vld [vmem:[%s3918_s24 + $0x38] sm:$0xff] }
 0x5b5   : > { %v2618_v53 = vpop.permute.xlu0 %2617 }
 0x5b6   : > { %v2715_v54 = vmul.f32 %v2618_v53, %v2523_v12 }
 0x5bf   : > { %v2663_v42 = vpop.permute.xlu1 %2662 }
 0x5c0   : > { %v2724_v13 = vmul.f32 %v2663_v42, %v2532_v14  ;;  %v2904_v14 = vld [vmem:[%s3918_s24 + $0x8] sm:$0xff] }
 0x5c2   : > { %v2744_v46 = vpack.c.bf16 %v2725_v27, %v2724_v13  ;;  %v2905_v13 = vld [vmem:[%s3918_s24 + $0x10] sm:$0xff] }
 0x5c3   : > { %v2113_v59 = vpop.permute.xlu1 %2112 }
 0x5c4   : > { %v2150_v7 = vmul.f32 %v2113_v59, %v1958_v19  ;;  %3202 = vmatprep.subr.msk.bf16.mxu1 %vm486_vm0, %v2744_v46  ;;  %v2906_v59 = vld [vmem:[%s3918_s24 + $0x18] sm:$0xff] }
 0x5c5   : > { %3147 = vmatpush3.bf16.xpose.msra.mxu1 %v2805_v40 }
 0x5c6   : > { %v2375_v15 = vadd.f32 %v5261_v34, %v2150_v7  ;;  %v2713_v34 = vmul.f32 %v2608_v35, %v2521_v16 }
 0x5c7   : > { %v2673_v23 = vpop.permute.xlu1 %2672 }
 0x5c8   : > { %2407 = vst.msk [vmem:[#allocation5 + $0xf0] sm:$0xff] %vm486_vm0, %v2375_v15  ;;  %v2726_v25 = vmul.f32 %v2673_v23, %v2534_v57  ;;  %v2907_v23 = vld [vmem:[%s3918_s24 + $0x20] sm:$0xff] }
 0x5ca   : > { %v2745_v48 = vpack.c.bf16 %v2727_v39, %v2726_v25 }
 0x5cb   : > { %v2603_v52 = vpop.permute.xlu1 %2602  ;;  %v2698_v8 = vpop.permute.xlu0 %2697 }
 0x5cc   : > { %v2712_v45 = vmul.f32 %v2603_v52, %v2520_v22  ;;  %3203 = vmatprep.subr.msk.bf16.mxu1 %vm486_vm0, %v2745_v48  ;;  %v2731_v17 = vmul.f32 %v2698_v8, %v2539_v61  ;;  %v2908_v48 = vld [vmem:[%s3918_s24 + $0x28] sm:$0xff] }
 0x5cd   : > { %3149 = vmatpush3.bf16.xpose.msra.mxu1 %v2808_v47 }
 0x5ce   : > { %v2738_v30 = vpack.c.bf16 %v2713_v34, %v2712_v45  ;;  %v2909_v45 = vld [vmem:[%s3918_s24 + $0x30] sm:$0xff]  ;;  %s3602_s24 = scalar_lea.vmem %s5330_s20, 1024 }
 0x5cf   : > { %v2683_v51 = vpop.permute.xlu1 %2682  ;;  %v2538_v29 = vld [vmem:[#allocation5 + $0xf0] sm:$0xff]  ;;  %v2764_v11 = vpop.permute.xlu0 %2763  ;;  %p3603_p0 = scmp.ne.s32.totalorder %s5330_s20, %s3602_s24  ;;  %p3610_p10 = scmp.lt.s32.totalorder %s3608_s12, %s3602_s24 }
 0x5d0   : > { %v2728_v37 = vmul.f32 %v2683_v51, %v2536_v1  ;;  %v2811_v9 = vsel %vm486_vm0, %v2738_v30, 0 }
 0x5d1   : > { %p3604_p12 = pnand %p3603_p0, %p5623_p3  ;;  %p3611_p9 = por %p3610_p10, %p3609_p7 }
 0x5d2   : > { %v2746_v3 = vpack.c.bf16 %v2729_v31, %v2728_v37 }
 0x5d3   : > { %v2613_v50 = vpop.permute.xlu1 %2612  ;;  %v2774_v57 = vpop.permute.xlu0 %2773  ;;  %p3605_p13 = pneg %p3604_p12 }
 0x5d4   : > { %v2714_v6 = vmul.f32 %v2613_v50, %v2522_v10  ;;  %3204 = vmatprep.subr.msk.bf16.mxu1 %vm486_vm0, %v2746_v3 }
 0x5d5   : > { %3151 = vmatpush3.bf16.xpose.msra.mxu1 %v2811_v9  ;;  %p3612_p11 = pnand %p3611_p9, %p3605_p13 }
 0x5d6   : > { %v2739_v41 = vpack.c.bf16 %v2715_v54, %v2714_v6 }
 0x5d7   : > { %v2693_v62 = vpop.permute.xlu1 %2692 }
 0x5d8   : > { %v2730_v55 = vmul.f32 %v2693_v62, %v2538_v29  ;;  %v2814_v4 = vsel %vm486_vm0, %v2739_v41, 0 }
 0x5da   : > { %v2747_v24 = vpack.c.bf16 %v2731_v17, %v2730_v55 }
 0x5db   : > { %v2759_v38 = vpop.permute.xlu1 %2758 }
 0x5dc   : > { %3205 = vmatprep.subr.msk.bf16.mxu1 %vm486_vm0, %v2747_v24 }
 0x5dd   : > { %3153 = vmatpush3.bf16.xpose.msra.mxu1 %v2814_v4 }
 0x5df   : > { %v2769_v21 = vpop.permute.xlu1 %2768 }
 0x5e4   : > { %3155 = vmatmul.mubr.msk.bf16.vlgmr.msra.gmra.mrb[76].mxu1 %vm486_vm0, %v5245_v56 }
 0x5e5   : > { %3156 = vmatprep.mubr.msk.bf16.mxu1 %vm486_vm0, %v3285_v28 }
 0x5ec   : > { %3157 = vmatmul.mubr.msk.bf16.gmra.mrb[80].mxu1 %vm486_vm0, %v3285_v28 }
 0x6b7   : > { %v2874_v5 = vpop.f32.mrb[76].mxu1 }
 0x6b8   : > { %v2875_v58 = vadd.f32 %v2874_v5, %v2759_v38  ;;  %v2876_v18 = vpop.f32.mrb[77].mxu1 }
 0x6b9   : > { %v2877_v32 = vadd.f32 %v2876_v18, %v2759_v38  ;;  %v2878_v63 = vpop.f32.mrb[78].mxu1 }
 0x6ba   : > { %v2895_v20 = vmul.f32 %v2894_v0, %v2875_v58  ;;  %v2879_v56 = vadd.f32 %v2878_v63, %v2764_v11  ;;  %v2880_v42 = vpop.f32.mrb[79].mxu1 }
 0x6bb   : > { %v2896_v27 = vmul.f32 %v2894_v0, %v2877_v32  ;;  %v2881_v19 = vadd.f32 %v2880_v42, %v2764_v11 }
 0x6bc   : > { %v2911_v46 = vadd.f32 %v2903_v44, %v2895_v20  ;;  %v2897_v60 = vmul.f32 %v2894_v0, %v2879_v56 }
 0x6bd   : > { %v2912_v33 = vadd.f32 %v2904_v14, %v2896_v27  ;;  %v2898_v7 = vmul.f32 %v2894_v0, %v2881_v19 }
 0x6be   : > { %2919 = vst [vmem:[%s5312_s22] sm:$0xff] %v2911_v46  ;;  %v2913_v40 = vadd.f32 %v2905_v13, %v2897_v60 }
 0x6bf   : > { %2920 = vst [vmem:[%s5312_s22 + $0x8] sm:$0xff] %v2912_v33  ;;  %v2914_v35 = vadd.f32 %v2906_v59, %v2898_v7  ;;  %v2884_v2 = vpop.f32.mrb[80].mxu1 }
 0x6c0   : > { %2921 = vst [vmem:[%s5312_s22 + $0x10] sm:$0xff] %v2913_v40  ;;  %v2885_v15 = vadd.f32 %v2884_v2, %v2769_v21  ;;  %v2886_v26 = vpop.f32.mrb[81].mxu1 }
 0x6c1   : > { %2922 = vst [vmem:[%s5312_s22 + $0x18] sm:$0xff] %v2914_v35  ;;  %v2887_v43 = vadd.f32 %v2886_v26, %v2769_v21  ;;  %v2888_v39 = vpop.f32.mrb[82].mxu1 }
 0x6c2   : > { %v2899_v25 = vmul.f32 %v2894_v0, %v2885_v15  ;;  %v2889_v49 = vadd.f32 %v2888_v39, %v2774_v57  ;;  %v2890_v22 = vpop.f32.mrb[83].mxu1 }
 0x6c3   : > { %v2900_v52 = vmul.f32 %v2894_v0, %v2887_v43  ;;  %v2891_v47 = vadd.f32 %v2890_v22, %v2774_v57 }
 0x6c4   : > { %v2915_v16 = vadd.f32 %v2907_v23, %v2899_v25  ;;  %v2901_v34 = vmul.f32 %v2894_v0, %v2889_v49 }
 0x6c5   : > { %v2916_v1 = vadd.f32 %v2908_v48, %v2900_v52  ;;  %v2902_v51 = vmul.f32 %v2894_v0, %v2891_v47 }
 0x6c6   : > { %2923 = vst [vmem:[%s5312_s22 + $0x20] sm:$0xff] %v2915_v16  ;;  %v2917_v31 = vadd.f32 %v2909_v45, %v2901_v34 }
 0x6c7   : > { %2924 = vst [vmem:[%s5312_s22 + $0x28] sm:$0xff] %v2916_v1  ;;  %v2918_v30 = vadd.f32 %v2910_v36, %v2902_v51 }
 0x6c8   : > { %2925 = vst [vmem:[%s5312_s22 + $0x30] sm:$0xff] %v2917_v31 }
 0x6c9   : > { %2926 = vst [vmem:[%s5312_s22 + $0x38] sm:$0xff] %v2918_v30 }
 0x6ca   : > { %3615 = shalt.err (!%p3612_p11)
}
 0x6cb   : > { %s3616_s13 = scalar_lea.hbm %s5328_s6, 1024  ;;  %s3620_s23 = scalar_lea.hbm %s5389_s7, 2048 }
 0x6cc   : > { %p3617_p1 = scmp.ne.s32.totalorder %s5328_s6, %s3616_s13  ;;  %p3621_p5 = scmp.lt.u32.totalorder %s5328_s6, %s5389_s7 }
 0x6cd   : > { %p3622_p4 = scmp.lt.u32.totalorder %s3620_s23, %s3616_s13  ;;  %p3624_p0 = scmp.lt.u32.totalorder %s3616_s13, %s5328_s6 }
 0x6ce   : > { %p3618_p6 = pnand %p3617_p1, %p5623_p3 }
 0x6cf   : > { %p3623_p8 = por %p3622_p4, %p3621_p5 }
 0x6d0   : > { %p3619_p2 = pneg %p3618_p6 }
 0x6d1   : > { %p3625_p12 = por %p3624_p0, %p3623_p8 }
 0x6d3   : > { %p3626_p13 = pnand %p3625_p12, %p3619_p2 }
 0x6d5   : > { %3629 = shalt.err (!%p3626_p13)
}
 0x6d6   : > { %s3698_s19 = smov 256   ;;  %s3699_s11 = smov 16  }
 0x6d7   : > { %3210 = dma.vmem_to_hbm [thread:$0]  (%p5623_p3), %s5330_s20, 1024, %s5328_s6, %s2928_s29, %s3698_s19, %s3698_s19, %s3699_s11  }
 0x6d8 PF: > { %s2958_s25 = sand.u32 1, %s3668_s26   ;;  %p5624_p7 = scmp.ne.s32.totalorder %s5462_s17, 0 }
 0x6d9   : > { %p5625_p10 = scmp.ge.s32.totalorder %s3688_s8, 2  ;;  %s2959_s24 = scalar_lea.sflag [#allocation9], %s2958_s25 }
 0x6db   : > { %p3220_p9 = pnand %p5625_p10, %p5624_p7 }
 0x6dd   : > { %3663 = dma.done.wait (!%p3220_p9), %s2959_s24, 1024  }
 0x6de   : > { %3665 = vsyncadd (!%p3220_p9), %s2959_s24, 4294966272  ;;  %s27_s8 = sadd.s32 1, %s3688_s8   ;;  %s5626_s15 = sld [smem:[#allocation16_spill]] }
 0x6df   : > { %p24_p11 = scmp.ge.s32.totalorder %s27_s8, 4   ;;  %s5627_s26 = smov %s3672_s27 }
 0x6e0   : > { %s5628_s27 = smov %s3676_s28  ;;  %s5629_s28 = smov %s3799_s16 }
 0x6e1   : > { %s5630_s29 = smov %s3684_s30  ;;  %26 = sbr.rel (!%p24_p11) target bundleno = 11 (0xb), region = 114 }
 0x6e4   : > { %s5631_s30 = smov %s5626_s15 }
 0x6e8   :  { %2964 = vsyncpa [#allocation8], 1 }
 0x6e9   :  { %2966 = vsyncpa [#allocation8 + $0x1], 1 }
 0x6ea   :  { %2967 = vsyncpa [#allocation11], 1 }
 0x6eb   :  { %2969 = vsyncpa [#allocation11 + $0x1], 1 }
 0x6ec   :  { %2970 = vsyncpa [#allocation9], 1 }
 0x6ed   :  { %2972 = vsyncpa [#allocation9 + $0x1], 1 }

</bundles_post_ra>
